<compile_context>
chip_gen: v6e
topology: v6e:2x2x1
jax: 0.10.0
libtpu: 0.0.40
codegen_flags: <defaults>
</compile_context>

<pallas_src>
import math
import functools

import numpy as np
import jax
import jax.numpy as jnp
from jax.experimental import pallas as pl
from jax.experimental.pallas import tpu as pltpu

MAX_SEQ = 1024
NEG_CLAMP, POS_CLAMP = -1e5, 1e5


# ----------------------------------------------------------------------------
# helpers (used both inside kernels and in the XLA reference)
# ----------------------------------------------------------------------------
def _erf(x):
    # Abramowitz & Stegun 7.1.26 polynomial, |err| < 1.5e-7.  Matches the exact
    # erf-form of nn.GELU() without relying on an erf lowering in Mosaic.
    s = jnp.where(x >= 0.0, 1.0, -1.0)
    a = jnp.abs(x)
    t = 1.0 / (1.0 + 0.3275911 * a)
    poly = t * (0.254829592 + t * (-0.284496736 + t * (1.421413741
               + t * (-1.453152027 + t * 1.061405429))))
    return s * (1.0 - poly * jnp.exp(-a * a))


def _gelu(x):
    return 0.5 * x * (1.0 + _erf(x * (1.0 / math.sqrt(2.0))))


def _roll_right_last(x, s):
    """Static circular right-rotation along the last axis (slices + concat)."""
    w = x.shape[-1]
    s = s % w
    if s == 0:
        return x
    return jnp.concatenate([x[..., w - s:], x[..., :w - s]], axis=-1)


# ----------------------------------------------------------------------------
# EnhancedMultiHeadAttention kernel (one batch element per grid step)
# ----------------------------------------------------------------------------
def _mha_kernel(x_ref, wqkv_ref, bqkv_ref, wo_ref, bo_ref, relw_ref, out_ref,
                *, num_heads, dim_head):
    S = x_ref.shape[1]
    H = num_heads * dim_head
    W = 2 * S - 1
    scale = 1.0 / math.sqrt(dim_head)

    x = x_ref[0].astype(jnp.bfloat16)                                   # (S, H)
    # fused Q/K/V projection: a single MXU pass over x
    qkv = (jnp.dot(x, wqkv_ref[...], preferred_element_type=jnp.float32)
           + bqkv_ref[...])                                             # (S, 3H) f32
    q = qkv[:, :H].astype(jnp.bfloat16)
    k = qkv[:, H:2 * H].astype(jnp.bfloat16)
    v = qkv[:, 2 * H:].astype(jnp.bfloat16)
    relw = relw_ref[...]                                                # (2S-1, dh) bf16

    # masks for the per-row "skew" shift, hoisted out of the head loop
    rows = jax.lax.broadcasted_iota(jnp.int32, (S, W), 0)
    nbits = (S - 1).bit_length()
    bit_masks = [(rows & (1 << b)) != 0 for b in range(nbits)]

    ctx_parts = []
    for h in range(num_heads):                                          # static unroll
        sl = slice(h * dim_head, (h + 1) * dim_head)
        qh, kh, vh = q[:, sl], k[:, sl], v[:, sl]                       # (S, dh) bf16

        # content scores (clamped *before* the relative term, as in the reference)
        sc = jax.lax.dot_general(qh, kh, (((1,), (1,)), ((), ())),
                                 preferred_element_type=jnp.float32) * scale
        sc = jnp.clip(sc, NEG_CLAMP, POS_CLAMP)

        # relative-position scores via the skew trick:
        #   m[i, c] = q_i . rel_emb[MAX_SEQ + S - 2 - c]   (MXU matmul)
        #   rel[i, j] = m[i, j + S - 1 - i]                (shifted diagonals)
        # Row i needs a circular right-rotation by (S + i) mod (2S-1): one uniform
        # static roll plus log2(S) masked static rolls for the +i part.
        m = jax.lax.dot_general(qh, relw, (((1,), (1,)), ((), ())),
                                preferred_element_type=jnp.float32)     # (S, 2S-1)
        m = _roll_right_last(m, S % W)
        for b in range(nbits):
            m = jnp.where(bit_masks[b], _roll_right_last(m, 1 << b), m)
        sc = sc + m[:, :S]

        # softmax (mask of ones) + reference renormalisation; dropout = identity
        # (inference).  The renorm also cancels the approx-reciprocal error.
        mx = jnp.max(sc, axis=-1, keepdims=True)
        e = jnp.exp(sc - mx)
        p = e * pl.reciprocal(jnp.sum(e, axis=-1, keepdims=True), approx=True)
        p = p / (jnp.sum(p, axis=-1, keepdims=True) + 1e-8)

        ctx_parts.append(jnp.dot(p.astype(jnp.bfloat16), vh,
                                 preferred_element_type=jnp.float32))   # (S, dh)

    # single output projection, hoisted out of the head loop
    ctx = jnp.concatenate(ctx_parts, axis=-1).astype(jnp.bfloat16)      # (S, H)
    out_ref[0] = (jnp.dot(ctx, wo_ref[...], preferred_element_type=jnp.float32)
                  + bo_ref[...])


def mha_forward(x, p, rel_win, num_heads):
    B, S, H = x.shape
    dh = H // num_heads
    W = 2 * S - 1
    wqkv = jnp.concatenate([p["wq"].T, p["wk"].T, p["wv"].T],
                           axis=1).astype(jnp.bfloat16)                 # (H, 3H)
    bqkv = jnp.concatenate([p["bq"], p["bk"], p["bv"]]).reshape(1, 3 * H)
    kernel = functools.partial(_mha_kernel, num_heads=num_heads, dim_head=dh)
    return pl.pallas_call(
        kernel,
        out_shape=jax.ShapeDtypeStruct((B, S, H), jnp.float32),
        grid=(B,),
        in_specs=[pl.BlockSpec((1, S, H), lambda b: (b, 0, 0)),
                  pl.BlockSpec((H, 3 * H), lambda b: (0, 0)),
                  pl.BlockSpec((1, 3 * H), lambda b: (0, 0)),
                  pl.BlockSpec((H, H), lambda b: (0, 0)),
                  pl.BlockSpec((1, H), lambda b: (0, 0)),
                  pl.BlockSpec((W, dh), lambda b: (0, 0))],
        out_specs=pl.BlockSpec((1, S, H), lambda b: (b, 0, 0)),
        compiler_params=pltpu.CompilerParams(dimension_semantics=("parallel",)),
    )(x, wqkv, bqkv, p["wo"].T.astype(jnp.bfloat16), p["bo"].reshape(1, H),
      rel_win.astype(jnp.bfloat16))


# ----------------------------------------------------------------------------
# rfft amplitude + fft_layer (Linear + GELU): one stacked-DFT matmul
# ----------------------------------------------------------------------------
def _fft_front_kernel(x_ref, dft_ref, w1_ref, b1_ref, out_ref, *, n_freq, f_pad):
    x = (x_ref[0] + 1e-8).astype(jnp.bfloat16)                          # (S, H)
    spec = jnp.dot(dft_ref[...], x, preferred_element_type=jnp.float32)  # (f_pad+F, H)
    re = spec[:n_freq]
    im = spec[f_pad:f_pad + n_freq]                                     # aligned offset
    amp = jnp.sqrt(re * re + im * im + 1e-10)
    y = (jnp.dot(amp.astype(jnp.bfloat16), w1_ref[...],
                 preferred_element_type=jnp.float32) + b1_ref[...])
    out_ref[0] = _gelu(y)


def fft_front_forward(x, dft_stacked, p, n_freq, f_pad):
    B, S, H = x.shape
    R = dft_stacked.shape[0]
    kernel = functools.partial(_fft_front_kernel, n_freq=n_freq, f_pad=f_pad)
    return pl.pallas_call(
        kernel,
        out_shape=jax.ShapeDtypeStruct((B, n_freq, H), jnp.float32),
        grid=(B,),
        in_specs=[pl.BlockSpec((1, S, H), lambda b: (b, 0, 0)),
                  pl.BlockSpec((R, S), lambda b: (0, 0)),
                  pl.BlockSpec((H, H), lambda b: (0, 0)),
                  pl.BlockSpec((1, H), lambda b: (0, 0))],
        out_specs=pl.BlockSpec((1, n_freq, H), lambda b: (b, 0, 0)),
        compiler_params=pltpu.CompilerParams(dimension_semantics=("parallel",)),
    )(x, dft_stacked.astype(jnp.bfloat16), p["w1"].T.astype(jnp.bfloat16),
      p["b1"].reshape(1, H))


# ----------------------------------------------------------------------------
# clamp + irfft + concat-Linear + LayerNorm + GELU + clamp
# (irfft and projection reassociated: Winv @ (f @ W2b))
# ----------------------------------------------------------------------------
def _output_kernel(t_ref, f_ref, winv_ref, w2a_ref, w2b_ref, b2_ref,
                   g_ref, be_ref, out_ref):
    t = t_ref[0].astype(jnp.bfloat16)                                   # (S, H)
    f = jnp.clip(f_ref[0], NEG_CLAMP, POS_CLAMP).astype(jnp.bfloat16)   # (F, H)
    fproj = jnp.dot(f, w2b_ref[...], preferred_element_type=jnp.float32)  # (F, H)
    y = (jnp.dot(t, w2a_ref[...], preferred_element_type=jnp.float32)
         + jnp.dot(winv_ref[...], fproj.astype(jnp.bfloat16),
                   preferred_element_type=jnp.float32)
         + b2_ref[...])
    mean = jnp.mean(y, axis=-1, keepdims=True)
    var = jnp.mean((y - mean) ** 2, axis=-1, keepdims=True)
    yn = (y - mean) * jax.lax.rsqrt(var + 1e-5) * g_ref[...] + be_ref[...]
    out_ref[0] = jnp.clip(_gelu(yn), NEG_CLAMP, POS_CLAMP)


def output_forward(time_out, freq_out, winv, p):
    B, S, H = time_out.shape
    F = freq_out.shape[1]
    w2 = p["w2"]                                   # (H, 2H) as in nn.Linear(2H, H)
    w2a = w2[:, :H].T.astype(jnp.bfloat16)         # acts on time_out
    w2b = w2[:, H:].T.astype(jnp.bfloat16)         # acts on irfft(freq_out)
    return pl.pallas_call(
        _output_kernel,
        out_shape=jax.ShapeDtypeStruct((B, S, H), jnp.float32),
        grid=(B,),
        in_specs=[pl.BlockSpec((1, S, H), lambda b: (b, 0, 0)),
                  pl.BlockSpec((1, F, H), lambda b: (b, 0, 0)),
                  pl.BlockSpec((S, F), lambda b: (0, 0)),
                  pl.BlockSpec((H, H), lambda b: (0, 0)),
                  pl.BlockSpec((H, H), lambda b: (0, 0)),
                  pl.BlockSpec((1, H), lambda b: (0, 0)),
                  pl.BlockSpec((1, H), lambda b: (0, 0)),
                  pl.BlockSpec((1, H), lambda b: (0, 0))],
        out_specs=pl.BlockSpec((1, S, H), lambda b: (b, 0, 0)),
        compiler_params=pltpu.CompilerParams(dimension_semantics=("parallel",)),
    )(time_out, freq_out, winv.astype(jnp.bfloat16), w2a, w2b,
      p["b2"].reshape(1, H), p["gamma"].reshape(1, H), p["beta"].reshape(1, H))


# ----------------------------------------------------------------------------
# glue: rel-window, DFT matrices, parameter init, full forward
# ----------------------------------------------------------------------------
def rel_window(rel_emb, seq_len):
    # R[c] = rel_emb[MAX_SEQ + seq_len - 2 - c],  c in [0, 2*seq_len - 1)
    assert seq_len <= MAX_SEQ
    return jnp.flip(rel_emb[MAX_SEQ - seq_len: MAX_SEQ + seq_len - 1], axis=0)


def dft_matrices(seq_len):
    S = seq_len
    F = S // 2 + 1
    f_pad = ((F + 7) // 8) * 8                 # sublane-aligned offset of sin block
    t = np.arange(S)
    fr = np.arange(F)
    ang = 2.0 * np.pi * np.outer(fr, t) / S
    stacked = np.zeros((f_pad + F, S), np.float32)
    stacked[:F] = np.cos(ang)
    stacked[f_pad:] = np.sin(ang)              # sign irrelevant: only squared
    cf = np.full(F, 2.0)
    cf[0] = 1.0
    if S % 2 == 0:
        cf[-1] = 1.0
    winv = ((cf[None, :] / S)
            * np.cos(2.0 * np.pi * np.outer(t, fr) / S)).astype(np.float32)  # (S, F)
    return jnp.asarray(stacked), jnp.asarray(winv), f_pad


def init_params(hidden, num_heads, seed=42):
    dh = hidden // num_heads
    keys = iter(jax.random.split(jax.random.PRNGKey(seed), 32))

    def linear(out_f, in_f):
        w = jax.random.normal(next(keys), (out_f, in_f), jnp.float32) / np.sqrt(in_f)
        b = jax.random.normal(next(keys), (out_f,), jnp.float32) * 0.01
        return w, b

    def attn_params():
        p = {}
        for name in ("q", "k", "v", "o"):
            w, b = linear(hidden, hidden)
            p["w" + name] = w
            p["b" + name] = b
        # larger-than-xavier scale so the relative-position term visibly affects
        # the output (makes the self-check in __main__ discriminating)
        p["rel_emb"] = (jax.random.normal(next(keys), (2 * MAX_SEQ - 1, dh),
                                          jnp.float32) * 0.5)
        return p

    params = {"time_attn": attn_params(), "freq_attn": attn_params()}
    w1, b1 = linear(hidden, hidden)
    params["fft_layer"] = {"w1": w1, "b1": b1}
    w2, b2 = linear(hidden, 2 * hidden)
    params["output_layer"] = {
        "w2": w2, "b2": b2,
        "gamma": jnp.ones((hidden,), jnp.float32),
        "beta": jnp.zeros((hidden,), jnp.float32),
    }
    return params


def time_frequency_attention(x, params, num_heads):
    B, S, H = x.shape
    n_freq = S // 2 + 1
    dft_stacked, winv, f_pad = dft_matrices(S)

    # time branch
    rel_t = rel_window(params["time_attn"]["rel_emb"], S)
    time_out = mha_forward(x, params["time_attn"], rel_t, num_heads)

    # frequency branch: rfft amplitude + Linear + GELU, attention over F bins
    xft = fft_front_forward(x, dft_stacked, params["fft_layer"], n_freq, f_pad)
    rel_f = rel_window(params["freq_attn"]["rel_emb"], n_freq)
    freq_out = mha_forward(xft, params["freq_attn"], rel_f, num_heads)

    # clamp + irfft + combine + output layer
    return output_forward(time_out, freq_out, winv, params["output_layer"])


# ----------------------------------------------------------------------------
# pure-XLA reference of the PyTorch graph (matmul inputs in bf16 like the MXU)
# ----------------------------------------------------------------------------
def _bf(a):
    return a.astype(jnp.bfloat16)


def _ref_mha(x, p, num_heads):
    B, S, H = x.shape
    dh = H // num_heads

    def lin(a, w, b):
        return jnp.dot(_bf(a), _bf(w.T), preferred_element_type=jnp.float32) + b

    def heads(a):
        return a.reshape(B, S, num_heads, dh).transpose(0, 2, 1, 3)

    q = heads(lin(x, p["wq"], p["bq"]))
    k = heads(lin(x, p["wk"], p["bk"]))
    v = heads(lin(x, p["wv"], p["bv"]))
    sc = jnp.einsum("bhid,bhjd->bhij", _bf(q), _bf(k),
                    preferred_element_type=jnp.float32) * (1.0 / math.sqrt(dh))
    sc = jnp.clip(sc, NEG_CLAMP, POS_CLAMP)
    idx = (jnp.arange(S)[:, None] - jnp.arange(S)[None, :]) + MAX_SEQ - 1
    rel = p["rel_emb"][idx]                                             # (S, S, dh)
    sc = sc + jnp.einsum("bhid,ijd->bhij", _bf(q), _bf(rel),
                         preferred_element_type=jnp.float32)
    e = jnp.exp(sc - sc.max(axis=-1, keepdims=True))
    attn = e / e.sum(axis=-1, keepdims=True)
    attn = attn / (attn.sum(axis=-1, keepdims=True) + 1e-8)
    ctx = jnp.einsum("bhij,bhjd->bhid", _bf(attn), _bf(v),
                     preferred_element_type=jnp.float32)
    ctx = ctx.transpose(0, 2, 1, 3).reshape(B, S, H)
    return lin(ctx, p["wo"], p["bo"])


def reference_forward(x, params, num_heads):
    B, S, H = x.shape
    F = S // 2 + 1
    dft_stacked, winv, f_pad = dft_matrices(S)

    time_out = _ref_mha(x, params["time_attn"], num_heads)

    spec = jnp.einsum("rs,bsh->brh", _bf(dft_stacked), _bf(x + 1e-8),
                      preferred_element_type=jnp.float32)
    amp = jnp.sqrt(spec[:, :F] ** 2 + spec[:, f_pad:f_pad + F] ** 2 + 1e-10)
    pf = params["fft_layer"]
    xft = _gelu(jnp.dot(_bf(amp), _bf(pf["w1"].T),
                        preferred_element_type=jnp.float32) + pf["b1"])

    freq_out = jnp.clip(_ref_mha(xft, params["freq_attn"], num_heads),
                        NEG_CLAMP, POS_CLAMP)
    freq_time = jnp.einsum("sf,bfh->bsh", _bf(winv), _bf(freq_out),
                           preferred_element_type=jnp.float32)

    po = params["output_layer"]
    combined = jnp.concatenate([time_out, freq_time], axis=-1)
    y = (jnp.dot(_bf(combined), _bf(po["w2"].T),
                 preferred_element_type=jnp.float32) + po["b2"])
    mean = y.mean(axis=-1, keepdims=True)
    var = ((y - mean) ** 2).mean(axis=-1, keepdims=True)
    yn = (y - mean) * jax.lax.rsqrt(var + 1e-5) * po["gamma"] + po["beta"]
    return jnp.clip(_gelu(yn), NEG_CLAMP, POS_CLAMP)


if __name__ == "__main__":
    B, S, H, NH = 2, 8, 32, 4
    x = jax.random.normal(jax.random.PRNGKey(0), (B, S, H), jnp.float32)
    params = init_params(H, NH, seed=42)

    fwd = jax.jit(functools.partial(time_frequency_attention, num_heads=NH))
    out = jax.block_until_ready(fwd(x, params))
    assert out.shape == (B, S, H)
    assert bool(jnp.all(jnp.isfinite(out)))

    # sanity: the real-DFT matrices reproduce rfft amplitude / irfft (pure numpy)
    F = S // 2 + 1
    dft_stacked, winv, f_pad = dft_matrices(S)
    xt = np.asarray(jax.random.normal(jax.random.PRNGKey(1), (3, S), jnp.float32))
    spec = xt @ np.asarray(dft_stacked).T
    amp = np.sqrt(spec[:, :F] ** 2 + spec[:, f_pad:f_pad + F] ** 2)
    np.testing.assert_allclose(amp, np.abs(np.fft.rfft(xt, axis=-1)),
                               rtol=1e-4, atol=1e-4)
    g = np.asarray(jax.random.normal(jax.random.PRNGKey(2), (3, F), jnp.float32))
    np.testing.assert_allclose(g @ np.asarray(winv).T,
                               np.fft.irfft(g, n=S, axis=-1), rtol=1e-4, atol=1e-4)

    # end-to-end check against the XLA reference of the module
    ref = np.asarray(reference_forward(x, params, NH))
    np.testing.assert_allclose(np.asarray(out), ref, rtol=5e-2, atol=5e-2)

    print("KERNEL_OK")
</pallas_src>

<mosaic_0001>
module attributes {stable_mosaic.version = 11 : i64} {
  func.func @_fft_front_kernel(%arg0: i32, %arg1: memref<1x8x32xf32, #tpu.memory_space<vmem>>, %arg2: memref<13x8xbf16, #tpu.memory_space<vmem>>, %arg3: memref<32x32xbf16, #tpu.memory_space<vmem>>, %arg4: memref<1x32xf32, #tpu.memory_space<vmem>>, %arg5: memref<1x5x32xf32, #tpu.memory_space<vmem>>) attributes {dimension_semantics = [#tpu.dimension_semantics<parallel>], iteration_bounds = array<i64: 2>, scalar_prefetch = 0 : i64, scratch_operands = 0 : i64, tpu.core_type = #tpu.core_type<tc>, window_params = [{transform_indices = @transform_0, window_bounds = array<i64: 1, 8, 32>}, {pipeline_mode = #tpu.pipeline_mode<synchronous>, transform_indices = @transform_1, window_bounds = array<i64: 13, 8>}, {pipeline_mode = #tpu.pipeline_mode<synchronous>, transform_indices = @transform_2, window_bounds = array<i64: 32, 32>}, {pipeline_mode = #tpu.pipeline_mode<synchronous>, transform_indices = @transform_3, window_bounds = array<i64: 1, 32>}, {transform_indices = @transform_4, window_bounds = array<i64: 1, 5, 32>}]} {
    %c0 = arith.constant 0 : index
    %c0_0 = arith.constant 0 : index
    %c0_1 = arith.constant 0 : index
    %0 = vector.load %arg1[%c0, %c0_0, %c0_1] : memref<1x8x32xf32, #tpu.memory_space<vmem>>, vector<1x8x32xf32>
    %1 = vector.shape_cast %0 : vector<1x8x32xf32> to vector<8x32xf32>
    %cst = arith.constant 9.99999993E-9 : f32
    %2 = vector.broadcast %cst : f32 to vector<8x32xf32>
    %3 = arith.addf %1, %2 : vector<8x32xf32>
    %4 = arith.truncf %3 : vector<8x32xf32> to vector<8x32xbf16>
    %c0_2 = arith.constant 0 : index
    %c0_3 = arith.constant 0 : index
    %5 = vector.load %arg2[%c0_2, %c0_3] : memref<13x8xbf16, #tpu.memory_space<vmem>>, vector<13x8xbf16>
    %cst_4 = arith.constant dense<0.000000e+00> : vector<13x32xf32>
    %6 = tpu.matmul %5, %4, %cst_4 {dimension_numbers = #tpu.dot_dimension_numbers<[1], [0], [0], [1], [0, 0, 1, 1], [], []>} : vector<13x8xbf16>, vector<8x32xbf16>, vector<13x32xf32> -> vector<13x32xf32>
    %7 = vector.extract_strided_slice %6 {offsets = [0, 0], sizes = [5, 32], strides = [1, 1]} : vector<13x32xf32> to vector<5x32xf32>
    %8 = vector.extract_strided_slice %6 {offsets = [8, 0], sizes = [5, 32], strides = [1, 1]} : vector<13x32xf32> to vector<5x32xf32>
    %9 = arith.mulf %7, %7 : vector<5x32xf32>
    %10 = arith.mulf %8, %8 : vector<5x32xf32>
    %11 = arith.addf %9, %10 : vector<5x32xf32>
    %cst_5 = arith.constant 1.000000e-10 : f32
    %12 = vector.broadcast %cst_5 : f32 to vector<5x32xf32>
    %13 = arith.addf %11, %12 : vector<5x32xf32>
    %14 = math.sqrt %13 : vector<5x32xf32>
    %15 = arith.truncf %14 : vector<5x32xf32> to vector<5x32xbf16>
    %c0_6 = arith.constant 0 : index
    %c0_7 = arith.constant 0 : index
    %16 = vector.load %arg3[%c0_6, %c0_7] : memref<32x32xbf16, #tpu.memory_space<vmem>>, vector<32x32xbf16>
    %cst_8 = arith.constant dense<0.000000e+00> : vector<5x32xf32>
    %17 = tpu.matmul %15, %16, %cst_8 {dimension_numbers = #tpu.dot_dimension_numbers<[1], [0], [0], [1], [0, 0, 1, 1], [], []>} : vector<5x32xbf16>, vector<32x32xbf16>, vector<5x32xf32> -> vector<5x32xf32>
    %c0_9 = arith.constant 0 : index
    %c0_10 = arith.constant 0 : index
    %18 = vector.load %arg4[%c0_9, %c0_10] : memref<1x32xf32, #tpu.memory_space<vmem>>, vector<1x32xf32>
    %19 = vector.broadcast %18 : vector<1x32xf32> to vector<5x32xf32>
    %20 = arith.addf %17, %19 : vector<5x32xf32>
    %cst_11 = arith.constant 5.000000e-01 : f32
    %21 = vector.broadcast %cst_11 : f32 to vector<5x32xf32>
    %22 = arith.mulf %21, %20 : vector<5x32xf32>
    %cst_12 = arith.constant 0.707106769 : f32
    %23 = vector.broadcast %cst_12 : f32 to vector<5x32xf32>
    %24 = arith.mulf %20, %23 : vector<5x32xf32>
    %cst_13 = arith.constant 0.000000e+00 : f32
    %25 = vector.broadcast %cst_13 : f32 to vector<5x32xf32>
    %26 = arith.cmpf oge, %24, %25 : vector<5x32xf32>
    %cst_14 = arith.constant 1.000000e+00 : f32
    %cst_15 = arith.constant -1.000000e+00 : f32
    %27 = vector.broadcast %cst_14 : f32 to vector<5x32xf32>
    %28 = vector.broadcast %cst_15 : f32 to vector<5x32xf32>
    %29 = arith.select %26, %27, %28 : vector<5x32xi1>, vector<5x32xf32>
    %30 = math.absf %24 : vector<5x32xf32>
    %cst_16 = arith.constant 0.327591091 : f32
    %31 = vector.broadcast %cst_16 : f32 to vector<5x32xf32>
    %32 = arith.mulf %31, %30 : vector<5x32xf32>
    %cst_17 = arith.constant 1.000000e+00 : f32
    %33 = vector.broadcast %cst_17 : f32 to vector<5x32xf32>
    %34 = arith.addf %33, %32 : vector<5x32xf32>
    %cst_18 = arith.constant 1.000000e+00 : f32
    %35 = vector.broadcast %cst_18 : f32 to vector<5x32xf32>
    %36 = arith.divf %35, %34 : vector<5x32xf32>
    %cst_19 = arith.constant 1.06140542 : f32
    %37 = vector.broadcast %cst_19 : f32 to vector<5x32xf32>
    %38 = arith.mulf %36, %37 : vector<5x32xf32>
    %cst_20 = arith.constant -1.45315206 : f32
    %39 = vector.broadcast %cst_20 : f32 to vector<5x32xf32>
    %40 = arith.addf %39, %38 : vector<5x32xf32>
    %41 = arith.mulf %36, %40 : vector<5x32xf32>
    %cst_21 = arith.constant 1.42141378 : f32
    %42 = vector.broadcast %cst_21 : f32 to vector<5x32xf32>
    %43 = arith.addf %42, %41 : vector<5x32xf32>
    %44 = arith.mulf %36, %43 : vector<5x32xf32>
    %cst_22 = arith.constant -0.284496725 : f32
    %45 = vector.broadcast %cst_22 : f32 to vector<5x32xf32>
    %46 = arith.addf %45, %44 : vector<5x32xf32>
    %47 = arith.mulf %36, %46 : vector<5x32xf32>
    %cst_23 = arith.constant 0.254829586 : f32
    %48 = vector.broadcast %cst_23 : f32 to vector<5x32xf32>
    %49 = arith.addf %48, %47 : vector<5x32xf32>
    %50 = arith.mulf %36, %49 : vector<5x32xf32>
    %cst_24 = arith.constant 0.000000e+00 : f32
    %51 = vector.broadcast %cst_24 : f32 to vector<5x32xf32>
    %52 = arith.subf %51, %30 : vector<5x32xf32>
    %53 = arith.mulf %52, %30 : vector<5x32xf32>
    %54 = math.exp %53 : vector<5x32xf32>
    %55 = arith.mulf %50, %54 : vector<5x32xf32>
    %cst_25 = arith.constant 1.000000e+00 : f32
    %56 = vector.broadcast %cst_25 : f32 to vector<5x32xf32>
    %57 = arith.subf %56, %55 : vector<5x32xf32>
    %58 = arith.mulf %29, %57 : vector<5x32xf32>
    %cst_26 = arith.constant 1.000000e+00 : f32
    %59 = vector.broadcast %cst_26 : f32 to vector<5x32xf32>
    %60 = arith.addf %59, %58 : vector<5x32xf32>
    %61 = arith.mulf %22, %60 : vector<5x32xf32>
    %c0_27 = arith.constant 0 : index
    %c0_28 = arith.constant 0 : index
    %c0_29 = arith.constant 0 : index
    %62 = vector.load %arg5[%c0_27, %c0_28, %c0_29] : memref<1x5x32xf32, #tpu.memory_space<vmem>>, vector<1x5x32xf32>
    %63 = vector.shape_cast %62 : vector<1x5x32xf32> to vector<5x32xf32>
    %64 = vector.shape_cast %61 : vector<5x32xf32> to vector<1x5x32xf32>
    tpu.vector_store %arg5[%c0_27, %c0_28, %c0_29], %64 {strides = array<i32>} : memref<1x5x32xf32, #tpu.memory_space<vmem>>, vector<1x5x32xf32>,
    return
  }
  func.func @transform_0(%arg0: i32) -> (i32, i32, i32) {
    %c0_i32 = arith.constant 0 : i32
    %c0_i32_0 = arith.constant 0 : i32
    %c0_i32_1 = arith.constant 0 : i32
    return %arg0, %c0_i32, %c0_i32_0 : i32, i32, i32
  }
  func.func @transform_1(%arg0: i32) -> (i32, i32) {
    %c0_i32 = arith.constant 0 : i32
    %c0_i32_0 = arith.constant 0 : i32
    %c0_i32_1 = arith.constant 0 : i32
    return %c0_i32, %c0_i32_0 : i32, i32
  }
  func.func @transform_2(%arg0: i32) -> (i32, i32) {
    %c0_i32 = arith.constant 0 : i32
    %c0_i32_0 = arith.constant 0 : i32
    %c0_i32_1 = arith.constant 0 : i32
    return %c0_i32, %c0_i32_0 : i32, i32
  }
  func.func @transform_3(%arg0: i32) -> (i32, i32) {
    %c0_i32 = arith.constant 0 : i32
    %c0_i32_0 = arith.constant 0 : i32
    %c0_i32_1 = arith.constant 0 : i32
    return %c0_i32, %c0_i32_0 : i32, i32
  }
  func.func @transform_4(%arg0: i32) -> (i32, i32, i32) {
    %c0_i32 = arith.constant 0 : i32
    %c0_i32_0 = arith.constant 0 : i32
    %c0_i32_1 = arith.constant 0 : i32
    return %arg0, %c0_i32, %c0_i32_0 : i32, i32, i32
  }
}

module attributes {stable_mosaic.version = 11 : i64} {
  func.func @_mha_kernel(%arg0: i32, %arg1: memref<1x8x32xf32, #tpu.memory_space<vmem>>, %arg2: memref<32x96xbf16, #tpu.memory_space<vmem>>, %arg3: memref<1x96xf32, #tpu.memory_space<vmem>>, %arg4: memref<32x32xbf16, #tpu.memory_space<vmem>>, %arg5: memref<1x32xf32, #tpu.memory_space<vmem>>, %arg6: memref<15x8xbf16, #tpu.memory_space<vmem>>, %arg7: memref<1x8x32xf32, #tpu.memory_space<vmem>>) attributes {dimension_semantics = [#tpu.dimension_semantics<parallel>], iteration_bounds = array<i64: 2>, scalar_prefetch = 0 : i64, scratch_operands = 0 : i64, tpu.core_type = #tpu.core_type<tc>, window_params = [{transform_indices = @transform_0, window_bounds = array<i64: 1, 8, 32>}, {pipeline_mode = #tpu.pipeline_mode<synchronous>, transform_indices = @transform_1, window_bounds = array<i64: 32, 96>}, {pipeline_mode = #tpu.pipeline_mode<synchronous>, transform_indices = @transform_2, window_bounds = array<i64: 1, 96>}, {pipeline_mode = #tpu.pipeline_mode<synchronous>, transform_indices = @transform_3, window_bounds = array<i64: 32, 32>}, {pipeline_mode = #tpu.pipeline_mode<synchronous>, transform_indices = @transform_4, window_bounds = array<i64: 1, 32>}, {pipeline_mode = #tpu.pipeline_mode<synchronous>, transform_indices = @transform_5, window_bounds = array<i64: 15, 8>}, {transform_indices = @transform_6, window_bounds = array<i64: 1, 8, 32>}]} {
    %c0 = arith.constant 0 : index
    %c0_0 = arith.constant 0 : index
    %c0_1 = arith.constant 0 : index
    %0 = vector.load %arg1[%c0, %c0_0, %c0_1] : memref<1x8x32xf32, #tpu.memory_space<vmem>>, vector<1x8x32xf32>
    %1 = vector.shape_cast %0 : vector<1x8x32xf32> to vector<8x32xf32>
    %2 = arith.truncf %1 : vector<8x32xf32> to vector<8x32xbf16>
    %c0_2 = arith.constant 0 : index
    %c0_3 = arith.constant 0 : index
    %3 = vector.load %arg2[%c0_2, %c0_3] : memref<32x96xbf16, #tpu.memory_space<vmem>>, vector<32x96xbf16>
    %cst = arith.constant dense<0.000000e+00> : vector<8x96xf32>
    %4 = tpu.matmul %2, %3, %cst {dimension_numbers = #tpu.dot_dimension_numbers<[1], [0], [0], [1], [0, 0, 1, 1], [], []>} : vector<8x32xbf16>, vector<32x96xbf16>, vector<8x96xf32> -> vector<8x96xf32>
    %c0_4 = arith.constant 0 : index
    %c0_5 = arith.constant 0 : index
    %5 = vector.load %arg3[%c0_4, %c0_5] : memref<1x96xf32, #tpu.memory_space<vmem>>, vector<1x96xf32>
    %6 = vector.broadcast %5 : vector<1x96xf32> to vector<8x96xf32>
    %7 = arith.addf %4, %6 : vector<8x96xf32>
    %8 = vector.extract_strided_slice %7 {offsets = [0, 0], sizes = [8, 32], strides = [1, 1]} : vector<8x96xf32> to vector<8x32xf32>
    %9 = arith.truncf %8 : vector<8x32xf32> to vector<8x32xbf16>
    %10 = vector.extract_strided_slice %7 {offsets = [0, 32], sizes = [8, 32], strides = [1, 1]} : vector<8x96xf32> to vector<8x32xf32>
    %11 = arith.truncf %10 : vector<8x32xf32> to vector<8x32xbf16>
    %12 = vector.extract_strided_slice %7 {offsets = [0, 64], sizes = [8, 32], strides = [1, 1]} : vector<8x96xf32> to vector<8x32xf32>
    %13 = arith.truncf %12 : vector<8x32xf32> to vector<8x32xbf16>
    %c0_6 = arith.constant 0 : index
    %c0_7 = arith.constant 0 : index
    %14 = vector.load %arg6[%c0_6, %c0_7] : memref<15x8xbf16, #tpu.memory_space<vmem>>, vector<15x8xbf16>
    %15 = tpu.iota {dimensions = array<i32: 0>} : vector<8x15xi32>
    %c1_i32 = arith.constant 1 : i32
    %16 = vector.broadcast %c1_i32 : i32 to vector<8x15xi32>
    %17 = arith.andi %15, %16 : vector<8x15xi32>
    %c0_i32 = arith.constant 0 : i32
    %18 = vector.broadcast %c0_i32 : i32 to vector<8x15xi32>
    %19 = arith.cmpi ne, %17, %18 : vector<8x15xi32>
    %c2_i32 = arith.constant 2 : i32
    %20 = vector.broadcast %c2_i32 : i32 to vector<8x15xi32>
    %21 = arith.andi %15, %20 : vector<8x15xi32>
    %c0_i32_8 = arith.constant 0 : i32
    %22 = vector.broadcast %c0_i32_8 : i32 to vector<8x15xi32>
    %23 = arith.cmpi ne, %21, %22 : vector<8x15xi32>
    %c4_i32 = arith.constant 4 : i32
    %24 = vector.broadcast %c4_i32 : i32 to vector<8x15xi32>
    %25 = arith.andi %15, %24 : vector<8x15xi32>
    %c0_i32_9 = arith.constant 0 : i32
    %26 = vector.broadcast %c0_i32_9 : i32 to vector<8x15xi32>
    %27 = arith.cmpi ne, %25, %26 : vector<8x15xi32>
    %28 = vector.extract_strided_slice %9 {offsets = [0, 0], sizes = [8, 8], strides = [1, 1]} : vector<8x32xbf16> to vector<8x8xbf16>
    %29 = vector.extract_strided_slice %11 {offsets = [0, 0], sizes = [8, 8], strides = [1, 1]} : vector<8x32xbf16> to vector<8x8xbf16>
    %30 = vector.extract_strided_slice %13 {offsets = [0, 0], sizes = [8, 8], strides = [1, 1]} : vector<8x32xbf16> to vector<8x8xbf16>
    %cst_10 = arith.constant dense<0.000000e+00> : vector<8x8xf32>
    %31 = tpu.matmul %28, %29, %cst_10 {dimension_numbers = #tpu.dot_dimension_numbers<[1], [1], [0], [0], [0, 0, 1, 0], [], []>} : vector<8x8xbf16>, vector<8x8xbf16>, vector<8x8xf32> -> vector<8x8xf32>
    %cst_11 = arith.constant 0.353553385 : f32
    %32 = vector.broadcast %cst_11 : f32 to vector<8x8xf32>
    %33 = arith.mulf %31, %32 : vector<8x8xf32>
    %cst_12 = arith.constant -1.000000e+05 : f32
    %cst_13 = arith.constant 1.000000e+05 : f32
    %34 = vector.broadcast %cst_12 : f32 to vector<8x8xf32>
    %35 = arith.maximumf %34, %33 : vector<8x8xf32>
    %36 = vector.broadcast %cst_13 : f32 to vector<8x8xf32>
    %37 = arith.minimumf %36, %35 : vector<8x8xf32>
    %cst_14 = arith.constant dense<0.000000e+00> : vector<8x15xf32>
    %38 = tpu.matmul %28, %14, %cst_14 {dimension_numbers = #tpu.dot_dimension_numbers<[1], [1], [0], [0], [0, 0, 1, 0], [], []>} : vector<8x8xbf16>, vector<15x8xbf16>, vector<8x15xf32> -> vector<8x15xf32>
    %39 = vector.extract_strided_slice %38 {offsets = [0, 7], sizes = [8, 8], strides = [1, 1]} : vector<8x15xf32> to vector<8x8xf32>
    %40 = vector.extract_strided_slice %38 {offsets = [0, 0], sizes = [8, 7], strides = [1, 1]} : vector<8x15xf32> to vector<8x7xf32>
    %41 = tpu.concatenate %39, %40 in 1 : vector<8x8xf32>, vector<8x7xf32> -> vector<8x15xf32>
    %42 = vector.extract_strided_slice %41 {offsets = [0, 14], sizes = [8, 1], strides = [1, 1]} : vector<8x15xf32> to vector<8x1xf32>
    %43 = vector.extract_strided_slice %41 {offsets = [0, 0], sizes = [8, 14], strides = [1, 1]} : vector<8x15xf32> to vector<8x14xf32>
    %44 = tpu.concatenate %42, %43 in 1 : vector<8x1xf32>, vector<8x14xf32> -> vector<8x15xf32>
    %45 = arith.select %19, %44, %41 : vector<8x15xi1>, vector<8x15xf32>
    %46 = vector.extract_strided_slice %45 {offsets = [0, 13], sizes = [8, 2], strides = [1, 1]} : vector<8x15xf32> to vector<8x2xf32>
    %47 = vector.extract_strided_slice %45 {offsets = [0, 0], sizes = [8, 13], strides = [1, 1]} : vector<8x15xf32> to vector<8x13xf32>
    %48 = tpu.concatenate %46, %47 in 1 : vector<8x2xf32>, vector<8x13xf32> -> vector<8x15xf32>
    %49 = arith.select %23, %48, %45 : vector<8x15xi1>, vector<8x15xf32>
    %50 = vector.extract_strided_slice %49 {offsets = [0, 11], sizes = [8, 4], strides = [1, 1]} : vector<8x15xf32> to vector<8x4xf32>
    %51 = vector.extract_strided_slice %49 {offsets = [0, 0], sizes = [8, 11], strides = [1, 1]} : vector<8x15xf32> to vector<8x11xf32>
    %52 = tpu.concatenate %50, %51 in 1 : vector<8x4xf32>, vector<8x11xf32> -> vector<8x15xf32>
    %53 = arith.select %27, %52, %49 : vector<8x15xi1>, vector<8x15xf32>
    %54 = vector.extract_strided_slice %53 {offsets = [0, 0], sizes = [8, 8], strides = [1, 1]} : vector<8x15xf32> to vector<8x8xf32>
    %55 = arith.addf %37, %54 : vector<8x8xf32>
    %cst_15 = arith.constant dense<0xFF800000> : vector<8xf32>
    %56 = vector.multi_reduction <maximumf>, %55, %cst_15 [1] : vector<8x8xf32> to vector<8xf32>
    %57 = vector.shape_cast %56 : vector<8xf32> to vector<8x1xf32>
    %58 = vector.broadcast %57 : vector<8x1xf32> to vector<8x8xf32>
    %59 = arith.subf %55, %58 : vector<8x8xf32>
    %60 = math.exp %59 : vector<8x8xf32>
    %cst_16 = arith.constant dense<0.000000e+00> : vector<8xf32>
    %61 = vector.multi_reduction <add>, %60, %cst_16 [1] : vector<8x8xf32> to vector<8xf32>
    %62 = vector.shape_cast %61 : vector<8xf32> to vector<8x1xf32>
    %63 = tpu.reciprocal %62 {approx = true} : vector<8x1xf32> -> vector<8x1xf32>
    %64 = vector.broadcast %63 : vector<8x1xf32> to vector<8x8xf32>
    %65 = arith.mulf %60, %64 : vector<8x8xf32>
    %cst_17 = arith.constant dense<0.000000e+00> : vector<8xf32>
    %66 = vector.multi_reduction <add>, %65, %cst_17 [1] : vector<8x8xf32> to vector<8xf32>
    %67 = vector.shape_cast %66 : vector<8xf32> to vector<8x1xf32>
    %cst_18 = arith.constant 9.99999993E-9 : f32
    %68 = vector.broadcast %cst_18 : f32 to vector<8x1xf32>
    %69 = arith.addf %67, %68 : vector<8x1xf32>
    %70 = vector.broadcast %69 : vector<8x1xf32> to vector<8x8xf32>
    %71 = arith.divf %65, %70 : vector<8x8xf32>
    %72 = arith.truncf %71 : vector<8x8xf32> to vector<8x8xbf16>
    %cst_19 = arith.constant dense<0.000000e+00> : vector<8x8xf32>
    %73 = tpu.matmul %72, %30, %cst_19 {dimension_numbers = #tpu.dot_dimension_numbers<[1], [0], [0], [1], [0, 0, 1, 1], [], []>} : vector<8x8xbf16>, vector<8x8xbf16>, vector<8x8xf32> -> vector<8x8xf32>
    %74 = vector.extract_strided_slice %9 {offsets = [0, 8], sizes = [8, 8], strides = [1, 1]} : vector<8x32xbf16> to vector<8x8xbf16>
    %75 = vector.extract_strided_slice %11 {offsets = [0, 8], sizes = [8, 8], strides = [1, 1]} : vector<8x32xbf16> to vector<8x8xbf16>
    %76 = vector.extract_strided_slice %13 {offsets = [0, 8], sizes = [8, 8], strides = [1, 1]} : vector<8x32xbf16> to vector<8x8xbf16>
    %cst_20 = arith.constant dense<0.000000e+00> : vector<8x8xf32>
    %77 = tpu.matmul %74, %75, %cst_20 {dimension_numbers = #tpu.dot_dimension_numbers<[1], [1], [0], [0], [0, 0, 1, 0], [], []>} : vector<8x8xbf16>, vector<8x8xbf16>, vector<8x8xf32> -> vector<8x8xf32>
    %cst_21 = arith.constant 0.353553385 : f32
    %78 = vector.broadcast %cst_21 : f32 to vector<8x8xf32>
    %79 = arith.mulf %77, %78 : vector<8x8xf32>
    %cst_22 = arith.constant -1.000000e+05 : f32
    %cst_23 = arith.constant 1.000000e+05 : f32
    %80 = vector.broadcast %cst_22 : f32 to vector<8x8xf32>
    %81 = arith.maximumf %80, %79 : vector<8x8xf32>
    %82 = vector.broadcast %cst_23 : f32 to vector<8x8xf32>
    %83 = arith.minimumf %82, %81 : vector<8x8xf32>
    %cst_24 = arith.constant dense<0.000000e+00> : vector<8x15xf32>
    %84 = tpu.matmul %74, %14, %cst_24 {dimension_numbers = #tpu.dot_dimension_numbers<[1], [1], [0], [0], [0, 0, 1, 0], [], []>} : vector<8x8xbf16>, vector<15x8xbf16>, vector<8x15xf32> -> vector<8x15xf32>
    %85 = vector.extract_strided_slice %84 {offsets = [0, 7], sizes = [8, 8], strides = [1, 1]} : vector<8x15xf32> to vector<8x8xf32>
    %86 = vector.extract_strided_slice %84 {offsets = [0, 0], sizes = [8, 7], strides = [1, 1]} : vector<8x15xf32> to vector<8x7xf32>
    %87 = tpu.concatenate %85, %86 in 1 : vector<8x8xf32>, vector<8x7xf32> -> vector<8x15xf32>
    %88 = vector.extract_strided_slice %87 {offsets = [0, 14], sizes = [8, 1], strides = [1, 1]} : vector<8x15xf32> to vector<8x1xf32>
    %89 = vector.extract_strided_slice %87 {offsets = [0, 0], sizes = [8, 14], strides = [1, 1]} : vector<8x15xf32> to vector<8x14xf32>
    %90 = tpu.concatenate %88, %89 in 1 : vector<8x1xf32>, vector<8x14xf32> -> vector<8x15xf32>
    %91 = arith.select %19, %90, %87 : vector<8x15xi1>, vector<8x15xf32>
    %92 = vector.extract_strided_slice %91 {offsets = [0, 13], sizes = [8, 2], strides = [1, 1]} : vector<8x15xf32> to vector<8x2xf32>
    %93 = vector.extract_strided_slice %91 {offsets = [0, 0], sizes = [8, 13], strides = [1, 1]} : vector<8x15xf32> to vector<8x13xf32>
    %94 = tpu.concatenate %92, %93 in 1 : vector<8x2xf32>, vector<8x13xf32> -> vector<8x15xf32>
    %95 = arith.select %23, %94, %91 : vector<8x15xi1>, vector<8x15xf32>
    %96 = vector.extract_strided_slice %95 {offsets = [0, 11], sizes = [8, 4], strides = [1, 1]} : vector<8x15xf32> to vector<8x4xf32>
    %97 = vector.extract_strided_slice %95 {offsets = [0, 0], sizes = [8, 11], strides = [1, 1]} : vector<8x15xf32> to vector<8x11xf32>
    %98 = tpu.concatenate %96, %97 in 1 : vector<8x4xf32>, vector<8x11xf32> -> vector<8x15xf32>
    %99 = arith.select %27, %98, %95 : vector<8x15xi1>, vector<8x15xf32>
    %100 = vector.extract_strided_slice %99 {offsets = [0, 0], sizes = [8, 8], strides = [1, 1]} : vector<8x15xf32> to vector<8x8xf32>
    %101 = arith.addf %83, %100 : vector<8x8xf32>
    %cst_25 = arith.constant dense<0xFF800000> : vector<8xf32>
    %102 = vector.multi_reduction <maximumf>, %101, %cst_25 [1] : vector<8x8xf32> to vector<8xf32>
    %103 = vector.shape_cast %102 : vector<8xf32> to vector<8x1xf32>
    %104 = vector.broadcast %103 : vector<8x1xf32> to vector<8x8xf32>
    %105 = arith.subf %101, %104 : vector<8x8xf32>
    %106 = math.exp %105 : vector<8x8xf32>
    %cst_26 = arith.constant dense<0.000000e+00> : vector<8xf32>
    %107 = vector.multi_reduction <add>, %106, %cst_26 [1] : vector<8x8xf32> to vector<8xf32>
    %108 = vector.shape_cast %107 : vector<8xf32> to vector<8x1xf32>
    %109 = tpu.reciprocal %108 {approx = true} : vector<8x1xf32> -> vector<8x1xf32>
    %110 = vector.broadcast %109 : vector<8x1xf32> to vector<8x8xf32>
    %111 = arith.mulf %106, %110 : vector<8x8xf32>
    %cst_27 = arith.constant dense<0.000000e+00> : vector<8xf32>
    %112 = vector.multi_reduction <add>, %111, %cst_27 [1] : vector<8x8xf32> to vector<8xf32>
    %113 = vector.shape_cast %112 : vector<8xf32> to vector<8x1xf32>
    %cst_28 = arith.constant 9.99999993E-9 : f32
    %114 = vector.broadcast %cst_28 : f32 to vector<8x1xf32>
    %115 = arith.addf %113, %114 : vector<8x1xf32>
    %116 = vector.broadcast %115 : vector<8x1xf32> to vector<8x8xf32>
    %117 = arith.divf %111, %116 : vector<8x8xf32>
    %118 = arith.truncf %117 : vector<8x8xf32> to vector<8x8xbf16>
    %cst_29 = arith.constant dense<0.000000e+00> : vector<8x8xf32>
    %119 = tpu.matmul %118, %76, %cst_29 {dimension_numbers = #tpu.dot_dimension_numbers<[1], [0], [0], [1], [0, 0, 1, 1], [], []>} : vector<8x8xbf16>, vector<8x8xbf16>, vector<8x8xf32> -> vector<8x8xf32>
    %120 = vector.extract_strided_slice %9 {offsets = [0, 16], sizes = [8, 8], strides = [1, 1]} : vector<8x32xbf16> to vector<8x8xbf16>
    %121 = vector.extract_strided_slice %11 {offsets = [0, 16], sizes = [8, 8], strides = [1, 1]} : vector<8x32xbf16> to vector<8x8xbf16>
    %122 = vector.extract_strided_slice %13 {offsets = [0, 16], sizes = [8, 8], strides = [1, 1]} : vector<8x32xbf16> to vector<8x8xbf16>
    %cst_30 = arith.constant dense<0.000000e+00> : vector<8x8xf32>
    %123 = tpu.matmul %120, %121, %cst_30 {dimension_numbers = #tpu.dot_dimension_numbers<[1], [1], [0], [0], [0, 0, 1, 0], [], []>} : vector<8x8xbf16>, vector<8x8xbf16>, vector<8x8xf32> -> vector<8x8xf32>
    %cst_31 = arith.constant 0.353553385 : f32
    %124 = vector.broadcast %cst_31 : f32 to vector<8x8xf32>
    %125 = arith.mulf %123, %124 : vector<8x8xf32>
    %cst_32 = arith.constant -1.000000e+05 : f32
    %cst_33 = arith.constant 1.000000e+05 : f32
    %126 = vector.broadcast %cst_32 : f32 to vector<8x8xf32>
    %127 = arith.maximumf %126, %125 : vector<8x8xf32>
    %128 = vector.broadcast %cst_33 : f32 to vector<8x8xf32>
    %129 = arith.minimumf %128, %127 : vector<8x8xf32>
    %cst_34 = arith.constant dense<0.000000e+00> : vector<8x15xf32>
    %130 = tpu.matmul %120, %14, %cst_34 {dimension_numbers = #tpu.dot_dimension_numbers<[1], [1], [0], [0], [0, 0, 1, 0], [], []>} : vector<8x8xbf16>, vector<15x8xbf16>, vector<8x15xf32> -> vector<8x15xf32>
    %131 = vector.extract_strided_slice %130 {offsets = [0, 7], sizes = [8, 8], strides = [1, 1]} : vector<8x15xf32> to vector<8x8xf32>
    %132 = vector.extract_strided_slice %130 {offsets = [0, 0], sizes = [8, 7], strides = [1, 1]} : vector<8x15xf32> to vector<8x7xf32>
    %133 = tpu.concatenate %131, %132 in 1 : vector<8x8xf32>, vector<8x7xf32> -> vector<8x15xf32>
    %134 = vector.extract_strided_slice %133 {offsets = [0, 14], sizes = [8, 1], strides = [1, 1]} : vector<8x15xf32> to vector<8x1xf32>
    %135 = vector.extract_strided_slice %133 {offsets = [0, 0], sizes = [8, 14], strides = [1, 1]} : vector<8x15xf32> to vector<8x14xf32>
    %136 = tpu.concatenate %134, %135 in 1 : vector<8x1xf32>, vector<8x14xf32> -> vector<8x15xf32>
    %137 = arith.select %19, %136, %133 : vector<8x15xi1>, vector<8x15xf32>
    %138 = vector.extract_strided_slice %137 {offsets = [0, 13], sizes = [8, 2], strides = [1, 1]} : vector<8x15xf32> to vector<8x2xf32>
    %139 = vector.extract_strided_slice %137 {offsets = [0, 0], sizes = [8, 13], strides = [1, 1]} : vector<8x15xf32> to vector<8x13xf32>
    %140 = tpu.concatenate %138, %139 in 1 : vector<8x2xf32>, vector<8x13xf32> -> vector<8x15xf32>
    %141 = arith.select %23, %140, %137 : vector<8x15xi1>, vector<8x15xf32>
    %142 = vector.extract_strided_slice %141 {offsets = [0, 11], sizes = [8, 4], strides = [1, 1]} : vector<8x15xf32> to vector<8x4xf32>
    %143 = vector.extract_strided_slice %141 {offsets = [0, 0], sizes = [8, 11], strides = [1, 1]} : vector<8x15xf32> to vector<8x11xf32>
    %144 = tpu.concatenate %142, %143 in 1 : vector<8x4xf32>, vector<8x11xf32> -> vector<8x15xf32>
    %145 = arith.select %27, %144, %141 : vector<8x15xi1>, vector<8x15xf32>
    %146 = vector.extract_strided_slice %145 {offsets = [0, 0], sizes = [8, 8], strides = [1, 1]} : vector<8x15xf32> to vector<8x8xf32>
    %147 = arith.addf %129, %146 : vector<8x8xf32>
    %cst_35 = arith.constant dense<0xFF800000> : vector<8xf32>
    %148 = vector.multi_reduction <maximumf>, %147, %cst_35 [1] : vector<8x8xf32> to vector<8xf32>
    %149 = vector.shape_cast %148 : vector<8xf32> to vector<8x1xf32>
    %150 = vector.broadcast %149 : vector<8x1xf32> to vector<8x8xf32>
    %151 = arith.subf %147, %150 : vector<8x8xf32>
    %152 = math.exp %151 : vector<8x8xf32>
    %cst_36 = arith.constant dense<0.000000e+00> : vector<8xf32>
    %153 = vector.multi_reduction <add>, %152, %cst_36 [1] : vector<8x8xf32> to vector<8xf32>
    %154 = vector.shape_cast %153 : vector<8xf32> to vector<8x1xf32>
    %155 = tpu.reciprocal %154 {approx = true} : vector<8x1xf32> -> vector<8x1xf32>
    %156 = vector.broadcast %155 : vector<8x1xf32> to vector<8x8xf32>
    %157 = arith.mulf %152, %156 : vector<8x8xf32>
    %cst_37 = arith.constant dense<0.000000e+00> : vector<8xf32>
    %158 = vector.multi_reduction <add>, %157, %cst_37 [1] : vector<8x8xf32> to vector<8xf32>
    %159 = vector.shape_cast %158 : vector<8xf32> to vector<8x1xf32>
    %cst_38 = arith.constant 9.99999993E-9 : f32
    %160 = vector.broadcast %cst_38 : f32 to vector<8x1xf32>
    %161 = arith.addf %159, %160 : vector<8x1xf32>
    %162 = vector.broadcast %161 : vector<8x1xf32> to vector<8x8xf32>
    %163 = arith.divf %157, %162 : vector<8x8xf32>
    %164 = arith.truncf %163 : vector<8x8xf32> to vector<8x8xbf16>
    %cst_39 = arith.constant dense<0.000000e+00> : vector<8x8xf32>
    %165 = tpu.matmul %164, %122, %cst_39 {dimension_numbers = #tpu.dot_dimension_numbers<[1], [0], [0], [1], [0, 0, 1, 1], [], []>} : vector<8x8xbf16>, vector<8x8xbf16>, vector<8x8xf32> -> vector<8x8xf32>
    %166 = vector.extract_strided_slice %9 {offsets = [0, 24], sizes = [8, 8], strides = [1, 1]} : vector<8x32xbf16> to vector<8x8xbf16>
    %167 = vector.extract_strided_slice %11 {offsets = [0, 24], sizes = [8, 8], strides = [1, 1]} : vector<8x32xbf16> to vector<8x8xbf16>
    %168 = vector.extract_strided_slice %13 {offsets = [0, 24], sizes = [8, 8], strides = [1, 1]} : vector<8x32xbf16> to vector<8x8xbf16>
    %cst_40 = arith.constant dense<0.000000e+00> : vector<8x8xf32>
    %169 = tpu.matmul %166, %167, %cst_40 {dimension_numbers = #tpu.dot_dimension_numbers<[1], [1], [0], [0], [0, 0, 1, 0], [], []>} : vector<8x8xbf16>, vector<8x8xbf16>, vector<8x8xf32> -> vector<8x8xf32>
    %cst_41 = arith.constant 0.353553385 : f32
    %170 = vector.broadcast %cst_41 : f32 to vector<8x8xf32>
    %171 = arith.mulf %169, %170 : vector<8x8xf32>
    %cst_42 = arith.constant -1.000000e+05 : f32
    %cst_43 = arith.constant 1.000000e+05 : f32
    %172 = vector.broadcast %cst_42 : f32 to vector<8x8xf32>
    %173 = arith.maximumf %172, %171 : vector<8x8xf32>
    %174 = vector.broadcast %cst_43 : f32 to vector<8x8xf32>
    %175 = arith.minimumf %174, %173 : vector<8x8xf32>
    %cst_44 = arith.constant dense<0.000000e+00> : vector<8x15xf32>
    %176 = tpu.matmul %166, %14, %cst_44 {dimension_numbers = #tpu.dot_dimension_numbers<[1], [1], [0], [0], [0, 0, 1, 0], [], []>} : vector<8x8xbf16>, vector<15x8xbf16>, vector<8x15xf32> -> vector<8x15xf32>
    %177 = vector.extract_strided_slice %176 {offsets = [0, 7], sizes = [8, 8], strides = [1, 1]} : vector<8x15xf32> to vector<8x8xf32>
    %178 = vector.extract_strided_slice %176 {offsets = [0, 0], sizes = [8, 7], strides = [1, 1]} : vector<8x15xf32> to vector<8x7xf32>
    %179 = tpu.concatenate %177, %178 in 1 : vector<8x8xf32>, vector<8x7xf32> -> vector<8x15xf32>
    %180 = vector.extract_strided_slice %179 {offsets = [0, 14], sizes = [8, 1], strides = [1, 1]} : vector<8x15xf32> to vector<8x1xf32>
    %181 = vector.extract_strided_slice %179 {offsets = [0, 0], sizes = [8, 14], strides = [1, 1]} : vector<8x15xf32> to vector<8x14xf32>
    %182 = tpu.concatenate %180, %181 in 1 : vector<8x1xf32>, vector<8x14xf32> -> vector<8x15xf32>
    %183 = arith.select %19, %182, %179 : vector<8x15xi1>, vector<8x15xf32>
    %184 = vector.extract_strided_slice %183 {offsets = [0, 13], sizes = [8, 2], strides = [1, 1]} : vector<8x15xf32> to vector<8x2xf32>
    %185 = vector.extract_strided_slice %183 {offsets = [0, 0], sizes = [8, 13], strides = [1, 1]} : vector<8x15xf32> to vector<8x13xf32>
    %186 = tpu.concatenate %184, %185 in 1 : vector<8x2xf32>, vector<8x13xf32> -> vector<8x15xf32>
    %187 = arith.select %23, %186, %183 : vector<8x15xi1>, vector<8x15xf32>
    %188 = vector.extract_strided_slice %187 {offsets = [0, 11], sizes = [8, 4], strides = [1, 1]} : vector<8x15xf32> to vector<8x4xf32>
    %189 = vector.extract_strided_slice %187 {offsets = [0, 0], sizes = [8, 11], strides = [1, 1]} : vector<8x15xf32> to vector<8x11xf32>
    %190 = tpu.concatenate %188, %189 in 1 : vector<8x4xf32>, vector<8x11xf32> -> vector<8x15xf32>
    %191 = arith.select %27, %190, %187 : vector<8x15xi1>, vector<8x15xf32>
    %192 = vector.extract_strided_slice %191 {offsets = [0, 0], sizes = [8, 8], strides = [1, 1]} : vector<8x15xf32> to vector<8x8xf32>
    %193 = arith.addf %175, %192 : vector<8x8xf32>
    %cst_45 = arith.constant dense<0xFF800000> : vector<8xf32>
    %194 = vector.multi_reduction <maximumf>, %193, %cst_45 [1] : vector<8x8xf32> to vector<8xf32>
    %195 = vector.shape_cast %194 : vector<8xf32> to vector<8x1xf32>
    %196 = vector.broadcast %195 : vector<8x1xf32> to vector<8x8xf32>
    %197 = arith.subf %193, %196 : vector<8x8xf32>
    %198 = math.exp %197 : vector<8x8xf32>
    %cst_46 = arith.constant dense<0.000000e+00> : vector<8xf32>
    %199 = vector.multi_reduction <add>, %198, %cst_46 [1] : vector<8x8xf32> to vector<8xf32>
    %200 = vector.shape_cast %199 : vector<8xf32> to vector<8x1xf32>
    %201 = tpu.reciprocal %200 {approx = true} : vector<8x1xf32> -> vector<8x1xf32>
    %202 = vector.broadcast %201 : vector<8x1xf32> to vector<8x8xf32>
    %203 = arith.mulf %198, %202 : vector<8x8xf32>
    %cst_47 = arith.constant dense<0.000000e+00> : vector<8xf32>
    %204 = vector.multi_reduction <add>, %203, %cst_47 [1] : vector<8x8xf32> to vector<8xf32>
    %205 = vector.shape_cast %204 : vector<8xf32> to vector<8x1xf32>
    %cst_48 = arith.constant 9.99999993E-9 : f32
    %206 = vector.broadcast %cst_48 : f32 to vector<8x1xf32>
    %207 = arith.addf %205, %206 : vector<8x1xf32>
    %208 = vector.broadcast %207 : vector<8x1xf32> to vector<8x8xf32>
    %209 = arith.divf %203, %208 : vector<8x8xf32>
    %210 = arith.truncf %209 : vector<8x8xf32> to vector<8x8xbf16>
    %cst_49 = arith.constant dense<0.000000e+00> : vector<8x8xf32>
    %211 = tpu.matmul %210, %168, %cst_49 {dimension_numbers = #tpu.dot_dimension_numbers<[1], [0], [0], [1], [0, 0, 1, 1], [], []>} : vector<8x8xbf16>, vector<8x8xbf16>, vector<8x8xf32> -> vector<8x8xf32>
    %212 = tpu.concatenate %73, %119, %165, %211 in 1 : vector<8x8xf32>, vector<8x8xf32>, vector<8x8xf32>, vector<8x8xf32> -> vector<8x32xf32>
    %213 = arith.truncf %212 : vector<8x32xf32> to vector<8x32xbf16>
    %c0_50 = arith.constant 0 : index
    %c0_51 = arith.constant 0 : index
    %214 = vector.load %arg4[%c0_50, %c0_51] : memref<32x32xbf16, #tpu.memory_space<vmem>>, vector<32x32xbf16>
    %cst_52 = arith.constant dense<0.000000e+00> : vector<8x32xf32>
    %215 = tpu.matmul %213, %214, %cst_52 {dimension_numbers = #tpu.dot_dimension_numbers<[1], [0], [0], [1], [0, 0, 1, 1], [], []>} : vector<8x32xbf16>, vector<32x32xbf16>, vector<8x32xf32> -> vector<8x32xf32>
    %c0_53 = arith.constant 0 : index
    %c0_54 = arith.constant 0 : index
    %216 = vector.load %arg5[%c0_53, %c0_54] : memref<1x32xf32, #tpu.memory_space<vmem>>, vector<1x32xf32>
    %217 = vector.broadcast %216 : vector<1x32xf32> to vector<8x32xf32>
    %218 = arith.addf %215, %217 : vector<8x32xf32>
    %c0_55 = arith.constant 0 : index
    %c0_56 = arith.constant 0 : index
    %c0_57 = arith.constant 0 : index
    %219 = vector.load %arg7[%c0_55, %c0_56, %c0_57] : memref<1x8x32xf32, #tpu.memory_space<vmem>>, vector<1x8x32xf32>
    %220 = vector.shape_cast %219 : vector<1x8x32xf32> to vector<8x32xf32>
    %221 = vector.shape_cast %218 : vector<8x32xf32> to vector<1x8x32xf32>
    tpu.vector_store %arg7[%c0_55, %c0_56, %c0_57], %221 {strides = array<i32>} : memref<1x8x32xf32, #tpu.memory_space<vmem>>, vector<1x8x32xf32>,
    return
  }
  func.func @transform_0(%arg0: i32) -> (i32, i32, i32) {
    %c0_i32 = arith.constant 0 : i32
    %c0_i32_0 = arith.constant 0 : i32
    %c0_i32_1 = arith.constant 0 : i32
    return %arg0, %c0_i32, %c0_i32_0 : i32, i32, i32
  }
  func.func @transform_1(%arg0: i32) -> (i32, i32) {
    %c0_i32 = arith.constant 0 : i32
    %c0_i32_0 = arith.constant 0 : i32
    %c0_i32_1 = arith.constant 0 : i32
    return %c0_i32, %c0_i32_0 : i32, i32
  }
  func.func @transform_2(%arg0: i32) -> (i32, i32) {
    %c0_i32 = arith.constant 0 : i32
    %c0_i32_0 = arith.constant 0 : i32
    %c0_i32_1 = arith.constant 0 : i32
    return %c0_i32, %c0_i32_0 : i32, i32
  }
  func.func @transform_3(%arg0: i32) -> (i32, i32) {
    %c0_i32 = arith.constant 0 : i32
    %c0_i32_0 = arith.constant 0 : i32
    %c0_i32_1 = arith.constant 0 : i32
    return %c0_i32, %c0_i32_0 : i32, i32
  }
  func.func @transform_4(%arg0: i32) -> (i32, i32) {
    %c0_i32 = arith.constant 0 : i32
    %c0_i32_0 = arith.constant 0 : i32
    %c0_i32_1 = arith.constant 0 : i32
    return %c0_i32, %c0_i32_0 : i32, i32
  }
  func.func @transform_5(%arg0: i32) -> (i32, i32) {
    %c0_i32 = arith.constant 0 : i32
    %c0_i32_0 = arith.constant 0 : i32
    %c0_i32_1 = arith.constant 0 : i32
    return %c0_i32, %c0_i32_0 : i32, i32
  }
  func.func @transform_6(%arg0: i32) -> (i32, i32, i32) {
    %c0_i32 = arith.constant 0 : i32
    %c0_i32_0 = arith.constant 0 : i32
    %c0_i32_1 = arith.constant 0 : i32
    return %arg0, %c0_i32, %c0_i32_0 : i32, i32, i32
  }
}

module attributes {stable_mosaic.version = 11 : i64} {
  func.func @_mha_kernel(%arg0: i32, %arg1: memref<1x5x32xf32, #tpu.memory_space<vmem>>, %arg2: memref<32x96xbf16, #tpu.memory_space<vmem>>, %arg3: memref<1x96xf32, #tpu.memory_space<vmem>>, %arg4: memref<32x32xbf16, #tpu.memory_space<vmem>>, %arg5: memref<1x32xf32, #tpu.memory_space<vmem>>, %arg6: memref<9x8xbf16, #tpu.memory_space<vmem>>, %arg7: memref<1x5x32xf32, #tpu.memory_space<vmem>>) attributes {dimension_semantics = [#tpu.dimension_semantics<parallel>], iteration_bounds = array<i64: 2>, scalar_prefetch = 0 : i64, scratch_operands = 0 : i64, tpu.core_type = #tpu.core_type<tc>, window_params = [{transform_indices = @transform_0, window_bounds = array<i64: 1, 5, 32>}, {pipeline_mode = #tpu.pipeline_mode<synchronous>, transform_indices = @transform_1, window_bounds = array<i64: 32, 96>}, {pipeline_mode = #tpu.pipeline_mode<synchronous>, transform_indices = @transform_2, window_bounds = array<i64: 1, 96>}, {pipeline_mode = #tpu.pipeline_mode<synchronous>, transform_indices = @transform_3, window_bounds = array<i64: 32, 32>}, {pipeline_mode = #tpu.pipeline_mode<synchronous>, transform_indices = @transform_4, window_bounds = array<i64: 1, 32>}, {pipeline_mode = #tpu.pipeline_mode<synchronous>, transform_indices = @transform_5, window_bounds = array<i64: 9, 8>}, {transform_indices = @transform_6, window_bounds = array<i64: 1, 5, 32>}]} {
    %c0 = arith.constant 0 : index
    %c0_0 = arith.constant 0 : index
    %c0_1 = arith.constant 0 : index
    %0 = vector.load %arg1[%c0, %c0_0, %c0_1] : memref<1x5x32xf32, #tpu.memory_space<vmem>>, vector<1x5x32xf32>
    %1 = vector.shape_cast %0 : vector<1x5x32xf32> to vector<5x32xf32>
    %2 = arith.truncf %1 : vector<5x32xf32> to vector<5x32xbf16>
    %c0_2 = arith.constant 0 : index
    %c0_3 = arith.constant 0 : index
    %3 = vector.load %arg2[%c0_2, %c0_3] : memref<32x96xbf16, #tpu.memory_space<vmem>>, vector<32x96xbf16>
    %cst = arith.constant dense<0.000000e+00> : vector<5x96xf32>
    %4 = tpu.matmul %2, %3, %cst {dimension_numbers = #tpu.dot_dimension_numbers<[1], [0], [0], [1], [0, 0, 1, 1], [], []>} : vector<5x32xbf16>, vector<32x96xbf16>, vector<5x96xf32> -> vector<5x96xf32>
    %c0_4 = arith.constant 0 : index
    %c0_5 = arith.constant 0 : index
    %5 = vector.load %arg3[%c0_4, %c0_5] : memref<1x96xf32, #tpu.memory_space<vmem>>, vector<1x96xf32>
    %6 = vector.broadcast %5 : vector<1x96xf32> to vector<5x96xf32>
    %7 = arith.addf %4, %6 : vector<5x96xf32>
    %8 = vector.extract_strided_slice %7 {offsets = [0, 0], sizes = [5, 32], strides = [1, 1]} : vector<5x96xf32> to vector<5x32xf32>
    %9 = arith.truncf %8 : vector<5x32xf32> to vector<5x32xbf16>
    %10 = vector.extract_strided_slice %7 {offsets = [0, 32], sizes = [5, 32], strides = [1, 1]} : vector<5x96xf32> to vector<5x32xf32>
    %11 = arith.truncf %10 : vector<5x32xf32> to vector<5x32xbf16>
    %12 = vector.extract_strided_slice %7 {offsets = [0, 64], sizes = [5, 32], strides = [1, 1]} : vector<5x96xf32> to vector<5x32xf32>
    %13 = arith.truncf %12 : vector<5x32xf32> to vector<5x32xbf16>
    %c0_6 = arith.constant 0 : index
    %c0_7 = arith.constant 0 : index
    %14 = vector.load %arg6[%c0_6, %c0_7] : memref<9x8xbf16, #tpu.memory_space<vmem>>, vector<9x8xbf16>
    %15 = tpu.iota {dimensions = array<i32: 0>} : vector<5x9xi32>
    %c1_i32 = arith.constant 1 : i32
    %16 = vector.broadcast %c1_i32 : i32 to vector<5x9xi32>
    %17 = arith.andi %15, %16 : vector<5x9xi32>
    %c0_i32 = arith.constant 0 : i32
    %18 = vector.broadcast %c0_i32 : i32 to vector<5x9xi32>
    %19 = arith.cmpi ne, %17, %18 : vector<5x9xi32>
    %c2_i32 = arith.constant 2 : i32
    %20 = vector.broadcast %c2_i32 : i32 to vector<5x9xi32>
    %21 = arith.andi %15, %20 : vector<5x9xi32>
    %c0_i32_8 = arith.constant 0 : i32
    %22 = vector.broadcast %c0_i32_8 : i32 to vector<5x9xi32>
    %23 = arith.cmpi ne, %21, %22 : vector<5x9xi32>
    %c4_i32 = arith.constant 4 : i32
    %24 = vector.broadcast %c4_i32 : i32 to vector<5x9xi32>
    %25 = arith.andi %15, %24 : vector<5x9xi32>
    %c0_i32_9 = arith.constant 0 : i32
    %26 = vector.broadcast %c0_i32_9 : i32 to vector<5x9xi32>
    %27 = arith.cmpi ne, %25, %26 : vector<5x9xi32>
    %28 = vector.extract_strided_slice %9 {offsets = [0, 0], sizes = [5, 8], strides = [1, 1]} : vector<5x32xbf16> to vector<5x8xbf16>
    %29 = vector.extract_strided_slice %11 {offsets = [0, 0], sizes = [5, 8], strides = [1, 1]} : vector<5x32xbf16> to vector<5x8xbf16>
    %30 = vector.extract_strided_slice %13 {offsets = [0, 0], sizes = [5, 8], strides = [1, 1]} : vector<5x32xbf16> to vector<5x8xbf16>
    %cst_10 = arith.constant dense<0.000000e+00> : vector<5x5xf32>
    %31 = tpu.matmul %28, %29, %cst_10 {dimension_numbers = #tpu.dot_dimension_numbers<[1], [1], [0], [0], [0, 0, 1, 0], [], []>} : vector<5x8xbf16>, vector<5x8xbf16>, vector<5x5xf32> -> vector<5x5xf32>
    %cst_11 = arith.constant 0.353553385 : f32
    %32 = vector.broadcast %cst_11 : f32 to vector<5x5xf32>
    %33 = arith.mulf %31, %32 : vector<5x5xf32>
    %cst_12 = arith.constant -1.000000e+05 : f32
    %cst_13 = arith.constant 1.000000e+05 : f32
    %34 = vector.broadcast %cst_12 : f32 to vector<5x5xf32>
    %35 = arith.maximumf %34, %33 : vector<5x5xf32>
    %36 = vector.broadcast %cst_13 : f32 to vector<5x5xf32>
    %37 = arith.minimumf %36, %35 : vector<5x5xf32>
    %cst_14 = arith.constant dense<0.000000e+00> : vector<5x9xf32>
    %38 = tpu.matmul %28, %14, %cst_14 {dimension_numbers = #tpu.dot_dimension_numbers<[1], [1], [0], [0], [0, 0, 1, 0], [], []>} : vector<5x8xbf16>, vector<9x8xbf16>, vector<5x9xf32> -> vector<5x9xf32>
    %39 = vector.extract_strided_slice %38 {offsets = [0, 4], sizes = [5, 5], strides = [1, 1]} : vector<5x9xf32> to vector<5x5xf32>
    %40 = vector.extract_strided_slice %38 {offsets = [0, 0], sizes = [5, 4], strides = [1, 1]} : vector<5x9xf32> to vector<5x4xf32>
    %41 = tpu.concatenate %39, %40 in 1 : vector<5x5xf32>, vector<5x4xf32> -> vector<5x9xf32>
    %42 = vector.extract_strided_slice %41 {offsets = [0, 8], sizes = [5, 1], strides = [1, 1]} : vector<5x9xf32> to vector<5x1xf32>
    %43 = vector.extract_strided_slice %41 {offsets = [0, 0], sizes = [5, 8], strides = [1, 1]} : vector<5x9xf32> to vector<5x8xf32>
    %44 = tpu.concatenate %42, %43 in 1 : vector<5x1xf32>, vector<5x8xf32> -> vector<5x9xf32>
    %45 = arith.select %19, %44, %41 : vector<5x9xi1>, vector<5x9xf32>
    %46 = vector.extract_strided_slice %45 {offsets = [0, 7], sizes = [5, 2], strides = [1, 1]} : vector<5x9xf32> to vector<5x2xf32>
    %47 = vector.extract_strided_slice %45 {offsets = [0, 0], sizes = [5, 7], strides = [1, 1]} : vector<5x9xf32> to vector<5x7xf32>
    %48 = tpu.concatenate %46, %47 in 1 : vector<5x2xf32>, vector<5x7xf32> -> vector<5x9xf32>
    %49 = arith.select %23, %48, %45 : vector<5x9xi1>, vector<5x9xf32>
    %50 = vector.extract_strided_slice %49 {offsets = [0, 5], sizes = [5, 4], strides = [1, 1]} : vector<5x9xf32> to vector<5x4xf32>
    %51 = vector.extract_strided_slice %49 {offsets = [0, 0], sizes = [5, 5], strides = [1, 1]} : vector<5x9xf32> to vector<5x5xf32>
    %52 = tpu.concatenate %50, %51 in 1 : vector<5x4xf32>, vector<5x5xf32> -> vector<5x9xf32>
    %53 = arith.select %27, %52, %49 : vector<5x9xi1>, vector<5x9xf32>
    %54 = vector.extract_strided_slice %53 {offsets = [0, 0], sizes = [5, 5], strides = [1, 1]} : vector<5x9xf32> to vector<5x5xf32>
    %55 = arith.addf %37, %54 : vector<5x5xf32>
    %cst_15 = arith.constant dense<0xFF800000> : vector<5xf32>
    %56 = vector.multi_reduction <maximumf>, %55, %cst_15 [1] : vector<5x5xf32> to vector<5xf32>
    %57 = vector.shape_cast %56 : vector<5xf32> to vector<5x1xf32>
    %58 = vector.broadcast %57 : vector<5x1xf32> to vector<5x5xf32>
    %59 = arith.subf %55, %58 : vector<5x5xf32>
    %60 = math.exp %59 : vector<5x5xf32>
    %cst_16 = arith.constant dense<0.000000e+00> : vector<5xf32>
    %61 = vector.multi_reduction <add>, %60, %cst_16 [1] : vector<5x5xf32> to vector<5xf32>
    %62 = vector.shape_cast %61 : vector<5xf32> to vector<5x1xf32>
    %63 = tpu.reciprocal %62 {approx = true} : vector<5x1xf32> -> vector<5x1xf32>
    %64 = vector.broadcast %63 : vector<5x1xf32> to vector<5x5xf32>
    %65 = arith.mulf %60, %64 : vector<5x5xf32>
    %cst_17 = arith.constant dense<0.000000e+00> : vector<5xf32>
    %66 = vector.multi_reduction <add>, %65, %cst_17 [1] : vector<5x5xf32> to vector<5xf32>
    %67 = vector.shape_cast %66 : vector<5xf32> to vector<5x1xf32>
    %cst_18 = arith.constant 9.99999993E-9 : f32
    %68 = vector.broadcast %cst_18 : f32 to vector<5x1xf32>
    %69 = arith.addf %67, %68 : vector<5x1xf32>
    %70 = vector.broadcast %69 : vector<5x1xf32> to vector<5x5xf32>
    %71 = arith.divf %65, %70 : vector<5x5xf32>
    %72 = arith.truncf %71 : vector<5x5xf32> to vector<5x5xbf16>
    %cst_19 = arith.constant dense<0.000000e+00> : vector<5x8xf32>
    %73 = tpu.matmul %72, %30, %cst_19 {dimension_numbers = #tpu.dot_dimension_numbers<[1], [0], [0], [1], [0, 0, 1, 1], [], []>} : vector<5x5xbf16>, vector<5x8xbf16>, vector<5x8xf32> -> vector<5x8xf32>
    %74 = vector.extract_strided_slice %9 {offsets = [0, 8], sizes = [5, 8], strides = [1, 1]} : vector<5x32xbf16> to vector<5x8xbf16>
    %75 = vector.extract_strided_slice %11 {offsets = [0, 8], sizes = [5, 8], strides = [1, 1]} : vector<5x32xbf16> to vector<5x8xbf16>
    %76 = vector.extract_strided_slice %13 {offsets = [0, 8], sizes = [5, 8], strides = [1, 1]} : vector<5x32xbf16> to vector<5x8xbf16>
    %cst_20 = arith.constant dense<0.000000e+00> : vector<5x5xf32>
    %77 = tpu.matmul %74, %75, %cst_20 {dimension_numbers = #tpu.dot_dimension_numbers<[1], [1], [0], [0], [0, 0, 1, 0], [], []>} : vector<5x8xbf16>, vector<5x8xbf16>, vector<5x5xf32> -> vector<5x5xf32>
    %cst_21 = arith.constant 0.353553385 : f32
    %78 = vector.broadcast %cst_21 : f32 to vector<5x5xf32>
    %79 = arith.mulf %77, %78 : vector<5x5xf32>
    %cst_22 = arith.constant -1.000000e+05 : f32
    %cst_23 = arith.constant 1.000000e+05 : f32
    %80 = vector.broadcast %cst_22 : f32 to vector<5x5xf32>
    %81 = arith.maximumf %80, %79 : vector<5x5xf32>
    %82 = vector.broadcast %cst_23 : f32 to vector<5x5xf32>
    %83 = arith.minimumf %82, %81 : vector<5x5xf32>
    %cst_24 = arith.constant dense<0.000000e+00> : vector<5x9xf32>
    %84 = tpu.matmul %74, %14, %cst_24 {dimension_numbers = #tpu.dot_dimension_numbers<[1], [1], [0], [0], [0, 0, 1, 0], [], []>} : vector<5x8xbf16>, vector<9x8xbf16>, vector<5x9xf32> -> vector<5x9xf32>
    %85 = vector.extract_strided_slice %84 {offsets = [0, 4], sizes = [5, 5], strides = [1, 1]} : vector<5x9xf32> to vector<5x5xf32>
    %86 = vector.extract_strided_slice %84 {offsets = [0, 0], sizes = [5, 4], strides = [1, 1]} : vector<5x9xf32> to vector<5x4xf32>
    %87 = tpu.concatenate %85, %86 in 1 : vector<5x5xf32>, vector<5x4xf32> -> vector<5x9xf32>
    %88 = vector.extract_strided_slice %87 {offsets = [0, 8], sizes = [5, 1], strides = [1, 1]} : vector<5x9xf32> to vector<5x1xf32>
    %89 = vector.extract_strided_slice %87 {offsets = [0, 0], sizes = [5, 8], strides = [1, 1]} : vector<5x9xf32> to vector<5x8xf32>
    %90 = tpu.concatenate %88, %89 in 1 : vector<5x1xf32>, vector<5x8xf32> -> vector<5x9xf32>
    %91 = arith.select %19, %90, %87 : vector<5x9xi1>, vector<5x9xf32>
    %92 = vector.extract_strided_slice %91 {offsets = [0, 7], sizes = [5, 2], strides = [1, 1]} : vector<5x9xf32> to vector<5x2xf32>
    %93 = vector.extract_strided_slice %91 {offsets = [0, 0], sizes = [5, 7], strides = [1, 1]} : vector<5x9xf32> to vector<5x7xf32>
    %94 = tpu.concatenate %92, %93 in 1 : vector<5x2xf32>, vector<5x7xf32> -> vector<5x9xf32>
    %95 = arith.select %23, %94, %91 : vector<5x9xi1>, vector<5x9xf32>
    %96 = vector.extract_strided_slice %95 {offsets = [0, 5], sizes = [5, 4], strides = [1, 1]} : vector<5x9xf32> to vector<5x4xf32>
    %97 = vector.extract_strided_slice %95 {offsets = [0, 0], sizes = [5, 5], strides = [1, 1]} : vector<5x9xf32> to vector<5x5xf32>
    %98 = tpu.concatenate %96, %97 in 1 : vector<5x4xf32>, vector<5x5xf32> -> vector<5x9xf32>
    %99 = arith.select %27, %98, %95 : vector<5x9xi1>, vector<5x9xf32>
    %100 = vector.extract_strided_slice %99 {offsets = [0, 0], sizes = [5, 5], strides = [1, 1]} : vector<5x9xf32> to vector<5x5xf32>
    %101 = arith.addf %83, %100 : vector<5x5xf32>
    %cst_25 = arith.constant dense<0xFF800000> : vector<5xf32>
    %102 = vector.multi_reduction <maximumf>, %101, %cst_25 [1] : vector<5x5xf32> to vector<5xf32>
    %103 = vector.shape_cast %102 : vector<5xf32> to vector<5x1xf32>
    %104 = vector.broadcast %103 : vector<5x1xf32> to vector<5x5xf32>
    %105 = arith.subf %101, %104 : vector<5x5xf32>
    %106 = math.exp %105 : vector<5x5xf32>
    %cst_26 = arith.constant dense<0.000000e+00> : vector<5xf32>
    %107 = vector.multi_reduction <add>, %106, %cst_26 [1] : vector<5x5xf32> to vector<5xf32>
    %108 = vector.shape_cast %107 : vector<5xf32> to vector<5x1xf32>
    %109 = tpu.reciprocal %108 {approx = true} : vector<5x1xf32> -> vector<5x1xf32>
    %110 = vector.broadcast %109 : vector<5x1xf32> to vector<5x5xf32>
    %111 = arith.mulf %106, %110 : vector<5x5xf32>
    %cst_27 = arith.constant dense<0.000000e+00> : vector<5xf32>
    %112 = vector.multi_reduction <add>, %111, %cst_27 [1] : vector<5x5xf32> to vector<5xf32>
    %113 = vector.shape_cast %112 : vector<5xf32> to vector<5x1xf32>
    %cst_28 = arith.constant 9.99999993E-9 : f32
    %114 = vector.broadcast %cst_28 : f32 to vector<5x1xf32>
    %115 = arith.addf %113, %114 : vector<5x1xf32>
    %116 = vector.broadcast %115 : vector<5x1xf32> to vector<5x5xf32>
    %117 = arith.divf %111, %116 : vector<5x5xf32>
    %118 = arith.truncf %117 : vector<5x5xf32> to vector<5x5xbf16>
    %cst_29 = arith.constant dense<0.000000e+00> : vector<5x8xf32>
    %119 = tpu.matmul %118, %76, %cst_29 {dimension_numbers = #tpu.dot_dimension_numbers<[1], [0], [0], [1], [0, 0, 1, 1], [], []>} : vector<5x5xbf16>, vector<5x8xbf16>, vector<5x8xf32> -> vector<5x8xf32>
    %120 = vector.extract_strided_slice %9 {offsets = [0, 16], sizes = [5, 8], strides = [1, 1]} : vector<5x32xbf16> to vector<5x8xbf16>
    %121 = vector.extract_strided_slice %11 {offsets = [0, 16], sizes = [5, 8], strides = [1, 1]} : vector<5x32xbf16> to vector<5x8xbf16>
    %122 = vector.extract_strided_slice %13 {offsets = [0, 16], sizes = [5, 8], strides = [1, 1]} : vector<5x32xbf16> to vector<5x8xbf16>
    %cst_30 = arith.constant dense<0.000000e+00> : vector<5x5xf32>
    %123 = tpu.matmul %120, %121, %cst_30 {dimension_numbers = #tpu.dot_dimension_numbers<[1], [1], [0], [0], [0, 0, 1, 0], [], []>} : vector<5x8xbf16>, vector<5x8xbf16>, vector<5x5xf32> -> vector<5x5xf32>
    %cst_31 = arith.constant 0.353553385 : f32
    %124 = vector.broadcast %cst_31 : f32 to vector<5x5xf32>
    %125 = arith.mulf %123, %124 : vector<5x5xf32>
    %cst_32 = arith.constant -1.000000e+05 : f32
    %cst_33 = arith.constant 1.000000e+05 : f32
    %126 = vector.broadcast %cst_32 : f32 to vector<5x5xf32>
    %127 = arith.maximumf %126, %125 : vector<5x5xf32>
    %128 = vector.broadcast %cst_33 : f32 to vector<5x5xf32>
    %129 = arith.minimumf %128, %127 : vector<5x5xf32>
    %cst_34 = arith.constant dense<0.000000e+00> : vector<5x9xf32>
    %130 = tpu.matmul %120, %14, %cst_34 {dimension_numbers = #tpu.dot_dimension_numbers<[1], [1], [0], [0], [0, 0, 1, 0], [], []>} : vector<5x8xbf16>, vector<9x8xbf16>, vector<5x9xf32> -> vector<5x9xf32>
    %131 = vector.extract_strided_slice %130 {offsets = [0, 4], sizes = [5, 5], strides = [1, 1]} : vector<5x9xf32> to vector<5x5xf32>
    %132 = vector.extract_strided_slice %130 {offsets = [0, 0], sizes = [5, 4], strides = [1, 1]} : vector<5x9xf32> to vector<5x4xf32>
    %133 = tpu.concatenate %131, %132 in 1 : vector<5x5xf32>, vector<5x4xf32> -> vector<5x9xf32>
    %134 = vector.extract_strided_slice %133 {offsets = [0, 8], sizes = [5, 1], strides = [1, 1]} : vector<5x9xf32> to vector<5x1xf32>
    %135 = vector.extract_strided_slice %133 {offsets = [0, 0], sizes = [5, 8], strides = [1, 1]} : vector<5x9xf32> to vector<5x8xf32>
    %136 = tpu.concatenate %134, %135 in 1 : vector<5x1xf32>, vector<5x8xf32> -> vector<5x9xf32>
    %137 = arith.select %19, %136, %133 : vector<5x9xi1>, vector<5x9xf32>
    %138 = vector.extract_strided_slice %137 {offsets = [0, 7], sizes = [5, 2], strides = [1, 1]} : vector<5x9xf32> to vector<5x2xf32>
    %139 = vector.extract_strided_slice %137 {offsets = [0, 0], sizes = [5, 7], strides = [1, 1]} : vector<5x9xf32> to vector<5x7xf32>
    %140 = tpu.concatenate %138, %139 in 1 : vector<5x2xf32>, vector<5x7xf32> -> vector<5x9xf32>
    %141 = arith.select %23, %140, %137 : vector<5x9xi1>, vector<5x9xf32>
    %142 = vector.extract_strided_slice %141 {offsets = [0, 5], sizes = [5, 4], strides = [1, 1]} : vector<5x9xf32> to vector<5x4xf32>
    %143 = vector.extract_strided_slice %141 {offsets = [0, 0], sizes = [5, 5], strides = [1, 1]} : vector<5x9xf32> to vector<5x5xf32>
    %144 = tpu.concatenate %142, %143 in 1 : vector<5x4xf32>, vector<5x5xf32> -> vector<5x9xf32>
    %145 = arith.select %27, %144, %141 : vector<5x9xi1>, vector<5x9xf32>
    %146 = vector.extract_strided_slice %145 {offsets = [0, 0], sizes = [5, 5], strides = [1, 1]} : vector<5x9xf32> to vector<5x5xf32>
    %147 = arith.addf %129, %146 : vector<5x5xf32>
    %cst_35 = arith.constant dense<0xFF800000> : vector<5xf32>
    %148 = vector.multi_reduction <maximumf>, %147, %cst_35 [1] : vector<5x5xf32> to vector<5xf32>
    %149 = vector.shape_cast %148 : vector<5xf32> to vector<5x1xf32>
    %150 = vector.broadcast %149 : vector<5x1xf32> to vector<5x5xf32>
    %151 = arith.subf %147, %150 : vector<5x5xf32>
    %152 = math.exp %151 : vector<5x5xf32>
    %cst_36 = arith.constant dense<0.000000e+00> : vector<5xf32>
    %153 = vector.multi_reduction <add>, %152, %cst_36 [1] : vector<5x5xf32> to vector<5xf32>
    %154 = vector.shape_cast %153 : vector<5xf32> to vector<5x1xf32>
    %155 = tpu.reciprocal %154 {approx = true} : vector<5x1xf32> -> vector<5x1xf32>
    %156 = vector.broadcast %155 : vector<5x1xf32> to vector<5x5xf32>
    %157 = arith.mulf %152, %156 : vector<5x5xf32>
    %cst_37 = arith.constant dense<0.000000e+00> : vector<5xf32>
    %158 = vector.multi_reduction <add>, %157, %cst_37 [1] : vector<5x5xf32> to vector<5xf32>
    %159 = vector.shape_cast %158 : vector<5xf32> to vector<5x1xf32>
    %cst_38 = arith.constant 9.99999993E-9 : f32
    %160 = vector.broadcast %cst_38 : f32 to vector<5x1xf32>
    %161 = arith.addf %159, %160 : vector<5x1xf32>
    %162 = vector.broadcast %161 : vector<5x1xf32> to vector<5x5xf32>
    %163 = arith.divf %157, %162 : vector<5x5xf32>
    %164 = arith.truncf %163 : vector<5x5xf32> to vector<5x5xbf16>
    %cst_39 = arith.constant dense<0.000000e+00> : vector<5x8xf32>
    %165 = tpu.matmul %164, %122, %cst_39 {dimension_numbers = #tpu.dot_dimension_numbers<[1], [0], [0], [1], [0, 0, 1, 1], [], []>} : vector<5x5xbf16>, vector<5x8xbf16>, vector<5x8xf32> -> vector<5x8xf32>
    %166 = vector.extract_strided_slice %9 {offsets = [0, 24], sizes = [5, 8], strides = [1, 1]} : vector<5x32xbf16> to vector<5x8xbf16>
    %167 = vector.extract_strided_slice %11 {offsets = [0, 24], sizes = [5, 8], strides = [1, 1]} : vector<5x32xbf16> to vector<5x8xbf16>
    %168 = vector.extract_strided_slice %13 {offsets = [0, 24], sizes = [5, 8], strides = [1, 1]} : vector<5x32xbf16> to vector<5x8xbf16>
    %cst_40 = arith.constant dense<0.000000e+00> : vector<5x5xf32>
    %169 = tpu.matmul %166, %167, %cst_40 {dimension_numbers = #tpu.dot_dimension_numbers<[1], [1], [0], [0], [0, 0, 1, 0], [], []>} : vector<5x8xbf16>, vector<5x8xbf16>, vector<5x5xf32> -> vector<5x5xf32>
    %cst_41 = arith.constant 0.353553385 : f32
    %170 = vector.broadcast %cst_41 : f32 to vector<5x5xf32>
    %171 = arith.mulf %169, %170 : vector<5x5xf32>
    %cst_42 = arith.constant -1.000000e+05 : f32
    %cst_43 = arith.constant 1.000000e+05 : f32
    %172 = vector.broadcast %cst_42 : f32 to vector<5x5xf32>
    %173 = arith.maximumf %172, %171 : vector<5x5xf32>
    %174 = vector.broadcast %cst_43 : f32 to vector<5x5xf32>
    %175 = arith.minimumf %174, %173 : vector<5x5xf32>
    %cst_44 = arith.constant dense<0.000000e+00> : vector<5x9xf32>
    %176 = tpu.matmul %166, %14, %cst_44 {dimension_numbers = #tpu.dot_dimension_numbers<[1], [1], [0], [0], [0, 0, 1, 0], [], []>} : vector<5x8xbf16>, vector<9x8xbf16>, vector<5x9xf32> -> vector<5x9xf32>
    %177 = vector.extract_strided_slice %176 {offsets = [0, 4], sizes = [5, 5], strides = [1, 1]} : vector<5x9xf32> to vector<5x5xf32>
    %178 = vector.extract_strided_slice %176 {offsets = [0, 0], sizes = [5, 4], strides = [1, 1]} : vector<5x9xf32> to vector<5x4xf32>
    %179 = tpu.concatenate %177, %178 in 1 : vector<5x5xf32>, vector<5x4xf32> -> vector<5x9xf32>
    %180 = vector.extract_strided_slice %179 {offsets = [0, 8], sizes = [5, 1], strides = [1, 1]} : vector<5x9xf32> to vector<5x1xf32>
    %181 = vector.extract_strided_slice %179 {offsets = [0, 0], sizes = [5, 8], strides = [1, 1]} : vector<5x9xf32> to vector<5x8xf32>
    %182 = tpu.concatenate %180, %181 in 1 : vector<5x1xf32>, vector<5x8xf32> -> vector<5x9xf32>
    %183 = arith.select %19, %182, %179 : vector<5x9xi1>, vector<5x9xf32>
    %184 = vector.extract_strided_slice %183 {offsets = [0, 7], sizes = [5, 2], strides = [1, 1]} : vector<5x9xf32> to vector<5x2xf32>
    %185 = vector.extract_strided_slice %183 {offsets = [0, 0], sizes = [5, 7], strides = [1, 1]} : vector<5x9xf32> to vector<5x7xf32>
    %186 = tpu.concatenate %184, %185 in 1 : vector<5x2xf32>, vector<5x7xf32> -> vector<5x9xf32>
    %187 = arith.select %23, %186, %183 : vector<5x9xi1>, vector<5x9xf32>
    %188 = vector.extract_strided_slice %187 {offsets = [0, 5], sizes = [5, 4], strides = [1, 1]} : vector<5x9xf32> to vector<5x4xf32>
    %189 = vector.extract_strided_slice %187 {offsets = [0, 0], sizes = [5, 5], strides = [1, 1]} : vector<5x9xf32> to vector<5x5xf32>
    %190 = tpu.concatenate %188, %189 in 1 : vector<5x4xf32>, vector<5x5xf32> -> vector<5x9xf32>
    %191 = arith.select %27, %190, %187 : vector<5x9xi1>, vector<5x9xf32>
    %192 = vector.extract_strided_slice %191 {offsets = [0, 0], sizes = [5, 5], strides = [1, 1]} : vector<5x9xf32> to vector<5x5xf32>
    %193 = arith.addf %175, %192 : vector<5x5xf32>
    %cst_45 = arith.constant dense<0xFF800000> : vector<5xf32>
    %194 = vector.multi_reduction <maximumf>, %193, %cst_45 [1] : vector<5x5xf32> to vector<5xf32>
    %195 = vector.shape_cast %194 : vector<5xf32> to vector<5x1xf32>
    %196 = vector.broadcast %195 : vector<5x1xf32> to vector<5x5xf32>
    %197 = arith.subf %193, %196 : vector<5x5xf32>
    %198 = math.exp %197 : vector<5x5xf32>
    %cst_46 = arith.constant dense<0.000000e+00> : vector<5xf32>
    %199 = vector.multi_reduction <add>, %198, %cst_46 [1] : vector<5x5xf32> to vector<5xf32>
    %200 = vector.shape_cast %199 : vector<5xf32> to vector<5x1xf32>
    %201 = tpu.reciprocal %200 {approx = true} : vector<5x1xf32> -> vector<5x1xf32>
    %202 = vector.broadcast %201 : vector<5x1xf32> to vector<5x5xf32>
    %203 = arith.mulf %198, %202 : vector<5x5xf32>
    %cst_47 = arith.constant dense<0.000000e+00> : vector<5xf32>
    %204 = vector.multi_reduction <add>, %203, %cst_47 [1] : vector<5x5xf32> to vector<5xf32>
    %205 = vector.shape_cast %204 : vector<5xf32> to vector<5x1xf32>
    %cst_48 = arith.constant 9.99999993E-9 : f32
    %206 = vector.broadcast %cst_48 : f32 to vector<5x1xf32>
    %207 = arith.addf %205, %206 : vector<5x1xf32>
    %208 = vector.broadcast %207 : vector<5x1xf32> to vector<5x5xf32>
    %209 = arith.divf %203, %208 : vector<5x5xf32>
    %210 = arith.truncf %209 : vector<5x5xf32> to vector<5x5xbf16>
    %cst_49 = arith.constant dense<0.000000e+00> : vector<5x8xf32>
    %211 = tpu.matmul %210, %168, %cst_49 {dimension_numbers = #tpu.dot_dimension_numbers<[1], [0], [0], [1], [0, 0, 1, 1], [], []>} : vector<5x5xbf16>, vector<5x8xbf16>, vector<5x8xf32> -> vector<5x8xf32>
    %212 = tpu.concatenate %73, %119, %165, %211 in 1 : vector<5x8xf32>, vector<5x8xf32>, vector<5x8xf32>, vector<5x8xf32> -> vector<5x32xf32>
    %213 = arith.truncf %212 : vector<5x32xf32> to vector<5x32xbf16>
    %c0_50 = arith.constant 0 : index
    %c0_51 = arith.constant 0 : index
    %214 = vector.load %arg4[%c0_50, %c0_51] : memref<32x32xbf16, #tpu.memory_space<vmem>>, vector<32x32xbf16>
    %cst_52 = arith.constant dense<0.000000e+00> : vector<5x32xf32>
    %215 = tpu.matmul %213, %214, %cst_52 {dimension_numbers = #tpu.dot_dimension_numbers<[1], [0], [0], [1], [0, 0, 1, 1], [], []>} : vector<5x32xbf16>, vector<32x32xbf16>, vector<5x32xf32> -> vector<5x32xf32>
    %c0_53 = arith.constant 0 : index
    %c0_54 = arith.constant 0 : index
    %216 = vector.load %arg5[%c0_53, %c0_54] : memref<1x32xf32, #tpu.memory_space<vmem>>, vector<1x32xf32>
    %217 = vector.broadcast %216 : vector<1x32xf32> to vector<5x32xf32>
    %218 = arith.addf %215, %217 : vector<5x32xf32>
    %c0_55 = arith.constant 0 : index
    %c0_56 = arith.constant 0 : index
    %c0_57 = arith.constant 0 : index
    %219 = vector.load %arg7[%c0_55, %c0_56, %c0_57] : memref<1x5x32xf32, #tpu.memory_space<vmem>>, vector<1x5x32xf32>
    %220 = vector.shape_cast %219 : vector<1x5x32xf32> to vector<5x32xf32>
    %221 = vector.shape_cast %218 : vector<5x32xf32> to vector<1x5x32xf32>
    tpu.vector_store %arg7[%c0_55, %c0_56, %c0_57], %221 {strides = array<i32>} : memref<1x5x32xf32, #tpu.memory_space<vmem>>, vector<1x5x32xf32>,
    return
  }
  func.func @transform_0(%arg0: i32) -> (i32, i32, i32) {
    %c0_i32 = arith.constant 0 : i32
    %c0_i32_0 = arith.constant 0 : i32
    %c0_i32_1 = arith.constant 0 : i32
    return %arg0, %c0_i32, %c0_i32_0 : i32, i32, i32
  }
  func.func @transform_1(%arg0: i32) -> (i32, i32) {
    %c0_i32 = arith.constant 0 : i32
    %c0_i32_0 = arith.constant 0 : i32
    %c0_i32_1 = arith.constant 0 : i32
    return %c0_i32, %c0_i32_0 : i32, i32
  }
  func.func @transform_2(%arg0: i32) -> (i32, i32) {
    %c0_i32 = arith.constant 0 : i32
    %c0_i32_0 = arith.constant 0 : i32
    %c0_i32_1 = arith.constant 0 : i32
    return %c0_i32, %c0_i32_0 : i32, i32
  }
  func.func @transform_3(%arg0: i32) -> (i32, i32) {
    %c0_i32 = arith.constant 0 : i32
    %c0_i32_0 = arith.constant 0 : i32
    %c0_i32_1 = arith.constant 0 : i32
    return %c0_i32, %c0_i32_0 : i32, i32
  }
  func.func @transform_4(%arg0: i32) -> (i32, i32) {
    %c0_i32 = arith.constant 0 : i32
    %c0_i32_0 = arith.constant 0 : i32
    %c0_i32_1 = arith.constant 0 : i32
    return %c0_i32, %c0_i32_0 : i32, i32
  }
  func.func @transform_5(%arg0: i32) -> (i32, i32) {
    %c0_i32 = arith.constant 0 : i32
    %c0_i32_0 = arith.constant 0 : i32
    %c0_i32_1 = arith.constant 0 : i32
    return %c0_i32, %c0_i32_0 : i32, i32
  }
  func.func @transform_6(%arg0: i32) -> (i32, i32, i32) {
    %c0_i32 = arith.constant 0 : i32
    %c0_i32_0 = arith.constant 0 : i32
    %c0_i32_1 = arith.constant 0 : i32
    return %arg0, %c0_i32, %c0_i32_0 : i32, i32, i32
  }
}

module attributes {stable_mosaic.version = 11 : i64} {
  func.func @_output_kernel(%arg0: i32, %arg1: memref<1x8x32xf32, #tpu.memory_space<vmem>>, %arg2: memref<1x5x32xf32, #tpu.memory_space<vmem>>, %arg3: memref<8x5xbf16, #tpu.memory_space<vmem>>, %arg4: memref<32x32xbf16, #tpu.memory_space<vmem>>, %arg5: memref<32x32xbf16, #tpu.memory_space<vmem>>, %arg6: memref<1x32xf32, #tpu.memory_space<vmem>>, %arg7: memref<1x32xf32, #tpu.memory_space<vmem>>, %arg8: memref<1x32xf32, #tpu.memory_space<vmem>>, %arg9: memref<1x8x32xf32, #tpu.memory_space<vmem>>) attributes {dimension_semantics = [#tpu.dimension_semantics<parallel>], iteration_bounds = array<i64: 2>, scalar_prefetch = 0 : i64, scratch_operands = 0 : i64, tpu.core_type = #tpu.core_type<tc>, window_params = [{transform_indices = @transform_0, window_bounds = array<i64: 1, 8, 32>}, {transform_indices = @transform_1, window_bounds = array<i64: 1, 5, 32>}, {pipeline_mode = #tpu.pipeline_mode<synchronous>, transform_indices = @transform_2, window_bounds = array<i64: 8, 5>}, {pipeline_mode = #tpu.pipeline_mode<synchronous>, transform_indices = @transform_3, window_bounds = array<i64: 32, 32>}, {pipeline_mode = #tpu.pipeline_mode<synchronous>, transform_indices = @transform_4, window_bounds = array<i64: 32, 32>}, {pipeline_mode = #tpu.pipeline_mode<synchronous>, transform_indices = @transform_5, window_bounds = array<i64: 1, 32>}, {pipeline_mode = #tpu.pipeline_mode<synchronous>, transform_indices = @transform_6, window_bounds = array<i64: 1, 32>}, {pipeline_mode = #tpu.pipeline_mode<synchronous>, transform_indices = @transform_7, window_bounds = array<i64: 1, 32>}, {transform_indices = @transform_8, window_bounds = array<i64: 1, 8, 32>}]} {
    %c0 = arith.constant 0 : index
    %c0_0 = arith.constant 0 : index
    %c0_1 = arith.constant 0 : index
    %0 = vector.load %arg1[%c0, %c0_0, %c0_1] : memref<1x8x32xf32, #tpu.memory_space<vmem>>, vector<1x8x32xf32>
    %1 = vector.shape_cast %0 : vector<1x8x32xf32> to vector<8x32xf32>
    %2 = arith.truncf %1 : vector<8x32xf32> to vector<8x32xbf16>
    %c0_2 = arith.constant 0 : index
    %c0_3 = arith.constant 0 : index
    %c0_4 = arith.constant 0 : index
    %3 = vector.load %arg2[%c0_2, %c0_3, %c0_4] : memref<1x5x32xf32, #tpu.memory_space<vmem>>, vector<1x5x32xf32>
    %4 = vector.shape_cast %3 : vector<1x5x32xf32> to vector<5x32xf32>
    %cst = arith.constant -1.000000e+05 : f32
    %cst_5 = arith.constant 1.000000e+05 : f32
    %5 = vector.broadcast %cst : f32 to vector<5x32xf32>
    %6 = arith.maximumf %5, %4 : vector<5x32xf32>
    %7 = vector.broadcast %cst_5 : f32 to vector<5x32xf32>
    %8 = arith.minimumf %7, %6 : vector<5x32xf32>
    %9 = arith.truncf %8 : vector<5x32xf32> to vector<5x32xbf16>
    %c0_6 = arith.constant 0 : index
    %c0_7 = arith.constant 0 : index
    %10 = vector.load %arg5[%c0_6, %c0_7] : memref<32x32xbf16, #tpu.memory_space<vmem>>, vector<32x32xbf16>
    %cst_8 = arith.constant dense<0.000000e+00> : vector<5x32xf32>
    %11 = tpu.matmul %9, %10, %cst_8 {dimension_numbers = #tpu.dot_dimension_numbers<[1], [0], [0], [1], [0, 0, 1, 1], [], []>} : vector<5x32xbf16>, vector<32x32xbf16>, vector<5x32xf32> -> vector<5x32xf32>
    %c0_9 = arith.constant 0 : index
    %c0_10 = arith.constant 0 : index
    %12 = vector.load %arg4[%c0_9, %c0_10] : memref<32x32xbf16, #tpu.memory_space<vmem>>, vector<32x32xbf16>
    %cst_11 = arith.constant dense<0.000000e+00> : vector<8x32xf32>
    %13 = tpu.matmul %2, %12, %cst_11 {dimension_numbers = #tpu.dot_dimension_numbers<[1], [0], [0], [1], [0, 0, 1, 1], [], []>} : vector<8x32xbf16>, vector<32x32xbf16>, vector<8x32xf32> -> vector<8x32xf32>
    %c0_12 = arith.constant 0 : index
    %c0_13 = arith.constant 0 : index
    %14 = vector.load %arg3[%c0_12, %c0_13] : memref<8x5xbf16, #tpu.memory_space<vmem>>, vector<8x5xbf16>
    %15 = arith.truncf %11 : vector<5x32xf32> to vector<5x32xbf16>
    %cst_14 = arith.constant dense<0.000000e+00> : vector<8x32xf32>
    %16 = tpu.matmul %14, %15, %cst_14 {dimension_numbers = #tpu.dot_dimension_numbers<[1], [0], [0], [1], [0, 0, 1, 1], [], []>} : vector<8x5xbf16>, vector<5x32xbf16>, vector<8x32xf32> -> vector<8x32xf32>
    %17 = arith.addf %13, %16 : vector<8x32xf32>
    %c0_15 = arith.constant 0 : index
    %c0_16 = arith.constant 0 : index
    %18 = vector.load %arg6[%c0_15, %c0_16] : memref<1x32xf32, #tpu.memory_space<vmem>>, vector<1x32xf32>
    %19 = vector.broadcast %18 : vector<1x32xf32> to vector<8x32xf32>
    %20 = arith.addf %17, %19 : vector<8x32xf32>
    %cst_17 = arith.constant dense<0.000000e+00> : vector<8xf32>
    %21 = vector.multi_reduction <add>, %20, %cst_17 [1] : vector<8x32xf32> to vector<8xf32>
    %22 = vector.shape_cast %21 : vector<8xf32> to vector<8x1xf32>
    %cst_18 = arith.constant 3.200000e+01 : f32
    %23 = vector.broadcast %cst_18 : f32 to vector<8x1xf32>
    %24 = arith.divf %22, %23 : vector<8x1xf32>
    %25 = vector.broadcast %24 : vector<8x1xf32> to vector<8x32xf32>
    %26 = arith.subf %20, %25 : vector<8x32xf32>
    %27 = arith.mulf %26, %26 : vector<8x32xf32>
    %cst_19 = arith.constant dense<0.000000e+00> : vector<8xf32>
    %28 = vector.multi_reduction <add>, %27, %cst_19 [1] : vector<8x32xf32> to vector<8xf32>
    %29 = vector.shape_cast %28 : vector<8xf32> to vector<8x1xf32>
    %cst_20 = arith.constant 3.200000e+01 : f32
    %30 = vector.broadcast %cst_20 : f32 to vector<8x1xf32>
    %31 = arith.divf %29, %30 : vector<8x1xf32>
    %32 = vector.broadcast %24 : vector<8x1xf32> to vector<8x32xf32>
    %33 = arith.subf %20, %32 : vector<8x32xf32>
    %cst_21 = arith.constant 9.99999974E-6 : f32
    %34 = vector.broadcast %cst_21 : f32 to vector<8x1xf32>
    %35 = arith.addf %31, %34 : vector<8x1xf32>
    %36 = math.rsqrt %35 : vector<8x1xf32>
    %37 = vector.broadcast %36 : vector<8x1xf32> to vector<8x32xf32>
    %38 = arith.mulf %33, %37 : vector<8x32xf32>
    %c0_22 = arith.constant 0 : index
    %c0_23 = arith.constant 0 : index
    %39 = vector.load %arg7[%c0_22, %c0_23] : memref<1x32xf32, #tpu.memory_space<vmem>>, vector<1x32xf32>
    %40 = vector.broadcast %39 : vector<1x32xf32> to vector<8x32xf32>
    %41 = arith.mulf %38, %40 : vector<8x32xf32>
    %c0_24 = arith.constant 0 : index
    %c0_25 = arith.constant 0 : index
    %42 = vector.load %arg8[%c0_24, %c0_25] : memref<1x32xf32, #tpu.memory_space<vmem>>, vector<1x32xf32>
    %43 = vector.broadcast %42 : vector<1x32xf32> to vector<8x32xf32>
    %44 = arith.addf %41, %43 : vector<8x32xf32>
    %cst_26 = arith.constant 5.000000e-01 : f32
    %45 = vector.broadcast %cst_26 : f32 to vector<8x32xf32>
    %46 = arith.mulf %45, %44 : vector<8x32xf32>
    %cst_27 = arith.constant 0.707106769 : f32
    %47 = vector.broadcast %cst_27 : f32 to vector<8x32xf32>
    %48 = arith.mulf %44, %47 : vector<8x32xf32>
    %cst_28 = arith.constant 0.000000e+00 : f32
    %49 = vector.broadcast %cst_28 : f32 to vector<8x32xf32>
    %50 = arith.cmpf oge, %48, %49 : vector<8x32xf32>
    %cst_29 = arith.constant 1.000000e+00 : f32
    %cst_30 = arith.constant -1.000000e+00 : f32
    %51 = vector.broadcast %cst_29 : f32 to vector<8x32xf32>
    %52 = vector.broadcast %cst_30 : f32 to vector<8x32xf32>
    %53 = arith.select %50, %51, %52 : vector<8x32xi1>, vector<8x32xf32>
    %54 = math.absf %48 : vector<8x32xf32>
    %cst_31 = arith.constant 0.327591091 : f32
    %55 = vector.broadcast %cst_31 : f32 to vector<8x32xf32>
    %56 = arith.mulf %55, %54 : vector<8x32xf32>
    %cst_32 = arith.constant 1.000000e+00 : f32
    %57 = vector.broadcast %cst_32 : f32 to vector<8x32xf32>
    %58 = arith.addf %57, %56 : vector<8x32xf32>
    %cst_33 = arith.constant 1.000000e+00 : f32
    %59 = vector.broadcast %cst_33 : f32 to vector<8x32xf32>
    %60 = arith.divf %59, %58 : vector<8x32xf32>
    %cst_34 = arith.constant 1.06140542 : f32
    %61 = vector.broadcast %cst_34 : f32 to vector<8x32xf32>
    %62 = arith.mulf %60, %61 : vector<8x32xf32>
    %cst_35 = arith.constant -1.45315206 : f32
    %63 = vector.broadcast %cst_35 : f32 to vector<8x32xf32>
    %64 = arith.addf %63, %62 : vector<8x32xf32>
    %65 = arith.mulf %60, %64 : vector<8x32xf32>
    %cst_36 = arith.constant 1.42141378 : f32
    %66 = vector.broadcast %cst_36 : f32 to vector<8x32xf32>
    %67 = arith.addf %66, %65 : vector<8x32xf32>
    %68 = arith.mulf %60, %67 : vector<8x32xf32>
    %cst_37 = arith.constant -0.284496725 : f32
    %69 = vector.broadcast %cst_37 : f32 to vector<8x32xf32>
    %70 = arith.addf %69, %68 : vector<8x32xf32>
    %71 = arith.mulf %60, %70 : vector<8x32xf32>
    %cst_38 = arith.constant 0.254829586 : f32
    %72 = vector.broadcast %cst_38 : f32 to vector<8x32xf32>
    %73 = arith.addf %72, %71 : vector<8x32xf32>
    %74 = arith.mulf %60, %73 : vector<8x32xf32>
    %cst_39 = arith.constant 0.000000e+00 : f32
    %75 = vector.broadcast %cst_39 : f32 to vector<8x32xf32>
    %76 = arith.subf %75, %54 : vector<8x32xf32>
    %77 = arith.mulf %76, %54 : vector<8x32xf32>
    %78 = math.exp %77 : vector<8x32xf32>
    %79 = arith.mulf %74, %78 : vector<8x32xf32>
    %cst_40 = arith.constant 1.000000e+00 : f32
    %80 = vector.broadcast %cst_40 : f32 to vector<8x32xf32>
    %81 = arith.subf %80, %79 : vector<8x32xf32>
    %82 = arith.mulf %53, %81 : vector<8x32xf32>
    %cst_41 = arith.constant 1.000000e+00 : f32
    %83 = vector.broadcast %cst_41 : f32 to vector<8x32xf32>
    %84 = arith.addf %83, %82 : vector<8x32xf32>
    %85 = arith.mulf %46, %84 : vector<8x32xf32>
    %cst_42 = arith.constant -1.000000e+05 : f32
    %cst_43 = arith.constant 1.000000e+05 : f32
    %86 = vector.broadcast %cst_42 : f32 to vector<8x32xf32>
    %87 = arith.maximumf %86, %85 : vector<8x32xf32>
    %88 = vector.broadcast %cst_43 : f32 to vector<8x32xf32>
    %89 = arith.minimumf %88, %87 : vector<8x32xf32>
    %c0_44 = arith.constant 0 : index
    %c0_45 = arith.constant 0 : index
    %c0_46 = arith.constant 0 : index
    %90 = vector.load %arg9[%c0_44, %c0_45, %c0_46] : memref<1x8x32xf32, #tpu.memory_space<vmem>>, vector<1x8x32xf32>
    %91 = vector.shape_cast %90 : vector<1x8x32xf32> to vector<8x32xf32>
    %92 = vector.shape_cast %89 : vector<8x32xf32> to vector<1x8x32xf32>
    tpu.vector_store %arg9[%c0_44, %c0_45, %c0_46], %92 {strides = array<i32>} : memref<1x8x32xf32, #tpu.memory_space<vmem>>, vector<1x8x32xf32>,
    return
  }
  func.func @transform_0(%arg0: i32) -> (i32, i32, i32) {
    %c0_i32 = arith.constant 0 : i32
    %c0_i32_0 = arith.constant 0 : i32
    %c0_i32_1 = arith.constant 0 : i32
    return %arg0, %c0_i32, %c0_i32_0 : i32, i32, i32
  }
  func.func @transform_1(%arg0: i32) -> (i32, i32, i32) {
    %c0_i32 = arith.constant 0 : i32
    %c0_i32_0 = arith.constant 0 : i32
    %c0_i32_1 = arith.constant 0 : i32
    return %arg0, %c0_i32, %c0_i32_0 : i32, i32, i32
  }
  func.func @transform_2(%arg0: i32) -> (i32, i32) {
    %c0_i32 = arith.constant 0 : i32
    %c0_i32_0 = arith.constant 0 : i32
    %c0_i32_1 = arith.constant 0 : i32
    return %c0_i32, %c0_i32_0 : i32, i32
  }
  func.func @transform_3(%arg0: i32) -> (i32, i32) {
    %c0_i32 = arith.constant 0 : i32
    %c0_i32_0 = arith.constant 0 : i32
    %c0_i32_1 = arith.constant 0 : i32
    return %c0_i32, %c0_i32_0 : i32, i32
  }
  func.func @transform_4(%arg0: i32) -> (i32, i32) {
    %c0_i32 = arith.constant 0 : i32
    %c0_i32_0 = arith.constant 0 : i32
    %c0_i32_1 = arith.constant 0 : i32
    return %c0_i32, %c0_i32_0 : i32, i32
  }
  func.func @transform_5(%arg0: i32) -> (i32, i32) {
    %c0_i32 = arith.constant 0 : i32
    %c0_i32_0 = arith.constant 0 : i32
    %c0_i32_1 = arith.constant 0 : i32
    return %c0_i32, %c0_i32_0 : i32, i32
  }
  func.func @transform_6(%arg0: i32) -> (i32, i32) {
    %c0_i32 = arith.constant 0 : i32
    %c0_i32_0 = arith.constant 0 : i32
    %c0_i32_1 = arith.constant 0 : i32
    return %c0_i32, %c0_i32_0 : i32, i32
  }
  func.func @transform_7(%arg0: i32) -> (i32, i32) {
    %c0_i32 = arith.constant 0 : i32
    %c0_i32_0 = arith.constant 0 : i32
    %c0_i32_1 = arith.constant 0 : i32
    return %c0_i32, %c0_i32_0 : i32, i32
  }
  func.func @transform_8(%arg0: i32) -> (i32, i32, i32) {
    %c0_i32 = arith.constant 0 : i32
    %c0_i32_0 = arith.constant 0 : i32
    %c0_i32_1 = arith.constant 0 : i32
    return %arg0, %c0_i32, %c0_i32_0 : i32, i32, i32
  }
}

</mosaic_0001>

<bundles_post_ra>
// kernel: time_frequency_attention.5
= control target key start
LH: loop header
LB: loop body
LE: loop exit
PB: predicated region body
PF: predicated region fallthrough
CT: control target
= control target key end

     0   :  { %s504_s15 = smov 0   ;;  %s540_s0 = inlined_call_operand.vmem [shape: f32[2,8,32], index: 0, kind: input, shape index: {}]   ;;  %s541_s1 = inlined_call_operand.vmem [shape: bf16[13,8], index: 1, kind: input, shape index: {}]   ;;  %s542_s2 = inlined_call_operand.vmem [shape: bf16[32,32], index: 2, kind: input, shape index: {}]   ;;  %s543_s3 = inlined_call_operand.vmem [shape: f32[1,32], index: 3, kind: input, shape index: {}]   ;;  %s544_s4 = inlined_call_operand.vmem [shape: f32[2,5,32], index: 4, kind: output, shape index: {}]  }
   0x1 LB: > { %s414_s16 = sadd.s32 4294967295, %s474_s15   ;;  %p418_p0 = scmp.ge.s32.totalorder %s474_s15, 1  ;;  %s474_s15 = sphi %s504_s15, %s14_s15  }
   0x2   : > { %p161_p1 = scmp.lt.s32.totalorder %s474_s15, 3 }
   0x4   : > { %p162_p2 = pnand %p418_p0, %p161_p1 }
   0x5   : > { %p185_p3 = scmp.lt.s32.totalorder (!%p162_p2), %s414_s16, 1 }
   0x6   : > { %165 = sbr.rel (%p162_p2) target bundleno = 492 (0x1ec), region = 36 }
   0xb   : > { %v476_v0 = vmov 0.0   ;;  %vm477_vm0 = vmmov 0   ;;  %s546_s16 = smov (!%p185_p3, %s414_s16), 1  ;;  %vm208_vm1 = vcmask 1043456   ;;  %v459_v5 = vld [vmem:[%s541_s1] sm:$0x7f]  }
   0xc   : > { %434 = vmatprep.subr.bf16.mxu0 %v476_v0  ;;  %436 = vmatprep.mubr.msk.bf16.mxu0 %vm477_vm0, %v476_v0  ;;  %s419_s17 = sshll.u32 %s546_s16, 3  ;;  %vm204_vm2 = vcmask 64512   ;;  %v460_v6 = vld [vmem:[%s542_s2 + $0x8] sm:$0xff]   ;;  %v461_v7 = vld [vmem:[%s542_s2] sm:$0xff]   ;;  %vm288_vm5 = vcmask 261120   ;;  %v478_v48 = vmov -1.0  }
   0xd   : > { %440 = vmatprep.subr.bf16.mxu1 %v476_v0  ;;  %444 = vmatprep.mubr.msk.bf16.mxu1 %vm477_vm0, %v476_v0  ;;  %s188_s20 = scalar_lea.vmem %s540_s0, %s419_s17  ;;  %v423_v22 = vld [vmem:[%s543_s3] ss:$0 sm:$0xff]  ;;  %s192_s5 = scalar_lea.vmem %s544_s4, %s419_s17  ;;  %vm359_vm7 = vcmask 258048  }
   0xe   : > { %v194_v1 = vld [vmem:[%s188_s20] sm:$0xff]  ;;  %441 = vmatpush3.bf16.msra.mxu1 %v460_v6 }
   0xf   : > { %v195_v2 = vadd.f32 1e-08, %v194_v1  ;;  %442 = vmatprep.subr.bf16.mxu1 %v476_v0 }
  0x11   : > { %v196_v3 = vpack.c.bf16 %v195_v2, %v195_v2 }
  0x12   : > { %443 = vmatpush3.bf16.msra.mxu1 %v461_v7 }
  0x13   : > { %v210_v4 = vsel %vm208_vm1, %v196_v3, 0 }
  0x14   : > { %435 = vmatpush3.bf16.msra.mxu0 %v210_v4 }
  0x17   : > { %437 = vmatmul.mubr.msk.bf16.vlgmr.msra.gmra.mxu0 %vm204_vm2, %v459_v5 }
  0xd7   : > { %v246_v8 = vpop.f32.mrf.mxu0 }
  0xd8   : > { %v253_v11 = vmul.f32 %v246_v8, %v246_v8 }
  0xd9   : > { %v438_v9 = vpop.f32.mrf.mxu0 }
  0xdb   : > { %v249_v10 = vpop.f32.mrf.mxu0 }
  0xdc   : > { %v254_v12 = vmul.f32 %v249_v10, %v249_v10 }
  0xdd   : > { %v439_v13 = vpop.f32.mrf.mxu0 }
  0xde   : > { %v255_v14 = vadd.f32 %v254_v12, %v253_v11 }
  0xe0   : > { %v256_v15 = vadd.f32 1e-10, %v255_v14 }
  0xe2   : > { %462 = vrsqrt.f32 %v256_v15  ;;  %vm259_vm3 = vcmp.eq.f32.partialorder %v256_v15, inf  ;;  %v262_v18 = vand.u32 2147483648, %v256_v15  ;;  %vm261_vm4 = vcmp.eq.f32.partialorder %v256_v15, 0.0 }
  0xef   : > { %v463_v16 = vpop.eup %462 }
  0xf0   : > { %v258_v17 = vmul.f32 %v463_v16, %v256_v15 }
  0xf2   : > { %v260_v19 = vsel %vm259_vm3, %v256_v15, %v258_v17 }
  0xf3   : > { %v263_v20 = vsel %vm261_vm4, %v262_v18, %v260_v19 }
  0xf4   : > { %v264_v21 = vpack.c.bf16 %v263_v20, %v263_v20 }
  0xf6   : > { %445 = vmatmul.mubr.msk.bf16.vlgmr.msra.gmra.mxu1 %vm288_vm5, %v264_v21 }
 0x1b6   : > { %v326_v23 = vpop.f32.mrf.mxu1 }
 0x1b7   : > { %v327_v24 = vadd.f32 %v423_v22, %v326_v23 }
 0x1b8   : > { %v446_v25 = vpop.f32.mrf.mxu1 }
 0x1b9   : > { %v333_v26 = vmul.f32 0.70710677, %v327_v24  ;;  %v332_v51 = vmul.f32 0.5, %v327_v24 }
 0x1ba   : > { %v329_v27 = vpop.f32.mrf.mxu1 }
 0x1bb   : > { %v336_v28 = vand.u32 2147483647, %v333_v26  ;;  %vm334_vm6 = vcmp.ge.f32.partialorder %v333_v26, 0.0 }
 0x1bc   : > { %v447_v29 = vpop.f32.mrf.mxu1  ;;  %v335_v49 = vsel %vm334_vm6, 1.0, %v478_v48 }
 0x1bd   : > { %v337_v30 = vmul.f32 0.3275911, %v336_v28  ;;  %v350_v32 = vsub.f32 0.0, %v336_v28 }
 0x1bf   : > { %v338_v31 = vadd.f32 1.0, %v337_v30  ;;  %v351_v33 = vmul.f32 %v350_v32, %v336_v28 }
 0x1c1   : > { %464 = vrcp.f32 %v338_v31  ;;  %v352_v36 = vmul.f32 1.442695, %v351_v33 }
 0x1c3   : > { %466 = vpow2.f32 %v352_v36 }
 0x1ce   : > { %v465_v34 = vpop.eup %464 }
 0x1cf   : > { %v341_v35 = vmul.f32 1.0614054, %v465_v34 }
 0x1d0   : > { %v467_v45 = vpop.eup %466 }
 0x1d1   : > { %v342_v37 = vadd.f32 -1.4531521, %v341_v35 }
 0x1d3   : > { %v343_v38 = vmul.f32 %v465_v34, %v342_v37 }
 0x1d5   : > { %v344_v39 = vadd.f32 1.4214138, %v343_v38 }
 0x1d7   : > { %v345_v40 = vmul.f32 %v465_v34, %v344_v39 }
 0x1d9   : > { %v346_v41 = vadd.f32 -0.28449672, %v345_v40 }
 0x1db   : > { %v347_v42 = vmul.f32 %v465_v34, %v346_v41 }
 0x1dd   : > { %v348_v43 = vadd.f32 0.2548296, %v347_v42 }
 0x1df   : > { %v349_v44 = vmul.f32 %v465_v34, %v348_v43 }
 0x1e1   : > { %v354_v46 = vmul.f32 %v467_v45, %v349_v44 }
 0x1e3   : > { %v355_v47 = vsub.f32 1.0, %v354_v46 }
 0x1e5   : > { %v356_v50 = vmul.f32 %v355_v47, %v335_v49 }
 0x1e7   : > { %v357_v52 = vadd.f32 1.0, %v356_v50 }
 0x1e9   : > { %v358_v53 = vmul.f32 %v357_v52, %v332_v51 }
 0x1eb   : > { %360 = vst.msk [vmem:[%s192_s5] sm:$0x1f] %vm359_vm7, %v358_v53 }
 0x1ec PF: > { %s14_s15 = sadd.s32 1, %s474_s15  }
 0x1ed   : > { %p11_p4 = scmp.ge.s32.totalorder %s14_s15, 4  }
 0x1ef   :  { %13 = sbr.rel (!%p11_p4) target bundleno = 1 (0x1), region = 66 }

// kernel: time_frequency_attention.7
= control target key start
LH: loop header
LB: loop body
LE: loop exit
PB: predicated region body
PF: predicated region fallthrough
CT: control target
= control target key end

     0   :  { %13 = vsyncpa [#allocation3], 0  ;;  %s990_s0 = inlined_call_operand.vmem [shape: f32[2,8,32], index: 0, kind: input, shape index: {}]   ;;  %s991_s1 = inlined_call_operand.vmem [shape: f32[2,5,32], index: 1, kind: input, shape index: {}]   ;;  %s992_s2 = inlined_call_operand.vmem [shape: bf16[8,5], index: 2, kind: input, shape index: {}]   ;;  %s993_s3 = inlined_call_operand.vmem [shape: bf16[32,32], index: 3, kind: input, shape index: {}]   ;;  %s994_s4 = inlined_call_operand.vmem [shape: bf16[32,32], index: 4, kind: input, shape index: {}]   ;;  %s995_s5 = inlined_call_operand.vmem [shape: f32[1,32], index: 5, kind: input, shape index: {}]   ;;  %s996_s6 = inlined_call_operand.vmem [shape: f32[1,32], index: 6, kind: input, shape index: {}]   ;;  %s997_s7 = inlined_call_operand.vmem [shape: f32[1,32], index: 7, kind: input, shape index: {}]   ;;  %s998_s8 = inlined_call_operand.hbm [shape: f32[2,8,32], index: 8, kind: output, shape index: {}]  }
   0x1   :  { %15 = vsyncpa [#allocation3 + $0x1], 0  ;;  %s868_s27 = smov 0   ;;  %s870_s28 = smov 0  }
   0x2   :  { %s872_s29 = smov 0   ;;  %s874_s30 = smov 0  }
   0x3 LB: > { %s889_s9 = sadd.s32 4294967295, %s816_s30   ;;  %s650_s10 = sadd.s32 4294967294, %s816_s30   ;;  %s816_s30 = sphi %s874_s30, %s1004_s30   ;;  %s812_s29 = sphi %s872_s29, %s1003_s29   ;;  %s808_s28 = sphi %s870_s28, %s1002_s28   ;;  %s804_s27 = sphi %s868_s27, %s1001_s27  }
   0x4   : > { %s893_s11 = sadd.s32 1, %s816_s30   ;;  %s206_s12 = sadd.s32 1, %s812_s29 }
   0x5   : > { %s203_s13 = ssub.s32 %s816_s30, %s893_s11  ;;  %p216_p0 = scmp.ne.s32.totalorder %s812_s29, %s808_s28 }
   0x6   : > { %p204_p1 = scmp.eq.s32.totalorder %s203_s13, 0  ;;  %p217_p2 = scmp.eq.s32.totalorder %s889_s9, 1 }
   0x7   : > { %p222_p3 = scmp.ne.s32.totalorder %s808_s28, %s804_s27  ;;  %p223_p4 = scmp.eq.s32.totalorder %s650_s10, 1 }
   0x8   : > { %s904_s14 = scalar_select %p204_p1, %s812_s29, %s206_s12  }
   0x9   : > { %p906_p5 = por %p217_p2, %p216_p0  ;;  %p910_p6 = por %p223_p4, %p222_p3 }
   0xa   : > { %p653_p7 = scmp.ge.s32.totalorder %s816_s30, 1  ;;  %p273_p8 = scmp.lt.s32.totalorder %s816_s30, 3 }
   0xc   : > { %p274_p9 = pnand %p653_p7, %p273_p8 }
   0xd   : > { %p310_p10 = scmp.lt.s32.totalorder (!%p274_p9), %s889_s9, 1  ;;  %s307_s12 = sand.u32 (!%p274_p9), 1, %s808_s28  }
   0xe   : > { %277 = sbr.rel (%p274_p9) target bundleno = 806 (0x326), region = 52  ;;  %s654_s13 = sshll.u32 (!%p274_p9), %s307_s12, 3 }
   0xf   : > { %s670_s17 = sshll.u32 (!%p274_p9), %s889_s9, 7  ;;  %s309_s18 = scalar_lea.vmem (!%p274_p9), [#allocation2], %s654_s13 }
  0x10   : > { %s566_s23 = scalar_lea.sflag (!%p274_p9), [#allocation3], %s307_s12 }
  0x13   : > { %v746_v0 = vld [vmem:[%s994_s4 + $0x8] sm:$0xff]   ;;  %v818_v1 = vmov 0.0   ;;  %v747_v2 = vld [vmem:[%s994_s4] sm:$0xff]   ;;  %vm819_vm0 = vmmov 0   ;;  %s311_s21 = scalar_select %p310_p10, %s889_s9, 1  ;;  %vm341_vm1 = vcmask 261120  }
  0x14   : > { %681 = vmatprep.subr.bf16.mxu0 %v818_v1  ;;  %689 = vmatprep.subr.bf16.mxu1 %v818_v1  ;;  %vm395_vm2 = vcmask 1041408   ;;  %vm396_vm3 = vcmask 1042432   ;;  %v820_v6 = vmov 65535   ;;  %v389_v14 = vld [vmem:[%s992_s2] sm:$0xf]  ;;  %vm391_vm4 = vcmask 39936  }
  0x15   : > { %682 = vmatpush3.bf16.msra.mxu0 %v746_v0  ;;  %685 = vmatprep.mubr.msk.bf16.mxu0 %vm819_vm0, %v818_v1  ;;  %s655_s22 = sshll.u32 %s311_s21, 3  ;;  %v397_v7 = vsel %vm395_vm2, 4294967295, %v820_v6  ;;  %v748_v15 = vld [vmem:[%s993_s3 + $0x8] sm:$0xff]   ;;  %v749_v18 = vld [vmem:[%s993_s3] sm:$0xff]  }
  0x16   : > { %683 = vmatprep.subr.bf16.mxu0 %v818_v1  ;;  %691 = vmatprep.mubr.msk.bf16.mxu1 %vm819_vm0, %v818_v1  ;;  %s317_s25 = scalar_lea.vmem %s991_s1, %s655_s22  ;;  %v398_v9 = vsel %vm396_vm3, %v397_v7, 0  ;;  %s313_s19 = scalar_lea.vmem %s990_s0, %s655_s22  ;;  %v665_v25 = vld [vmem:[%s995_s5] ss:$0 sm:$0xff] }
  0x17   : > { %v321_v3 = vld [vmem:[%s317_s25] sm:$0x1f]  ;;  %s577_s22 = scalar_lea.hbm %s998_s8, %s670_s17  ;;  %s822_s25 = smov [#allocation2]  }
  0x18   : > { %v657_v4 = vclamps-f32 %v321_v3, 100000.0  ;;  %v319_v17 = vld [vmem:[%s313_s19] sm:$0xff]  ;;  %s579_s19 = sshll.u32 %s309_s18, 4  ;;  %s760_s26 = sshll.u32 %s822_s25, 4  ;;  %s580_s19 = int_to_ptr.vmem [resolvable:$true] %s579_s19  ;;  %s761_s26 = int_to_ptr.vmem [resolvable:$false] %s760_s26 }
  0x19   : > { %684 = vmatpush3.bf16.msra.mxu0 %v747_v2  ;;  %v320_v19 = vpack.c.bf16 %v319_v17, %v319_v17  ;;  %v666_v41 = vld [vmem:[%s996_s6] ss:$0 sm:$0xff]  ;;  %v821_v2 = vmov -1.0   ;;  %s756_s24 = scalar_lea.vmem %s580_s19, 128  ;;  %s762_s9 = scalar_lea.vmem %s761_s26, 256 }
  0x1a   : > { %v324_v5 = vpack.c.bf16 %v657_v4, %v657_v4  ;;  %v667_v43 = vld [vmem:[%s997_s7] ss:$0 sm:$0xff]  ;;  %p757_p11 = scmp.ne.s32.totalorder %s580_s19, %s756_s24  ;;  %p763_p0 = scmp.lt.s32.totalorder %s580_s19, %s761_s26 }
  0x1b   : > { %p764_p1 = scmp.lt.s32.totalorder %s762_s9, %s756_s24 }
  0x1c   : > { %686 = vmatmul.mubr.msk.bf16.vlgmr.msra.gmra.mxu0 %vm341_vm1, %v324_v5  ;;  %p758_p12 = pnand %p757_p11, %p906_p5 }
  0x1d   : > { %p765_p2 = por %p764_p1, %p763_p0 }
  0x1e   : > { %p759_p13 = pneg %p758_p12 }
  0x20   : > { %p766_p3 = pnand %p765_p2, %p759_p13 }
  0xdc   : > { %v379_v8 = vpop.f32.mrf.mxu0 }
  0xdd   : > { %v390_v10 = vpack.c.bf16 %v379_v8, %v379_v8 }
  0xde   : > { %v687_v11 = vpop.f32.mrf.mxu0 }
  0xdf   : > { %v400_v12 = vand.u32 %v398_v9, %v390_v10 }
  0xe0   : > { %v382_v13 = vpop.f32.mrf.mxu0 }
  0xe1   : > { %690 = vmatpush3.bf16.msra.mxu1 %v400_v12 }
  0xe2   : > { %v688_v16 = vpop.f32.mrf.mxu0  ;;  %695 = vmatprep.subr.bf16.mxu1 %v818_v1 }
  0xe4   : > { %692 = vmatmul.mubr.msk.bf16.vlgmr.msra.gmra.mxu1 %vm391_vm4, %v389_v14 }
  0xe5   : > { %696 = vmatpush3.bf16.msra.mxu1 %v748_v15  ;;  %699 = vmatprep.mubr.msk.bf16.mxu1 %vm819_vm0, %v818_v1 }
  0xe6   : > { %697 = vmatprep.subr.bf16.mxu1 %v818_v1 }
  0xe9   : > { %698 = vmatpush3.bf16.msra.mxu1 %v749_v18 }
  0xec   : > { %700 = vmatmul.mubr.msk.bf16.vlgmr.msra.gmra.mxu1 %vm341_vm1, %v320_v19 }
 0x1a4   : > { %v436_v20 = vpop.f32.mrf.mxu1 }
 0x1a6   : > { %v693_v21 = vpop.f32.mrf.mxu1 }
 0x1a8   : > { %v439_v22 = vpop.f32.mrf.mxu1 }
 0x1aa   : > { %v694_v23 = vpop.f32.mrf.mxu1 }
 0x1ac   : > { %v491_v24 = vpop.f32.mrf.mxu1 }
 0x1ad   : > { %v492_v26 = vadd.f32 %v491_v24, %v436_v20 }
 0x1ae   : > { %v701_v27 = vpop.f32.mrf.mxu1 }
 0x1af   : > { %v504_v28 = vadd.f32 %v665_v25, %v492_v26 }
 0x1b0   : > { %v494_v29 = vpop.f32.mrf.mxu1 }
 0x1b1   : > { %v505_v30 = vsel %vm341_vm1, %v504_v28, 0.0 }
 0x1b2   : > { %506 = vadd.xlane.f32.xlu0 %v505_v30  ;;  %v702_v31 = vpop.f32.mrf.mxu1 }
 0x23b   : > { %v507_v32 = vpop.xlane.xlu0 %506 }
 0x23c   : > { %v509_v33 = vmul.f32 0.03125, %v507_v32 }
 0x23e   : > { %v510_v34 = vsub.f32 %v504_v28, %v509_v33 }
 0x240   : > { %v511_v35 = vmul.f32 %v510_v34, %v510_v34 }
 0x242   : > { %v512_v36 = vsel %vm341_vm1, %v511_v35, 0.0 }
 0x243   : > { %513 = vadd.xlane.f32.xlu0 %v512_v36 }
 0x2cc   : > { %v514_v37 = vpop.xlane.xlu0 %513 }
 0x2cd   : > { %v515_v38 = vmul.f32 0.03125, %v514_v37 }
 0x2cf   : > { %v516_v39 = vadd.f32 1e-05, %v515_v38 }
 0x2d1   : > { %750 = vrsqrt.f32 %v516_v39 }
 0x2de   : > { %v751_v40 = vpop.eup %750 }
 0x2df   : > { %v518_v42 = vmul.f32 %v751_v40, %v510_v34 }
 0x2e1   : > { %v526_v44 = vmul.f32 %v666_v41, %v518_v42 }
 0x2e3   : > { %v534_v45 = vadd.f32 %v667_v43, %v526_v44 }
 0x2e5   : > { %v536_v46 = vmul.f32 0.70710677, %v534_v45  ;;  %v535_v5 = vmul.f32 0.5, %v534_v45 }
 0x2e7   : > { %v539_v47 = vand.u32 2147483647, %v536_v46  ;;  %vm537_vm5 = vcmp.ge.f32.partialorder %v536_v46, 0.0 }
 0x2e8   : > { %v538_v3 = vsel %vm537_vm5, 1.0, %v821_v2 }
 0x2e9   : > { %v540_v48 = vmul.f32 0.3275911, %v539_v47  ;;  %v553_v50 = vsub.f32 0.0, %v539_v47 }
 0x2eb   : > { %v541_v49 = vadd.f32 1.0, %v540_v48  ;;  %v554_v51 = vmul.f32 %v553_v50, %v539_v47 }
 0x2ed   : > { %752 = vrcp.f32 %v541_v49  ;;  %v555_v54 = vmul.f32 1.442695, %v554_v51 }
 0x2ef   : > { %754 = vpow2.f32 %v555_v54 }
 0x2fa   : > { %v753_v52 = vpop.eup %752 }
 0x2fb   : > { %v544_v53 = vmul.f32 1.0614054, %v753_v52 }
 0x2fc   : > { %v755_v63 = vpop.eup %754 }
 0x2fd   : > { %v545_v55 = vadd.f32 -1.4531521, %v544_v53 }
 0x2ff   : > { %v546_v56 = vmul.f32 %v753_v52, %v545_v55 }
 0x301   : > { %v547_v57 = vadd.f32 1.4214138, %v546_v56 }
 0x303   : > { %v548_v58 = vmul.f32 %v753_v52, %v547_v57 }
 0x305   : > { %v549_v59 = vadd.f32 -0.28449672, %v548_v58 }
 0x307   : > { %v550_v60 = vmul.f32 %v753_v52, %v549_v59 }
 0x309   : > { %v551_v61 = vadd.f32 0.2548296, %v550_v60 }
 0x30b   : > { %v552_v62 = vmul.f32 %v753_v52, %v551_v61 }
 0x30d   : > { %v557_v0 = vmul.f32 %v755_v63, %v552_v62 }
 0x30f   : > { %v558_v1 = vsub.f32 1.0, %v557_v0 }
 0x311   : > { %v559_v4 = vmul.f32 %v558_v1, %v538_v3 }
 0x313   : > { %v560_v6 = vadd.f32 1.0, %v559_v4 }
 0x315   : > { %v561_v7 = vmul.f32 %v560_v6, %v535_v5 }
 0x317   : > { %v668_v8 = vclamps-f32 %v561_v7, 100000.0 }
 0x319   : > { %564 = vst.msk [vmem:[%s309_s18] sm:$0xff] %vm341_vm1, %v668_v8 }
 0x31a   : > { %769 = shalt.err (!%p766_p3)
}
 0x31b   : > { %s770_s10 = scalar_lea.hbm %s577_s22, 128  ;;  %s774_s17 = scalar_lea.hbm %s998_s8, 256 }
 0x31c   : > { %p771_p4 = scmp.ne.s32.totalorder %s577_s22, %s770_s10  ;;  %p775_p9 = scmp.lt.s32.totalorder %s577_s22, %s998_s8 }
 0x31d   : > { %p776_p10 = scmp.lt.s32.totalorder %s774_s17, %s770_s10 }
 0x31e   : > { %p772_p7 = pnand %p771_p4, %p906_p5 }
 0x31f   : > { %p777_p11 = por %p776_p10, %p775_p9 }
 0x320   : > { %p773_p8 = pneg %p772_p7 }
 0x322   : > { %p778_p12 = pnand %p777_p11, %p773_p8 }
 0x324   : > { %781 = shalt.err (!%p778_p12)
}
 0x325   : > { %703 = dma.vmem_to_hbm [thread:$0]  (%p906_p5), %s580_s19, 128, %s577_s22, %s566_s23  }
 0x326 PF: > { %p709_p13 = scmp.ge.s32.totalorder %s816_s30, 2  ;;  %s591_s21 = sand.u32 1, %s804_s27  }
 0x327   : > { %s592_s24 = scalar_lea.sflag [#allocation3], %s591_s21 }
 0x328   : > { %p706_p0 = pnand %p709_p13, %p910_p6 }
 0x32a   : > { %p707_p1 = pneg %p706_p0 }
 0x32c   : > { %799 = dma.done.wait (%p707_p1), %s592_s24, 128  }
 0x32d   : > { %801 = vsyncadd (%p707_p1), %s592_s24, 4294967168  ;;  %p18_p2 = scmp.ge.s32.totalorder %s893_s11, 4   ;;  %s1001_s27 = smov %s808_s28 }
 0x32e   : > { %s1002_s28 = smov %s812_s29  ;;  %s1003_s29 = smov %s904_s14 }
 0x32f   : > { %s1004_s30 = smov %s893_s11  ;;  %20 = sbr.rel (!%p18_p2) target bundleno = 3 (0x3), region = 90 }
 0x334   :  { %597 = vsyncpa [#allocation3], 1 }
 0x335   :  { %599 = vsyncpa [#allocation3 + $0x1], 1 }

// kernel: time_frequency_attention.4
= control target key start
LH: loop header
LB: loop body
LE: loop exit
PB: predicated region body
PF: predicated region fallthrough
CT: control target
= control target key end

     0   :  { %s1536_s21 = smov 0   ;;  %s1774_s0 = inlined_call_operand.vmem [shape: f32[2,8,32], index: 0, kind: input, shape index: {}]   ;;  %s1775_s1 = inlined_call_operand.vmem [shape: bf16[32,96], index: 1, kind: input, shape index: {}]   ;;  %s1776_s2 = inlined_call_operand.vmem [shape: f32[1,96], index: 2, kind: input, shape index: {}]   ;;  %s1777_s3 = inlined_call_operand.vmem [shape: bf16[32,32], index: 3, kind: input, shape index: {}]   ;;  %s1778_s4 = inlined_call_operand.vmem [shape: f32[1,32], index: 4, kind: input, shape index: {}]   ;;  %s1779_s5 = inlined_call_operand.vmem [shape: bf16[15,8], index: 5, kind: input, shape index: {}]   ;;  %s1780_s6 = inlined_call_operand.vmem [shape: f32[2,8,32], index: 6, kind: output, shape index: {}]  }
   0x1 LB: > { %s1258_s22 = sadd.s32 4294967295, %s1476_s21   ;;  %p1262_p0 = scmp.ge.s32.totalorder %s1476_s21, 1  ;;  %s1476_s21 = sphi %s1536_s21, %s16_s21  }
   0x2   : > { %p211_p1 = scmp.lt.s32.totalorder %s1476_s21, 3 }
   0x4   : > { %p212_p2 = pnand %p1262_p0, %p211_p1 }
   0x5   : > { %p239_p3 = scmp.lt.s32.totalorder (!%p212_p2), %s1258_s22, 1  ;;  %s1480_s11 = smov (!%p212_p2), 96  }
   0x6   : > { %215 = sbr.rel (%p212_p2) target bundleno = 5283 (0x14a3), region = 44  ;;  %s1481_s12 = smov (!%p212_p2), 8  }
   0x7   : > { %s1482_s13 = smov (!%p212_p2), 121   ;;  %s1483_s14 = smov (!%p212_p2), 1  }
   0x8   : > { %s1484_s15 = smov (!%p212_p2), 114   ;;  %s1485_s16 = smov (!%p212_p2), 2  }
   0x9   : > { %s1486_s17 = smov (!%p212_p2), 115   ;;  %s1487_s18 = smov (!%p212_p2), 4  }
   0xa   : > { %s1488_s19 = smov (!%p212_p2), 117   ;;  %s1489_s20 = smov (!%p212_p2), 64  }
   0xb   : > { %v1441_v0 = vld [vmem:[%s1775_s1 + $0x8] sm:$0xff]   ;;  %v1478_v1 = vmov 0.0   ;;  %v1442_v2 = vld [vmem:[%s1775_s1] sm:$0xff]   ;;  %vm1479_vm0 = vmmov 0   ;;  %s1788_s22 = smov (!%p239_p3, %s1258_s22), 1  ;;  %vm331_vm1 = vcmask 64512   ;;  %v320_v27 = vlaneseq }
   0xc   : > { %1322 = vmatprep.subr.bf16.mxu0 %v1478_v1  ;;  %1330 = vmatprep.subr.bf16.mxu1 %v1478_v1  ;;  %v1443_v3 = vld [vmem:[%s1779_s5] sm:$0xff]   ;;  %s1263_s29 = sshll.u32 %s1788_s22, 3  ;;  %vm273_vm2 = vcmask 261120   ;;  %vm444_vm3 = vcmask 7168   ;;  %vm454_vm5 = vcmask 15360   ;;  %vm464_vm7 = vcmask 31744  }
   0xd   : > { %1323 = vmatpush3.bf16.msra.mxu0 %v1441_v0  ;;  %1326 = vmatprep.mubr.msk.bf16.mxu0 %vm1479_vm0, %v1478_v1  ;;  %s242_s8 = scalar_lea.vmem %s1774_s0, %s1263_s29  ;;  %v1570_v6 = vsel %vm331_vm1, %v1443_v3, 0  ;;  %v1265_v7 = vld [vmem:[%s1776_s2] ss:$0 sm:$0xff]  ;;  %v321_v28 = vshrl.u32 %v320_v27, 7  ;;  %s1490_s23 = smov 88   ;;  %vm491_vm9 = vcmask 1043456  }
   0xe   : > { %1324 = vmatprep.subr.bf16.mxu0 %v1478_v1  ;;  %1332 = vmatprep.mubr.msk.bf16.mxu1 %vm1479_vm0, %v1478_v1  ;;  %v248_v4 = vld [vmem:[%s242_s8] sm:$0xff]  ;;  %s1491_s24 = smov 120   ;;  %s1492_s25 = smov 56   ;;  %vm1133_vm10 = vcmask 130048   ;;  %vm1135_vm11 = vcmask 195584  }
   0xf   : > { %v249_v5 = vpack.c.bf16 %v248_v4, %v248_v4  ;;  %v322_v29 = vand.u32 1, %v321_v28  ;;  %v324_v35 = vand.u32 2, %v321_v28  ;;  %v326_v41 = vand.u32 4, %v321_v28  ;;  %s1493_s26 = smov 80   ;;  %s1494_s27 = smov 112  }
  0x10   : > { %s1495_s28 = smov 48   ;;  %s1496_s30 = smov 72  }
  0x11   : > { %1325 = vmatpush3.bf16.msra.mxu0 %v1442_v2  ;;  %vm1598_vm4 = vcmp.ne.s32.totalorder %v322_v29, 0  ;;  %vm1607_vm6 = vcmp.ne.s32.totalorder %v324_v35, 0  ;;  %vm1616_vm8 = vcmp.ne.s32.totalorder %v326_v41, 0  ;;  %s1497_s7 = smov 104   ;;  %s1498_s8 = smov 40  }
  0x12   : > { %1336 = vmatprep.subr.bf16.mxu0 %v1478_v1  ;;  %s1499_s9 = smov 16  }
  0x14   : > { %1327 = vmatmul.mubr.msk.bf16.vlgmr.msra.gmra.mxu0 %vm273_vm2, %v249_v5 }
  0x15   : > { %1337 = vmatpush3.bf16.xpose.msra.mxu0 %v1570_v6  ;;  %1338 = vmatprep.mubr.msk.bf16.mxu0 %vm1479_vm0, %v1478_v1 }
  0x16   : > { %1348 = vmatprep.subr.bf16.mxu0 %v1478_v1 }
  0xd4   : > { %v311_v8 = vpop.f32.mrf.mxu0 }
  0xd5   : > { %v312_v9 = vadd.f32 %v1265_v7, %v311_v8 }
  0xd6   : > { %v1328_v10 = vpop.f32.mrf.mxu0 }
  0xd7   : > { %v1580_v11 = vpack.c.bf16 %v312_v9, %v312_v9 }
  0xd8   : > { %v314_v12 = vpop.f32.mrf.mxu0 }
  0xd9   : > { %329 = vrot.lane.b32.xlu0 %v1580_v11, %s1480_s11  ;;  %1339 = vmatmul.mubr.msk.bf16.vlgmr.msra.gmra.mxu0 %vm331_vm1, %v1580_v11 }
  0xda   : > { %v1329_v13 = vpop.f32.mrf.mxu0  ;;  %1350 = vmatprep.mubr.msk.bf16.mxu0 %vm1479_vm0, %v1478_v1 }
 0x14b   : > { %v330_v14 = vpop.permute.xlu0 %329 }
 0x14c   : > { %v336_v15 = vsel %vm331_vm1, %v330_v14, 0 }
 0x14d   : > { %1331 = vmatpush3.bf16.xpose.msra.mxu1 %v336_v15 }
 0x14e   : > { %1342 = vmatprep.subr.bf16.mxu1 %v1478_v1 }
 0x154   : > { %1333 = vmatmul.mubr.msk.bf16.vlgmr.msra.gmra.mxu1 %vm331_vm1, %v1580_v11 }
 0x155   : > { %1344 = vmatprep.mubr.msk.bf16.mxu1 %vm1479_vm0, %v1478_v1 }
 0x199   : > { %v423_v16 = vpop.f32.mrf.mxu0 }
 0x19a   : > { %433 = vrot.lane.b32.xlu1 %v423_v16, %s1481_s12  ;;  %430 = vrot.lane.b32.xlu0 %v423_v16, %s1482_s13 }
 0x19b   : > { %v1340_v17 = vpop.f32.mrf.mxu0 }
 0x19d   : > { %v426_v18 = vpop.f32.mrf.mxu0 }
 0x19f   : > { %v1341_v19 = vpop.f32.mrf.mxu0 }
 0x20c   : > { %v434_v20 = vpop.permute.xlu1 %433  ;;  %v431_v21 = vpop.permute.xlu0 %430 }
 0x20d   : > { %v436_v22 = vsel %vm331_vm1, %v431_v21, %v434_v20 }
 0x20e   : > { %441 = vrot.lane.b32.xlu0 %v436_v22, %s1483_s14  ;;  %438 = vrot.lane.b32.xlu1 %v436_v22, %s1484_s15 }
 0x214   : > { %v372_v23 = vpop.f32.mrf.mxu1 }
 0x215   : > { %v378_v42 = vmul.f32 0.35355338, %v372_v23 }
 0x216   : > { %v1334_v24 = vpop.f32.mrf.mxu1 }
 0x217   : > { %v1270_v46 = vclamps-f32 %v378_v42, 100000.0 }
 0x218   : > { %v375_v25 = vpop.f32.mrf.mxu1 }
 0x21a   : > { %v1335_v26 = vpop.f32.mrf.mxu1 }
 0x280   : > { %v442_v31 = vpop.permute.xlu0 %441  ;;  %v439_v32 = vpop.permute.xlu1 %438 }
 0x281   : > { %v445_v33 = vsel %vm444_vm3, %v439_v32, %v442_v31 }
 0x282   : > { %v446_v34 = vsel %vm1598_vm4, %v445_v33, %v436_v22 }
 0x283   : > { %451 = vrot.lane.b32.xlu0 %v446_v34, %s1485_s16  ;;  %448 = vrot.lane.b32.xlu1 %v446_v34, %s1486_s17 }
 0x2f5   : > { %v452_v37 = vpop.permute.xlu0 %451  ;;  %v449_v38 = vpop.permute.xlu1 %448 }
 0x2f6   : > { %v455_v39 = vsel %vm454_vm5, %v449_v38, %v452_v37 }
 0x2f7   : > { %v456_v40 = vsel %vm1607_vm6, %v455_v39, %v446_v34 }
 0x2f8   : > { %461 = vrot.lane.b32.xlu0 %v456_v40, %s1487_s18  ;;  %458 = vrot.lane.b32.xlu1 %v456_v40, %s1488_s19 }
 0x36a   : > { %v462_v44 = vpop.permute.xlu0 %461  ;;  %v459_v45 = vpop.permute.xlu1 %458 }
 0x36b   : > { %v465_v47 = vsel %vm464_vm7, %v459_v45, %v462_v44 }
 0x36c   : > { %v466_v48 = vsel %vm1616_vm8, %v465_v47, %v456_v40 }
 0x36d   : > { %v467_v49 = vadd.f32 %v1270_v46, %v466_v48 }
 0x36f   : > { %v468_v50 = vsel %vm331_vm1, %v467_v49, -inf }
 0x370   : > { %469 = vmax.xlane.f32.xlu1 %v468_v50 }
 0x381   : > { %486 = vrot.lane.b32.xlu1 %v1580_v11, %s1489_s20 }
 0x385   : > { %537 = vrot.lane.b32.xlu1 %v1580_v11, %s1490_s23 }
 0x3f9   : > { %v470_v51 = vpop.xlane.xlu1 %469 }
 0x3fa   : > { %v471_v52 = vsub.f32 %v467_v49, %v470_v51 }
 0x3fc   : > { %v472_v53 = vmul.f32 1.442695, %v471_v52 }
 0x3fd   : > { %v487_v54 = vpop.permute.xlu1 %486 }
 0x3fe   : > { %1446 = vpow2.f32 %v472_v53  ;;  %v493_v55 = vsel %vm491_vm9, %v487_v54, 0 }
 0x3ff   : > { %1343 = vmatpush3.bf16.msra.mxu1 %v493_v55 }
 0x400   : > { %1354 = vmatprep.subr.bf16.mxu1 %v1478_v1 }
 0x401   : > { %v538_v56 = vpop.permute.xlu1 %537 }
 0x402   : > { %v543_v57 = vsel %vm331_vm1, %v538_v56, 0 }
 0x403   : > { %1349 = vmatpush3.bf16.xpose.msra.mxu0 %v543_v57 }
 0x404   : > { %1360 = vmatprep.subr.bf16.mxu0 %v1478_v1 }
 0x40b   : > { %v1447_v58 = vpop.eup %1446 }
 0x40c   : > { %v474_v59 = vsel %vm331_vm1, %v1447_v58, 0.0 }
 0x40d   : > { %475 = vadd.xlane.f32.xlu0 %v474_v59 }
 0x496   : > { %v476_v60 = vpop.xlane.xlu0 %475 }
 0x497   : > { %1448 = vrcp.f32 %v476_v60 }
 0x4a4   : > { %v1449_v61 = vpop.eup %1448 }
 0x4a5   : > { %v478_v62 = vmul.f32 %v1449_v61, %v1447_v58 }
 0x4a7   : > { %v479_v63 = vsel %vm331_vm1, %v478_v62, 0.0 }
 0x4a8   : > { %480 = vadd.xlane.f32.xlu0 %v479_v63 }
 0x4be   : > { %535 = vrot.lane.b32.xlu0 %v1580_v11, %s1491_s24 }
 0x531   : > { %v481_v0 = vpop.xlane.xlu0 %480 }
 0x532   : > { %v482_v2 = vadd.f32 1e-08, %v481_v0 }
 0x534   : > { %1450 = vrcp.f32 %v482_v2 }
 0x535   : > { %v536_v3 = vpop.permute.xlu0 %535 }
 0x536   : > { %1351 = vmatmul.mubr.msk.bf16.vlgmr.msra.gmra.mxu0 %vm331_vm1, %v536_v3 }
 0x537   : > { %1362 = vmatprep.mubr.msk.bf16.mxu0 %vm1479_vm0, %v1478_v1 }
 0x541   : > { %v1451_v4 = vpop.eup %1450 }
 0x542   : > { %v484_v5 = vmul.f32 %v1451_v4, %v478_v62 }
 0x544   : > { %v485_v7 = vpack.c.bf16 %v484_v5, %v484_v5 }
 0x546   : > { %1345 = vmatmul.mubr.msk.bf16.vlgmr.msra.gmra.mxu1 %vm331_vm1, %v485_v7 }
 0x547   : > { %1355 = vmatpush3.bf16.xpose.msra.mxu1 %v1570_v6  ;;  %1356 = vmatprep.mubr.msk.bf16.mxu1 %vm1479_vm0, %v1478_v1 }
 0x548   : > { %1366 = vmatprep.subr.bf16.mxu1 %v1478_v1 }
 0x54e   : > { %1357 = vmatmul.mubr.msk.bf16.vlgmr.msra.gmra.mxu1 %vm331_vm1, %v536_v3 }
 0x54f   : > { %1368 = vmatprep.mubr.msk.bf16.mxu1 %vm1479_vm0, %v1478_v1 }
 0x5f6   : > { %v579_v8 = vpop.f32.mrf.mxu0 }
 0x5f7   : > { %v585_v33 = vmul.f32 0.35355338, %v579_v8 }
 0x5f8   : > { %v1352_v9 = vpop.f32.mrf.mxu0 }
 0x5f9   : > { %v1275_v37 = vclamps-f32 %v585_v33, 100000.0 }
 0x5fa   : > { %v582_v10 = vpop.f32.mrf.mxu0 }
 0x5fc   : > { %v1353_v12 = vpop.f32.mrf.mxu0 }
 0x606   : > { %v1644_v13 = vpop.f32.mrf.mxu1 }
 0x608   : > { %v1346_v14 = vpop.f32.mrf.mxu1 }
 0x60a   : > { %v532_v15 = vpop.f32.mrf.mxu1 }
 0x60c   : > { %v1347_v16 = vpop.f32.mrf.mxu1 }
 0x60e   : > { %v622_v17 = vpop.f32.mrf.mxu1 }
 0x60f   : > { %632 = vrot.lane.b32.xlu0 %v622_v17, %s1481_s12  ;;  %629 = vrot.lane.b32.xlu1 %v622_v17, %s1482_s13 }
 0x610   : > { %v1358_v18 = vpop.f32.mrf.mxu1 }
 0x612   : > { %v625_v19 = vpop.f32.mrf.mxu1 }
 0x614   : > { %v1359_v20 = vpop.f32.mrf.mxu1 }
 0x681   : > { %v633_v21 = vpop.permute.xlu0 %632  ;;  %v630_v22 = vpop.permute.xlu1 %629 }
 0x682   : > { %v635_v23 = vsel %vm331_vm1, %v630_v22, %v633_v21 }
 0x683   : > { %640 = vrot.lane.b32.xlu0 %v635_v23, %s1483_s14  ;;  %637 = vrot.lane.b32.xlu1 %v635_v23, %s1484_s15 }
 0x6f5   : > { %v641_v24 = vpop.permute.xlu0 %640  ;;  %v638_v25 = vpop.permute.xlu1 %637 }
 0x6f6   : > { %v643_v26 = vsel %vm444_vm3, %v638_v25, %v641_v24 }
 0x6f7   : > { %v644_v27 = vsel %vm1598_vm4, %v643_v26, %v635_v23 }
 0x6f8   : > { %649 = vrot.lane.b32.xlu0 %v644_v27, %s1485_s16  ;;  %646 = vrot.lane.b32.xlu1 %v644_v27, %s1486_s17 }
 0x76a   : > { %v650_v28 = vpop.permute.xlu0 %649  ;;  %v647_v29 = vpop.permute.xlu1 %646 }
 0x76b   : > { %v652_v31 = vsel %vm454_vm5, %v647_v29, %v650_v28 }
 0x76c   : > { %v653_v32 = vsel %vm1607_vm6, %v652_v31, %v644_v27 }
 0x76d   : > { %658 = vrot.lane.b32.xlu0 %v653_v32, %s1487_s18  ;;  %655 = vrot.lane.b32.xlu1 %v653_v32, %s1488_s19 }
 0x7df   : > { %v659_v34 = vpop.permute.xlu0 %658  ;;  %v656_v35 = vpop.permute.xlu1 %655 }
 0x7e0   : > { %v661_v38 = vsel %vm464_vm7, %v656_v35, %v659_v34 }
 0x7e1   : > { %v662_v39 = vsel %vm1616_vm8, %v661_v38, %v653_v32 }
 0x7e2   : > { %v663_v40 = vadd.f32 %v1275_v37, %v662_v39 }
 0x7e4   : > { %v664_v41 = vsel %vm331_vm1, %v663_v40, -inf }
 0x7e5   : > { %665 = vmax.xlane.f32.xlu1 %v664_v41 }
 0x7f6   : > { %682 = vrot.lane.b32.xlu1 %v1580_v11, %s1492_s25 }
 0x7fa   : > { %732 = vrot.lane.b32.xlu1 %v1580_v11, %s1493_s26 }
 0x86e   : > { %v666_v42 = vpop.xlane.xlu1 %665 }
 0x86f   : > { %v667_v44 = vsub.f32 %v663_v40, %v666_v42 }
 0x871   : > { %v668_v45 = vmul.f32 1.442695, %v667_v44 }
 0x872   : > { %v683_v46 = vpop.permute.xlu1 %682 }
 0x873   : > { %1452 = vpow2.f32 %v668_v45  ;;  %v688_v47 = vsel %vm491_vm9, %v683_v46, 0 }
 0x874   : > { %1361 = vmatpush3.bf16.msra.mxu0 %v688_v47 }
 0x875   : > { %1372 = vmatprep.subr.bf16.mxu0 %v1478_v1 }
 0x876   : > { %v733_v48 = vpop.permute.xlu1 %732 }
 0x877   : > { %v738_v49 = vsel %vm331_vm1, %v733_v48, 0 }
 0x878   : > { %1367 = vmatpush3.bf16.xpose.msra.mxu1 %v738_v49 }
 0x879   : > { %1378 = vmatprep.subr.bf16.mxu1 %v1478_v1 }
 0x880   : > { %v1453_v50 = vpop.eup %1452 }
 0x881   : > { %v670_v51 = vsel %vm331_vm1, %v1453_v50, 0.0 }
 0x882   : > { %671 = vadd.xlane.f32.xlu0 %v670_v51 }
 0x90b   : > { %v672_v52 = vpop.xlane.xlu0 %671 }
 0x90c   : > { %1454 = vrcp.f32 %v672_v52 }
 0x919   : > { %v1455_v53 = vpop.eup %1454 }
 0x91a   : > { %v674_v54 = vmul.f32 %v1455_v53, %v1453_v50 }
 0x91c   : > { %v675_v55 = vsel %vm331_vm1, %v674_v54, 0.0 }
 0x91d   : > { %676 = vadd.xlane.f32.xlu0 %v675_v55 }
 0x933   : > { %730 = vrot.lane.b32.xlu0 %v1580_v11, %s1494_s27 }
 0x9a6   : > { %v677_v56 = vpop.xlane.xlu0 %676 }
 0x9a7   : > { %v678_v57 = vadd.f32 1e-08, %v677_v56 }
 0x9a9   : > { %1456 = vrcp.f32 %v678_v57 }
 0x9aa   : > { %v731_v58 = vpop.permute.xlu0 %730 }
 0x9ab   : > { %1369 = vmatmul.mubr.msk.bf16.vlgmr.msra.gmra.mxu1 %vm331_vm1, %v731_v58 }
 0x9ac   : > { %1380 = vmatprep.mubr.msk.bf16.mxu1 %vm1479_vm0, %v1478_v1 }
 0x9b6   : > { %v1457_v59 = vpop.eup %1456 }
 0x9b7   : > { %v680_v60 = vmul.f32 %v1457_v59, %v674_v54 }
 0x9b9   : > { %v681_v61 = vpack.c.bf16 %v680_v60, %v680_v60 }
 0x9bb   : > { %1363 = vmatmul.mubr.msk.bf16.vlgmr.msra.gmra.mxu0 %vm331_vm1, %v681_v61 }
 0x9bc   : > { %1373 = vmatpush3.bf16.xpose.msra.mxu0 %v1570_v6  ;;  %1374 = vmatprep.mubr.msk.bf16.mxu0 %vm1479_vm0, %v1478_v1 }
 0x9bd   : > { %1384 = vmatprep.subr.bf16.mxu0 %v1478_v1 }
 0x9c3   : > { %1375 = vmatmul.mubr.msk.bf16.vlgmr.msra.gmra.mxu0 %vm331_vm1, %v731_v58 }
 0x9c4   : > { %1386 = vmatprep.mubr.msk.bf16.mxu0 %vm1479_vm0, %v1478_v1 }
 0xa6b   : > { %v774_v62 = vpop.f32.mrf.mxu1 }
 0xa6c   : > { %v780_v25 = vmul.f32 0.35355338, %v774_v62 }
 0xa6d   : > { %v1370_v63 = vpop.f32.mrf.mxu1 }
 0xa6e   : > { %v1279_v28 = vclamps-f32 %v780_v25, 100000.0 }
 0xa6f   : > { %v777_v0 = vpop.f32.mrf.mxu1 }
 0xa71   : > { %v1371_v2 = vpop.f32.mrf.mxu1 }
 0xa7b   : > { %v1685_v3 = vpop.f32.mrf.mxu0 }
 0xa7d   : > { %v1364_v4 = vpop.f32.mrf.mxu0 }
 0xa7f   : > { %v727_v5 = vpop.f32.mrf.mxu0 }
 0xa81   : > { %v1365_v7 = vpop.f32.mrf.mxu0 }
 0xa83   : > { %v817_v8 = vpop.f32.mrf.mxu0 }
 0xa84   : > { %827 = vrot.lane.b32.xlu0 %v817_v8, %s1481_s12  ;;  %824 = vrot.lane.b32.xlu1 %v817_v8, %s1482_s13 }
 0xa85   : > { %v1376_v9 = vpop.f32.mrf.mxu0 }
 0xa87   : > { %v820_v10 = vpop.f32.mrf.mxu0 }
 0xa89   : > { %v1377_v12 = vpop.f32.mrf.mxu0 }
 0xaf6   : > { %v828_v14 = vpop.permute.xlu0 %827  ;;  %v825_v15 = vpop.permute.xlu1 %824 }
 0xaf7   : > { %v830_v16 = vsel %vm331_vm1, %v825_v15, %v828_v14 }
 0xaf8   : > { %835 = vrot.lane.b32.xlu0 %v830_v16, %s1483_s14  ;;  %832 = vrot.lane.b32.xlu1 %v830_v16, %s1484_s15 }
 0xb6a   : > { %v836_v17 = vpop.permute.xlu0 %835  ;;  %v833_v18 = vpop.permute.xlu1 %832 }
 0xb6b   : > { %v838_v19 = vsel %vm444_vm3, %v833_v18, %v836_v17 }
 0xb6c   : > { %v839_v20 = vsel %vm1598_vm4, %v838_v19, %v830_v16 }
 0xb6d   : > { %844 = vrot.lane.b32.xlu0 %v839_v20, %s1485_s16  ;;  %841 = vrot.lane.b32.xlu1 %v839_v20, %s1486_s17 }
 0xbdf   : > { %v845_v21 = vpop.permute.xlu0 %844  ;;  %v842_v22 = vpop.permute.xlu1 %841 }
 0xbe0   : > { %v847_v23 = vsel %vm454_vm5, %v842_v22, %v845_v21 }
 0xbe1   : > { %v848_v24 = vsel %vm1607_vm6, %v847_v23, %v839_v20 }
 0xbe2   : > { %853 = vrot.lane.b32.xlu0 %v848_v24, %s1487_s18  ;;  %850 = vrot.lane.b32.xlu1 %v848_v24, %s1488_s19 }
 0xc54   : > { %v854_v26 = vpop.permute.xlu0 %853  ;;  %v851_v27 = vpop.permute.xlu1 %850 }
 0xc55   : > { %v856_v29 = vsel %vm464_vm7, %v851_v27, %v854_v26 }
 0xc56   : > { %v857_v31 = vsel %vm1616_vm8, %v856_v29, %v848_v24 }
 0xc57   : > { %v858_v32 = vadd.f32 %v1279_v28, %v857_v31 }
 0xc59   : > { %v859_v33 = vsel %vm331_vm1, %v858_v32, -inf }
 0xc5a   : > { %860 = vmax.xlane.f32.xlu1 %v859_v33 }
 0xc6b   : > { %877 = vrot.lane.b32.xlu1 %v1580_v11, %s1495_s28 }
 0xc6f   : > { %927 = vrot.lane.b32.xlu1 %v1580_v11, %s1496_s30 }
 0xce3   : > { %v861_v34 = vpop.xlane.xlu1 %860 }
 0xce4   : > { %v862_v35 = vsub.f32 %v858_v32, %v861_v34 }
 0xce6   : > { %v863_v37 = vmul.f32 1.442695, %v862_v35 }
 0xce7   : > { %v878_v38 = vpop.permute.xlu1 %877 }
 0xce8   : > { %1458 = vpow2.f32 %v863_v37  ;;  %v883_v39 = vsel %vm491_vm9, %v878_v38, 0 }
 0xce9   : > { %1379 = vmatpush3.bf16.msra.mxu1 %v883_v39 }
 0xcea   : > { %1390 = vmatprep.subr.bf16.mxu1 %v1478_v1 }
 0xceb   : > { %v928_v40 = vpop.permute.xlu1 %927 }
 0xcec   : > { %v933_v41 = vsel %vm331_vm1, %v928_v40, 0  ;;  %v1444_v40 = vld [vmem:[%s1777_s3 + $0x8] sm:$0xff]  }
 0xced   : > { %1385 = vmatpush3.bf16.xpose.msra.mxu0 %v933_v41  ;;  %v1445_v41 = vld [vmem:[%s1777_s3] sm:$0xff]  }
 0xcee   : > { %1396 = vmatprep.subr.bf16.mxu0 %v1478_v1 }
 0xcf5   : > { %v1459_v42 = vpop.eup %1458 }
 0xcf6   : > { %v865_v44 = vsel %vm331_vm1, %v1459_v42, 0.0 }
 0xcf7   : > { %866 = vadd.xlane.f32.xlu0 %v865_v44 }
 0xd80   : > { %v867_v45 = vpop.xlane.xlu0 %866 }
 0xd81   : > { %1460 = vrcp.f32 %v867_v45 }
 0xd8e   : > { %v1461_v46 = vpop.eup %1460 }
 0xd8f   : > { %v869_v47 = vmul.f32 %v1461_v46, %v1459_v42 }
 0xd91   : > { %v870_v48 = vsel %vm331_vm1, %v869_v47, 0.0 }
 0xd92   : > { %871 = vadd.xlane.f32.xlu0 %v870_v48 }
 0xda8   : > { %925 = vrot.lane.b32.xlu0 %v1580_v11, %s1497_s7 }
 0xe1b   : > { %v872_v49 = vpop.xlane.xlu0 %871 }
 0xe1c   : > { %v873_v50 = vadd.f32 1e-08, %v872_v49 }
 0xe1e   : > { %1462 = vrcp.f32 %v873_v50 }
 0xe1f   : > { %v926_v51 = vpop.permute.xlu0 %925 }
 0xe20   : > { %1387 = vmatmul.mubr.msk.bf16.vlgmr.msra.gmra.mxu0 %vm331_vm1, %v926_v51 }
 0xe21   : > { %1398 = vmatprep.mubr.msk.bf16.mxu0 %vm1479_vm0, %v1478_v1 }
 0xe2b   : > { %v1463_v52 = vpop.eup %1462 }
 0xe2c   : > { %v875_v53 = vmul.f32 %v1463_v52, %v869_v47 }
 0xe2e   : > { %v876_v54 = vpack.c.bf16 %v875_v53, %v875_v53 }
 0xe30   : > { %1381 = vmatmul.mubr.msk.bf16.vlgmr.msra.gmra.mxu1 %vm331_vm1, %v876_v54 }
 0xe31   : > { %1391 = vmatpush3.bf16.xpose.msra.mxu1 %v1570_v6  ;;  %1392 = vmatprep.mubr.msk.bf16.mxu1 %vm1479_vm0, %v1478_v1 }
 0xe32   : > { %1402 = vmatprep.subr.bf16.mxu1 %v1478_v1 }
 0xe38   : > { %1393 = vmatmul.mubr.msk.bf16.vlgmr.msra.gmra.mxu1 %vm331_vm1, %v926_v51 }
 0xe39   : > { %1406 = vmatprep.mubr.msk.bf16.mxu1 %vm1479_vm0, %v1478_v1  ;;  %1403 = vmatpush3.bf16.msra.mxu1 %v1444_v40 }
 0xe3a   : > { %1404 = vmatprep.subr.bf16.mxu1 %v1478_v1  ;;  %v1286_v1 = vld [vmem:[%s1778_s4] ss:$0 sm:$0xff] }
 0xe3d   : > { %1405 = vmatpush3.bf16.msra.mxu1 %v1445_v41 }
 0xee0   : > { %v969_v55 = vpop.f32.mrf.mxu0 }
 0xee1   : > { %v975_v18 = vmul.f32 0.35355338, %v969_v55 }
 0xee2   : > { %v1388_v56 = vpop.f32.mrf.mxu0 }
 0xee3   : > { %v1283_v30 = vclamps-f32 %v975_v18, 100000.0 }
 0xee4   : > { %v972_v57 = vpop.f32.mrf.mxu0 }
 0xee6   : > { %v1389_v58 = vpop.f32.mrf.mxu0 }
 0xef0   : > { %v919_v59 = vpop.f32.mrf.mxu1 }
 0xef2   : > { %v1382_v60 = vpop.f32.mrf.mxu1 }
 0xef4   : > { %v922_v61 = vpop.f32.mrf.mxu1 }
 0xef6   : > { %v1383_v62 = vpop.f32.mrf.mxu1 }
 0xef8   : > { %v1012_v63 = vpop.f32.mrf.mxu1 }
 0xef9   : > { %1022 = vrot.lane.b32.xlu0 %v1012_v63, %s1481_s12  ;;  %1019 = vrot.lane.b32.xlu1 %v1012_v63, %s1482_s13 }
 0xefa   : > { %v1394_v6 = vpop.f32.mrf.mxu1 }
 0xefc   : > { %v1015_v0 = vpop.f32.mrf.mxu1 }
 0xefe   : > { %v1395_v2 = vpop.f32.mrf.mxu1 }
 0xf6b   : > { %v1023_v4 = vpop.permute.xlu0 %1022  ;;  %v1020_v5 = vpop.permute.xlu1 %1019 }
 0xf6c   : > { %v1025_v7 = vsel %vm331_vm1, %v1020_v5, %v1023_v4 }
 0xf6d   : > { %1030 = vrot.lane.b32.xlu0 %v1025_v7, %s1483_s14  ;;  %1027 = vrot.lane.b32.xlu1 %v1025_v7, %s1484_s15 }
 0xfdf   : > { %v1031_v8 = vpop.permute.xlu0 %1030  ;;  %v1028_v9 = vpop.permute.xlu1 %1027 }
 0xfe0   : > { %v1033_v10 = vsel %vm444_vm3, %v1028_v9, %v1031_v8 }
 0xfe1   : > { %v1034_v12 = vsel %vm1598_vm4, %v1033_v10, %v1025_v7 }
 0xfe2   : > { %1039 = vrot.lane.b32.xlu0 %v1034_v12, %s1485_s16  ;;  %1036 = vrot.lane.b32.xlu1 %v1034_v12, %s1486_s17 }
0x1054   : > { %v1040_v14 = vpop.permute.xlu0 %1039  ;;  %v1037_v15 = vpop.permute.xlu1 %1036 }
0x1055   : > { %v1042_v16 = vsel %vm454_vm5, %v1037_v15, %v1040_v14 }
0x1056   : > { %v1043_v17 = vsel %vm1607_vm6, %v1042_v16, %v1034_v12 }
0x1057   : > { %1048 = vrot.lane.b32.xlu0 %v1043_v17, %s1487_s18  ;;  %1045 = vrot.lane.b32.xlu1 %v1043_v17, %s1488_s19  ;;  %s246_s19 = scalar_lea.vmem %s1780_s6, %s1263_s29 }
0x10c9   : > { %v1049_v19 = vpop.permute.xlu0 %1048  ;;  %v1046_v20 = vpop.permute.xlu1 %1045 }
0x10ca   : > { %v1051_v21 = vsel %vm464_vm7, %v1046_v20, %v1049_v19 }
0x10cb   : > { %v1052_v22 = vsel %vm1616_vm8, %v1051_v21, %v1043_v17 }
0x10cc   : > { %v1053_v23 = vadd.f32 %v1283_v30, %v1052_v22 }
0x10ce   : > { %v1054_v24 = vsel %vm331_vm1, %v1053_v23, -inf }
0x10cf   : > { %1055 = vmax.xlane.f32.xlu1 %v1054_v24 }
0x10e0   : > { %1072 = vrot.lane.b32.xlu1 %v1580_v11, %s1498_s8 }
0x10e4   : > { %1125 = vrot.lane.b32.xlu1 %v919_v59, %s1499_s9 }
0x1158   : > { %v1056_v36 = vpop.xlane.xlu1 %1055 }
0x1159   : > { %v1057_v25 = vsub.f32 %v1053_v23, %v1056_v36 }
0x115b   : > { %v1058_v26 = vmul.f32 1.442695, %v1057_v25 }
0x115c   : > { %v1073_v27 = vpop.permute.xlu1 %1072 }
0x115d   : > { %1464 = vpow2.f32 %v1058_v26  ;;  %v1078_v28 = vsel %vm491_vm9, %v1073_v27, 0 }
0x115e   : > { %1397 = vmatpush3.bf16.msra.mxu0 %v1078_v28 }
0x1160   : > { %v1126_v47 = vpop.permute.xlu1 %1125 }
0x116a   : > { %v1465_v29 = vpop.eup %1464 }
0x116b   : > { %v1060_v43 = vsel %vm331_vm1, %v1465_v29, 0.0 }
0x116c   : > { %1061 = vadd.xlane.f32.xlu0 %v1060_v43 }
0x11f5   : > { %v1062_v31 = vpop.xlane.xlu0 %1061 }
0x11f6   : > { %1466 = vrcp.f32 %v1062_v31 }
0x1203   : > { %v1467_v32 = vpop.eup %1466 }
0x1204   : > { %v1064_v33 = vmul.f32 %v1467_v32, %v1465_v29 }
0x1206   : > { %v1065_v11 = vsel %vm331_vm1, %v1064_v33, 0.0 }
0x1207   : > { %1066 = vadd.xlane.f32.xlu0 %v1065_v11 }
0x121d   : > { %1121 = vrot.lane.b32.xlu0 %v1685_v3, %s1481_s12  ;;  %s1500_s12 = smov 24  }
0x1290   : > { %v1067_v34 = vpop.xlane.xlu0 %1066 }
0x1291   : > { %v1068_v35 = vadd.f32 1e-08, %v1067_v34 }
0x1293   : > { %1468 = vrcp.f32 %v1068_v35 }
0x1294   : > { %v1122_v46 = vpop.permute.xlu0 %1121 }
0x1295   : > { %v1132_v48 = vsel %vm331_vm1, %v1644_v13, %v1122_v46 }
0x1296   : > { %v1134_v49 = vsel %vm1133_vm10, %v1132_v48, %v1126_v47 }
0x12a0   : > { %v1469_v37 = vpop.eup %1468 }
0x12a1   : > { %v1070_v38 = vmul.f32 %v1469_v37, %v1064_v33 }
0x12a3   : > { %v1071_v39 = vpack.c.bf16 %v1070_v38, %v1070_v38 }
0x12a5   : > { %1399 = vmatmul.mubr.msk.bf16.vlgmr.msra.gmra.mxu0 %vm331_vm1, %v1071_v39 }
0x1365   : > { %v1114_v3 = vpop.f32.mrf.mxu0 }
0x1366   : > { %1129 = vrot.lane.b32.xlu1 %v1114_v3, %s1500_s12 }
0x1367   : > { %v1400_v42 = vpop.f32.mrf.mxu0 }
0x1369   : > { %v1117_v44 = vpop.f32.mrf.mxu0 }
0x136b   : > { %v1401_v45 = vpop.f32.mrf.mxu0 }
0x13d8   : > { %v1130_v50 = vpop.permute.xlu1 %1129 }
0x13d9   : > { %v1136_v51 = vsel %vm1135_vm11, %v1134_v49, %v1130_v50 }
0x13da   : > { %v1137_v52 = vpack.c.bf16 %v1136_v51, %v1136_v51 }
0x13dc   : > { %1407 = vmatmul.mubr.msk.bf16.vlgmr.msra.gmra.mxu1 %vm273_vm2, %v1137_v52 }
0x149c   : > { %v1198_v53 = vpop.f32.mrf.mxu1 }
0x149d   : > { %v1199_v54 = vadd.f32 %v1286_v1, %v1198_v53 }
0x149e   : > { %v1408_v13 = vpop.f32.mrf.mxu1 }
0x149f   : > { %1204 = vst.msk [vmem:[%s246_s19] sm:$0xff] %vm273_vm2, %v1199_v54 }
0x14a0   : > { %v1201_v55 = vpop.f32.mrf.mxu1 }
0x14a2   : > { %v1409_v56 = vpop.f32.mrf.mxu1 }
0x14a3 PF: > { %s16_s21 = sadd.s32 1, %s1476_s21  }
0x14a4   : > { %p13_p4 = scmp.ge.s32.totalorder %s16_s21, 4  }
0x14a6   :  { %15 = sbr.rel (!%p13_p4) target bundleno = 1 (0x1), region = 74 }

// kernel: time_frequency_attention.6
= control target key start
LH: loop header
LB: loop body
LE: loop exit
PB: predicated region body
PF: predicated region fallthrough
CT: control target
= control target key end

     0   :  { %s1544_s21 = smov 0   ;;  %s1783_s0 = inlined_call_operand.vmem [shape: f32[2,5,32], index: 0, kind: input, shape index: {}]   ;;  %s1784_s1 = inlined_call_operand.vmem [shape: bf16[32,96], index: 1, kind: input, shape index: {}]   ;;  %s1785_s2 = inlined_call_operand.vmem [shape: f32[1,96], index: 2, kind: input, shape index: {}]   ;;  %s1786_s3 = inlined_call_operand.vmem [shape: bf16[32,32], index: 3, kind: input, shape index: {}]   ;;  %s1787_s4 = inlined_call_operand.vmem [shape: f32[1,32], index: 4, kind: input, shape index: {}]   ;;  %s1788_s5 = inlined_call_operand.vmem [shape: bf16[9,8], index: 5, kind: input, shape index: {}]   ;;  %s1789_s6 = inlined_call_operand.vmem [shape: f32[2,5,32], index: 6, kind: output, shape index: {}]  }
   0x1 LB: > { %s1264_s22 = sadd.s32 4294967295, %s1483_s21   ;;  %p1268_p0 = scmp.ge.s32.totalorder %s1483_s21, 1  ;;  %s1483_s21 = sphi %s1544_s21, %s16_s21  }
   0x2   : > { %p211_p1 = scmp.lt.s32.totalorder %s1483_s21, 3 }
   0x4   : > { %p212_p2 = pnand %p1268_p0, %p211_p1 }
   0x5   : > { %p239_p3 = scmp.lt.s32.totalorder (!%p212_p2), %s1264_s22, 1  ;;  %s1487_s11 = smov (!%p212_p2), 96  }
   0x6   : > { %215 = sbr.rel (%p212_p2) target bundleno = 5283 (0x14a3), region = 44  ;;  %s1488_s12 = smov (!%p212_p2), 5  }
   0x7   : > { %s1489_s13 = smov (!%p212_p2), 124   ;;  %s1490_s14 = smov (!%p212_p2), 1  }
   0x8   : > { %s1491_s15 = smov (!%p212_p2), 120   ;;  %s1492_s16 = smov (!%p212_p2), 2  }
   0x9   : > { %s1493_s17 = smov (!%p212_p2), 121   ;;  %s1494_s18 = smov (!%p212_p2), 4  }
   0xa   : > { %s1495_s19 = smov (!%p212_p2), 123   ;;  %s1496_s20 = smov (!%p212_p2), 64  }
   0xb   : > { %v1448_v0 = vld [vmem:[%s1784_s1 + $0x8] sm:$0xff]   ;;  %v1485_v1 = vmov 0.0   ;;  %v1449_v2 = vld [vmem:[%s1784_s1] sm:$0xff]   ;;  %vm1486_vm0 = vmmov 0   ;;  %s1797_s22 = smov (!%p239_p3, %s1264_s22), 1  ;;  %vm331_vm1 = vcmask 64512   ;;  %v320_v27 = vlaneseq }
   0xc   : > { %1328 = vmatprep.subr.bf16.mxu0 %v1485_v1  ;;  %1336 = vmatprep.subr.bf16.mxu1 %v1485_v1  ;;  %v1450_v3 = vld [vmem:[%s1788_s5] sm:$0x1f]   ;;  %s1269_s29 = sshll.u32 %s1797_s22, 3  ;;  %vm273_vm2 = vcmask 261120   ;;  %vm436_vm3 = vcmask 39936   ;;  %vm445_vm4 = vcmask 7168  }
   0xd   : > { %1329 = vmatpush3.bf16.msra.mxu0 %v1448_v0  ;;  %1332 = vmatprep.mubr.msk.bf16.mxu0 %vm1486_vm0, %v1485_v1  ;;  %s242_s8 = scalar_lea.vmem %s1783_s0, %s1269_s29  ;;  %v1578_v6 = vsel %vm331_vm1, %v1450_v3, 0  ;;  %v1271_v7 = vld [vmem:[%s1785_s2] ss:$0 sm:$0xff]  ;;  %v321_v28 = vshrl.u32 %v320_v27, 7  ;;  %vm455_vm6 = vcmask 15360   ;;  %vm465_vm8 = vcmask 31744  }
   0xe   : > { %1330 = vmatprep.subr.bf16.mxu0 %v1485_v1  ;;  %1338 = vmatprep.mubr.msk.bf16.mxu1 %vm1486_vm0, %v1485_v1  ;;  %v248_v4 = vld [vmem:[%s242_s8] sm:$0x1f]  ;;  %vm469_vm10 = vcmask 36864   ;;  %s1497_s23 = smov 88   ;;  %vm493_vm11 = vcmask 1041408   ;;  %vm494_vm12 = vcmask 1042432  }
   0xf   : > { %v249_v5 = vpack.c.bf16 %v248_v4, %v248_v4  ;;  %v322_v29 = vand.u32 1, %v321_v28  ;;  %v324_v35 = vand.u32 2, %v321_v28  ;;  %v326_v41 = vand.u32 4, %v321_v28  ;;  %s1499_s24 = smov 56   ;;  %s1500_s25 = smov 80  }
  0x10   : > { %v1498_v51 = vmov 65535   ;;  %s1501_s26 = smov 112   ;;  %s1502_s27 = smov 48   ;;  %vm1138_vm13 = vcmask 130048   ;;  %vm1140_vm14 = vcmask 195584   ;;  %vm1209_vm15 = vcmask 258048  }
  0x11   : > { %1331 = vmatpush3.bf16.msra.mxu0 %v1449_v2  ;;  %vm1606_vm5 = vcmp.ne.s32.totalorder %v322_v29, 0  ;;  %vm1615_vm7 = vcmp.ne.s32.totalorder %v324_v35, 0  ;;  %vm1624_vm9 = vcmp.ne.s32.totalorder %v326_v41, 0  ;;  %v495_v52 = vsel %vm493_vm11, 4294967295, %v1498_v51  ;;  %s1503_s28 = smov 72   ;;  %s1504_s30 = smov 104  }
  0x12   : > { %1342 = vmatprep.subr.bf16.mxu0 %v1485_v1  ;;  %v1634_v55 = vsel %vm494_vm12, %v495_v52, 0  ;;  %s1505_s7 = smov 40   ;;  %s1506_s8 = smov 16  }
  0x13   : > { %s1507_s9 = smov 8  }
  0x14   : > { %1333 = vmatmul.mubr.msk.bf16.vlgmr.msra.gmra.mxu0 %vm273_vm2, %v249_v5 }
  0x15   : > { %1343 = vmatpush3.bf16.xpose.msra.mxu0 %v1578_v6  ;;  %1344 = vmatprep.mubr.msk.bf16.mxu0 %vm1486_vm0, %v1485_v1 }
  0x16   : > { %1354 = vmatprep.subr.bf16.mxu0 %v1485_v1 }
  0xd4   : > { %v311_v8 = vpop.f32.mrf.mxu0 }
  0xd5   : > { %v312_v9 = vadd.f32 %v1271_v7, %v311_v8 }
  0xd6   : > { %v1334_v10 = vpop.f32.mrf.mxu0 }
  0xd7   : > { %v1588_v11 = vpack.c.bf16 %v312_v9, %v312_v9 }
  0xd8   : > { %v314_v12 = vpop.f32.mrf.mxu0 }
  0xd9   : > { %329 = vrot.lane.b32.xlu0 %v1588_v11, %s1487_s11  ;;  %1345 = vmatmul.mubr.msk.bf16.vlgmr.msra.gmra.mxu0 %vm331_vm1, %v1588_v11 }
  0xda   : > { %v1335_v13 = vpop.f32.mrf.mxu0  ;;  %1356 = vmatprep.mubr.msk.bf16.mxu0 %vm1486_vm0, %v1485_v1 }
 0x14b   : > { %v330_v14 = vpop.permute.xlu0 %329 }
 0x14c   : > { %v336_v15 = vsel %vm331_vm1, %v330_v14, 0 }
 0x14d   : > { %1337 = vmatpush3.bf16.xpose.msra.mxu1 %v336_v15 }
 0x14e   : > { %1348 = vmatprep.subr.bf16.mxu1 %v1485_v1 }
 0x154   : > { %1339 = vmatmul.mubr.msk.bf16.vlgmr.msra.gmra.mxu1 %vm331_vm1, %v1588_v11 }
 0x155   : > { %1350 = vmatprep.mubr.msk.bf16.mxu1 %vm1486_vm0, %v1485_v1 }
 0x199   : > { %v423_v16 = vpop.f32.mrf.mxu0 }
 0x19a   : > { %433 = vrot.lane.b32.xlu1 %v423_v16, %s1488_s12  ;;  %430 = vrot.lane.b32.xlu0 %v423_v16, %s1489_s13 }
 0x19b   : > { %v1346_v17 = vpop.f32.mrf.mxu0 }
 0x19d   : > { %v426_v18 = vpop.f32.mrf.mxu0 }
 0x19f   : > { %v1347_v19 = vpop.f32.mrf.mxu0 }
 0x20c   : > { %v434_v20 = vpop.permute.xlu1 %433  ;;  %v431_v21 = vpop.permute.xlu0 %430 }
 0x20d   : > { %v437_v22 = vsel %vm436_vm3, %v431_v21, %v434_v20 }
 0x20e   : > { %442 = vrot.lane.b32.xlu0 %v437_v22, %s1490_s14  ;;  %439 = vrot.lane.b32.xlu1 %v437_v22, %s1491_s15 }
 0x214   : > { %v372_v23 = vpop.f32.mrf.mxu1 }
 0x215   : > { %v378_v42 = vmul.f32 0.35355338, %v372_v23 }
 0x216   : > { %v1340_v24 = vpop.f32.mrf.mxu1 }
 0x217   : > { %v1276_v46 = vclamps-f32 %v378_v42, 100000.0 }
 0x218   : > { %v375_v25 = vpop.f32.mrf.mxu1 }
 0x21a   : > { %v1341_v26 = vpop.f32.mrf.mxu1 }
 0x280   : > { %v443_v31 = vpop.permute.xlu0 %442  ;;  %v440_v32 = vpop.permute.xlu1 %439 }
 0x281   : > { %v446_v33 = vsel %vm445_vm4, %v440_v32, %v443_v31 }
 0x282   : > { %v447_v34 = vsel %vm1606_vm5, %v446_v33, %v437_v22 }
 0x283   : > { %452 = vrot.lane.b32.xlu0 %v447_v34, %s1492_s16  ;;  %449 = vrot.lane.b32.xlu1 %v447_v34, %s1493_s17 }
 0x2f5   : > { %v453_v37 = vpop.permute.xlu0 %452  ;;  %v450_v38 = vpop.permute.xlu1 %449 }
 0x2f6   : > { %v456_v39 = vsel %vm455_vm6, %v450_v38, %v453_v37 }
 0x2f7   : > { %v457_v40 = vsel %vm1615_vm7, %v456_v39, %v447_v34 }
 0x2f8   : > { %462 = vrot.lane.b32.xlu0 %v457_v40, %s1494_s18  ;;  %459 = vrot.lane.b32.xlu1 %v457_v40, %s1495_s19 }
 0x36a   : > { %v463_v44 = vpop.permute.xlu0 %462  ;;  %v460_v45 = vpop.permute.xlu1 %459 }
 0x36b   : > { %v466_v47 = vsel %vm465_vm8, %v460_v45, %v463_v44 }
 0x36c   : > { %v467_v48 = vsel %vm1624_vm9, %v466_v47, %v457_v40 }
 0x36d   : > { %v468_v49 = vadd.f32 %v1276_v46, %v467_v48 }
 0x36f   : > { %v470_v50 = vsel %vm469_vm10, %v468_v49, -inf }
 0x370   : > { %471 = vmax.xlane.f32.xlu1 %v470_v50 }
 0x381   : > { %488 = vrot.lane.b32.xlu1 %v1588_v11, %s1496_s20 }
 0x385   : > { %542 = vrot.lane.b32.xlu1 %v1588_v11, %s1497_s23 }
 0x3f9   : > { %v472_v53 = vpop.xlane.xlu1 %471 }
 0x3fa   : > { %v473_v54 = vsub.f32 %v468_v49, %v472_v53 }
 0x3fc   : > { %v474_v56 = vmul.f32 1.442695, %v473_v54 }
 0x3fd   : > { %v489_v57 = vpop.permute.xlu1 %488 }
 0x3fe   : > { %1453 = vpow2.f32 %v474_v56  ;;  %v498_v58 = vand.u32 %v1634_v55, %v489_v57 }
 0x400   : > { %1349 = vmatpush3.bf16.msra.mxu1 %v498_v58 }
 0x401   : > { %v543_v59 = vpop.permute.xlu1 %542  ;;  %1360 = vmatprep.subr.bf16.mxu1 %v1485_v1 }
 0x402   : > { %v548_v60 = vsel %vm331_vm1, %v543_v59, 0 }
 0x403   : > { %1355 = vmatpush3.bf16.xpose.msra.mxu0 %v548_v60 }
 0x404   : > { %1366 = vmatprep.subr.bf16.mxu0 %v1485_v1 }
 0x40b   : > { %v1454_v61 = vpop.eup %1453 }
 0x40c   : > { %v476_v62 = vsel %vm469_vm10, %v1454_v61, 0.0 }
 0x40d   : > { %477 = vadd.xlane.f32.xlu0 %v476_v62 }
 0x496   : > { %v478_v63 = vpop.xlane.xlu0 %477 }
 0x497   : > { %1455 = vrcp.f32 %v478_v63 }
 0x4a4   : > { %v1456_v0 = vpop.eup %1455 }
 0x4a5   : > { %v480_v2 = vmul.f32 %v1456_v0, %v1454_v61 }
 0x4a7   : > { %v481_v3 = vsel %vm469_vm10, %v480_v2, 0.0 }
 0x4a8   : > { %482 = vadd.xlane.f32.xlu0 %v481_v3 }
 0x4be   : > { %540 = vrot.lane.b32.xlu0 %v1588_v11, %s1491_s15 }
 0x531   : > { %v483_v4 = vpop.xlane.xlu0 %482 }
 0x532   : > { %v484_v5 = vadd.f32 1e-08, %v483_v4 }
 0x534   : > { %1457 = vrcp.f32 %v484_v5 }
 0x535   : > { %v541_v7 = vpop.permute.xlu0 %540 }
 0x536   : > { %1357 = vmatmul.mubr.msk.bf16.vlgmr.msra.gmra.mxu0 %vm331_vm1, %v541_v7 }
 0x537   : > { %1368 = vmatprep.mubr.msk.bf16.mxu0 %vm1486_vm0, %v1485_v1 }
 0x541   : > { %v1458_v8 = vpop.eup %1457 }
 0x542   : > { %v486_v9 = vmul.f32 %v1458_v8, %v480_v2 }
 0x544   : > { %v487_v10 = vpack.c.bf16 %v486_v9, %v486_v9 }
 0x546   : > { %1351 = vmatmul.mubr.msk.bf16.vlgmr.msra.gmra.mxu1 %vm436_vm3, %v487_v10 }
 0x547   : > { %1361 = vmatpush3.bf16.xpose.msra.mxu1 %v1578_v6  ;;  %1362 = vmatprep.mubr.msk.bf16.mxu1 %vm1486_vm0, %v1485_v1 }
 0x548   : > { %1372 = vmatprep.subr.bf16.mxu1 %v1485_v1 }
 0x54e   : > { %1363 = vmatmul.mubr.msk.bf16.vlgmr.msra.gmra.mxu1 %vm331_vm1, %v541_v7 }
 0x54f   : > { %1374 = vmatprep.mubr.msk.bf16.mxu1 %vm1486_vm0, %v1485_v1 }
 0x5f6   : > { %v584_v12 = vpop.f32.mrf.mxu0 }
 0x5f7   : > { %v590_v37 = vmul.f32 0.35355338, %v584_v12 }
 0x5f8   : > { %v1358_v13 = vpop.f32.mrf.mxu0 }
 0x5f9   : > { %v1281_v40 = vclamps-f32 %v590_v37, 100000.0 }
 0x5fa   : > { %v587_v14 = vpop.f32.mrf.mxu0 }
 0x5fc   : > { %v1359_v15 = vpop.f32.mrf.mxu0 }
 0x606   : > { %v1655_v16 = vpop.f32.mrf.mxu1 }
 0x608   : > { %v1352_v17 = vpop.f32.mrf.mxu1 }
 0x60a   : > { %v537_v18 = vpop.f32.mrf.mxu1 }
 0x60c   : > { %v1353_v19 = vpop.f32.mrf.mxu1 }
 0x60e   : > { %v627_v20 = vpop.f32.mrf.mxu1 }
 0x60f   : > { %637 = vrot.lane.b32.xlu0 %v627_v20, %s1488_s12  ;;  %634 = vrot.lane.b32.xlu1 %v627_v20, %s1489_s13 }
 0x610   : > { %v1364_v21 = vpop.f32.mrf.mxu1 }
 0x612   : > { %v630_v22 = vpop.f32.mrf.mxu1 }
 0x614   : > { %v1365_v23 = vpop.f32.mrf.mxu1 }
 0x681   : > { %v638_v24 = vpop.permute.xlu0 %637  ;;  %v635_v25 = vpop.permute.xlu1 %634 }
 0x682   : > { %v640_v26 = vsel %vm436_vm3, %v635_v25, %v638_v24 }
 0x683   : > { %645 = vrot.lane.b32.xlu0 %v640_v26, %s1490_s14  ;;  %642 = vrot.lane.b32.xlu1 %v640_v26, %s1491_s15 }
 0x6f5   : > { %v646_v27 = vpop.permute.xlu0 %645  ;;  %v643_v28 = vpop.permute.xlu1 %642 }
 0x6f6   : > { %v648_v29 = vsel %vm445_vm4, %v643_v28, %v646_v27 }
 0x6f7   : > { %v649_v31 = vsel %vm1606_vm5, %v648_v29, %v640_v26 }
 0x6f8   : > { %654 = vrot.lane.b32.xlu0 %v649_v31, %s1492_s16  ;;  %651 = vrot.lane.b32.xlu1 %v649_v31, %s1493_s17 }
 0x76a   : > { %v655_v32 = vpop.permute.xlu0 %654  ;;  %v652_v33 = vpop.permute.xlu1 %651 }
 0x76b   : > { %v657_v34 = vsel %vm455_vm6, %v652_v33, %v655_v32 }
 0x76c   : > { %v658_v35 = vsel %vm1615_vm7, %v657_v34, %v649_v31 }
 0x76d   : > { %663 = vrot.lane.b32.xlu0 %v658_v35, %s1494_s18  ;;  %660 = vrot.lane.b32.xlu1 %v658_v35, %s1495_s19 }
 0x7df   : > { %v664_v38 = vpop.permute.xlu0 %663  ;;  %v661_v39 = vpop.permute.xlu1 %660 }
 0x7e0   : > { %v666_v41 = vsel %vm465_vm8, %v661_v39, %v664_v38 }
 0x7e1   : > { %v667_v42 = vsel %vm1624_vm9, %v666_v41, %v658_v35 }
 0x7e2   : > { %v668_v44 = vadd.f32 %v1281_v40, %v667_v42 }
 0x7e4   : > { %v669_v45 = vsel %vm469_vm10, %v668_v44, -inf }
 0x7e5   : > { %670 = vmax.xlane.f32.xlu1 %v669_v45 }
 0x7f6   : > { %687 = vrot.lane.b32.xlu1 %v1588_v11, %s1499_s24 }
 0x7fa   : > { %737 = vrot.lane.b32.xlu1 %v1588_v11, %s1500_s25 }
 0x86e   : > { %v671_v46 = vpop.xlane.xlu1 %670 }
 0x86f   : > { %v672_v47 = vsub.f32 %v668_v44, %v671_v46 }
 0x871   : > { %v673_v48 = vmul.f32 1.442695, %v672_v47 }
 0x872   : > { %v688_v49 = vpop.permute.xlu1 %687 }
 0x873   : > { %1459 = vpow2.f32 %v673_v48  ;;  %v693_v50 = vand.u32 %v688_v49, %v1634_v55 }
 0x875   : > { %1367 = vmatpush3.bf16.msra.mxu0 %v693_v50 }
 0x876   : > { %v738_v51 = vpop.permute.xlu1 %737  ;;  %1378 = vmatprep.subr.bf16.mxu0 %v1485_v1 }
 0x877   : > { %v743_v52 = vsel %vm331_vm1, %v738_v51, 0 }
 0x878   : > { %1373 = vmatpush3.bf16.xpose.msra.mxu1 %v743_v52 }
 0x879   : > { %1384 = vmatprep.subr.bf16.mxu1 %v1485_v1 }
 0x880   : > { %v1460_v53 = vpop.eup %1459 }
 0x881   : > { %v675_v54 = vsel %vm469_vm10, %v1460_v53, 0.0 }
 0x882   : > { %676 = vadd.xlane.f32.xlu0 %v675_v54 }
 0x90b   : > { %v677_v56 = vpop.xlane.xlu0 %676 }
 0x90c   : > { %1461 = vrcp.f32 %v677_v56 }
 0x919   : > { %v1462_v57 = vpop.eup %1461 }
 0x91a   : > { %v679_v58 = vmul.f32 %v1462_v57, %v1460_v53 }
 0x91c   : > { %v680_v59 = vsel %vm469_vm10, %v679_v58, 0.0 }
 0x91d   : > { %681 = vadd.xlane.f32.xlu0 %v680_v59 }
 0x933   : > { %735 = vrot.lane.b32.xlu0 %v1588_v11, %s1501_s26 }
 0x9a6   : > { %v682_v60 = vpop.xlane.xlu0 %681 }
 0x9a7   : > { %v683_v61 = vadd.f32 1e-08, %v682_v60 }
 0x9a9   : > { %1463 = vrcp.f32 %v683_v61 }
 0x9aa   : > { %v736_v62 = vpop.permute.xlu0 %735 }
 0x9ab   : > { %1375 = vmatmul.mubr.msk.bf16.vlgmr.msra.gmra.mxu1 %vm331_vm1, %v736_v62 }
 0x9ac   : > { %1386 = vmatprep.mubr.msk.bf16.mxu1 %vm1486_vm0, %v1485_v1 }
 0x9b6   : > { %v1464_v63 = vpop.eup %1463 }
 0x9b7   : > { %v685_v0 = vmul.f32 %v1464_v63, %v679_v58 }
 0x9b9   : > { %v686_v2 = vpack.c.bf16 %v685_v0, %v685_v0 }
 0x9bb   : > { %1369 = vmatmul.mubr.msk.bf16.vlgmr.msra.gmra.mxu0 %vm436_vm3, %v686_v2 }
 0x9bc   : > { %1379 = vmatpush3.bf16.xpose.msra.mxu0 %v1578_v6  ;;  %1380 = vmatprep.mubr.msk.bf16.mxu0 %vm1486_vm0, %v1485_v1 }
 0x9bd   : > { %1390 = vmatprep.subr.bf16.mxu0 %v1485_v1 }
 0x9c3   : > { %1381 = vmatmul.mubr.msk.bf16.vlgmr.msra.gmra.mxu0 %vm331_vm1, %v736_v62 }
 0x9c4   : > { %1392 = vmatprep.mubr.msk.bf16.mxu0 %vm1486_vm0, %v1485_v1 }
 0xa6b   : > { %v779_v3 = vpop.f32.mrf.mxu1 }
 0xa6c   : > { %v785_v29 = vmul.f32 0.35355338, %v779_v3 }
 0xa6d   : > { %v1376_v4 = vpop.f32.mrf.mxu1 }
 0xa6e   : > { %v1285_v33 = vclamps-f32 %v785_v29, 100000.0 }
 0xa6f   : > { %v782_v5 = vpop.f32.mrf.mxu1 }
 0xa71   : > { %v1377_v7 = vpop.f32.mrf.mxu1 }
 0xa7b   : > { %v1696_v8 = vpop.f32.mrf.mxu0 }
 0xa7d   : > { %v1370_v9 = vpop.f32.mrf.mxu0 }
 0xa7f   : > { %v732_v10 = vpop.f32.mrf.mxu0 }
 0xa81   : > { %v1371_v12 = vpop.f32.mrf.mxu0 }
 0xa83   : > { %v822_v13 = vpop.f32.mrf.mxu0 }
 0xa84   : > { %832 = vrot.lane.b32.xlu0 %v822_v13, %s1488_s12  ;;  %829 = vrot.lane.b32.xlu1 %v822_v13, %s1489_s13 }
 0xa85   : > { %v1382_v14 = vpop.f32.mrf.mxu0 }
 0xa87   : > { %v825_v15 = vpop.f32.mrf.mxu0 }
 0xa89   : > { %v1383_v17 = vpop.f32.mrf.mxu0 }
 0xaf6   : > { %v833_v18 = vpop.permute.xlu0 %832  ;;  %v830_v19 = vpop.permute.xlu1 %829 }
 0xaf7   : > { %v835_v20 = vsel %vm436_vm3, %v830_v19, %v833_v18 }
 0xaf8   : > { %840 = vrot.lane.b32.xlu0 %v835_v20, %s1490_s14  ;;  %837 = vrot.lane.b32.xlu1 %v835_v20, %s1491_s15 }
 0xb6a   : > { %v841_v21 = vpop.permute.xlu0 %840  ;;  %v838_v22 = vpop.permute.xlu1 %837 }
 0xb6b   : > { %v843_v23 = vsel %vm445_vm4, %v838_v22, %v841_v21 }
 0xb6c   : > { %v844_v24 = vsel %vm1606_vm5, %v843_v23, %v835_v20 }
 0xb6d   : > { %849 = vrot.lane.b32.xlu0 %v844_v24, %s1492_s16  ;;  %846 = vrot.lane.b32.xlu1 %v844_v24, %s1493_s17 }
 0xbdf   : > { %v850_v25 = vpop.permute.xlu0 %849  ;;  %v847_v26 = vpop.permute.xlu1 %846 }
 0xbe0   : > { %v852_v27 = vsel %vm455_vm6, %v847_v26, %v850_v25 }
 0xbe1   : > { %v853_v28 = vsel %vm1615_vm7, %v852_v27, %v844_v24 }
 0xbe2   : > { %858 = vrot.lane.b32.xlu0 %v853_v28, %s1494_s18  ;;  %855 = vrot.lane.b32.xlu1 %v853_v28, %s1495_s19 }
 0xc54   : > { %v859_v31 = vpop.permute.xlu0 %858  ;;  %v856_v32 = vpop.permute.xlu1 %855 }
 0xc55   : > { %v861_v34 = vsel %vm465_vm8, %v856_v32, %v859_v31 }
 0xc56   : > { %v862_v35 = vsel %vm1624_vm9, %v861_v34, %v853_v28 }
 0xc57   : > { %v863_v37 = vadd.f32 %v1285_v33, %v862_v35 }
 0xc59   : > { %v864_v38 = vsel %vm469_vm10, %v863_v37, -inf }
 0xc5a   : > { %865 = vmax.xlane.f32.xlu1 %v864_v38 }
 0xc6b   : > { %882 = vrot.lane.b32.xlu1 %v1588_v11, %s1502_s27 }
 0xc6f   : > { %932 = vrot.lane.b32.xlu1 %v1588_v11, %s1503_s28 }
 0xce3   : > { %v866_v39 = vpop.xlane.xlu1 %865 }
 0xce4   : > { %v867_v40 = vsub.f32 %v863_v37, %v866_v39 }
 0xce6   : > { %v868_v41 = vmul.f32 1.442695, %v867_v40 }
 0xce7   : > { %v883_v42 = vpop.permute.xlu1 %882 }
 0xce8   : > { %1465 = vpow2.f32 %v868_v41  ;;  %v888_v44 = vand.u32 %v883_v42, %v1634_v55 }
 0xcea   : > { %1385 = vmatpush3.bf16.msra.mxu1 %v888_v44 }
 0xceb   : > { %v933_v45 = vpop.permute.xlu1 %932  ;;  %1396 = vmatprep.subr.bf16.mxu1 %v1485_v1 }
 0xcec   : > { %v938_v46 = vsel %vm331_vm1, %v933_v45, 0  ;;  %v1451_v45 = vld [vmem:[%s1786_s3 + $0x8] sm:$0xff]  }
 0xced   : > { %1391 = vmatpush3.bf16.xpose.msra.mxu0 %v938_v46  ;;  %v1452_v46 = vld [vmem:[%s1786_s3] sm:$0xff]  }
 0xcee   : > { %1402 = vmatprep.subr.bf16.mxu0 %v1485_v1 }
 0xcf5   : > { %v1466_v47 = vpop.eup %1465 }
 0xcf6   : > { %v870_v48 = vsel %vm469_vm10, %v1466_v47, 0.0 }
 0xcf7   : > { %871 = vadd.xlane.f32.xlu0 %v870_v48 }
 0xd80   : > { %v872_v49 = vpop.xlane.xlu0 %871 }
 0xd81   : > { %1467 = vrcp.f32 %v872_v49 }
 0xd8e   : > { %v1468_v50 = vpop.eup %1467 }
 0xd8f   : > { %v874_v51 = vmul.f32 %v1468_v50, %v1466_v47 }
 0xd91   : > { %v875_v52 = vsel %vm469_vm10, %v874_v51, 0.0 }
 0xd92   : > { %876 = vadd.xlane.f32.xlu0 %v875_v52 }
 0xda8   : > { %930 = vrot.lane.b32.xlu0 %v1588_v11, %s1504_s30 }
 0xe1b   : > { %v877_v53 = vpop.xlane.xlu0 %876 }
 0xe1c   : > { %v878_v54 = vadd.f32 1e-08, %v877_v53 }
 0xe1e   : > { %1469 = vrcp.f32 %v878_v54 }
 0xe1f   : > { %v931_v56 = vpop.permute.xlu0 %930 }
 0xe20   : > { %1393 = vmatmul.mubr.msk.bf16.vlgmr.msra.gmra.mxu0 %vm331_vm1, %v931_v56 }
 0xe21   : > { %1404 = vmatprep.mubr.msk.bf16.mxu0 %vm1486_vm0, %v1485_v1 }
 0xe2b   : > { %v1470_v57 = vpop.eup %1469 }
 0xe2c   : > { %v880_v58 = vmul.f32 %v1470_v57, %v874_v51 }
 0xe2e   : > { %v881_v59 = vpack.c.bf16 %v880_v58, %v880_v58 }
 0xe30   : > { %1387 = vmatmul.mubr.msk.bf16.vlgmr.msra.gmra.mxu1 %vm436_vm3, %v881_v59 }
 0xe31   : > { %1397 = vmatpush3.bf16.xpose.msra.mxu1 %v1578_v6  ;;  %1398 = vmatprep.mubr.msk.bf16.mxu1 %vm1486_vm0, %v1485_v1 }
 0xe32   : > { %1408 = vmatprep.subr.bf16.mxu1 %v1485_v1 }
 0xe38   : > { %1399 = vmatmul.mubr.msk.bf16.vlgmr.msra.gmra.mxu1 %vm331_vm1, %v931_v56 }
 0xe39   : > { %1412 = vmatprep.mubr.msk.bf16.mxu1 %vm1486_vm0, %v1485_v1  ;;  %1409 = vmatpush3.bf16.msra.mxu1 %v1451_v45 }
 0xe3a   : > { %1410 = vmatprep.subr.bf16.mxu1 %v1485_v1  ;;  %v1292_v1 = vld [vmem:[%s1787_s4] ss:$0 sm:$0xff] }
 0xe3d   : > { %1411 = vmatpush3.bf16.msra.mxu1 %v1452_v46 }
 0xee0   : > { %v974_v60 = vpop.f32.mrf.mxu0 }
 0xee1   : > { %v980_v23 = vmul.f32 0.35355338, %v974_v60 }
 0xee2   : > { %v1394_v61 = vpop.f32.mrf.mxu0 }
 0xee3   : > { %v1289_v30 = vclamps-f32 %v980_v23, 100000.0 }
 0xee4   : > { %v977_v62 = vpop.f32.mrf.mxu0 }
 0xee6   : > { %v1395_v63 = vpop.f32.mrf.mxu0 }
 0xef0   : > { %v924_v0 = vpop.f32.mrf.mxu1 }
 0xef2   : > { %v1388_v2 = vpop.f32.mrf.mxu1 }
 0xef4   : > { %v927_v3 = vpop.f32.mrf.mxu1 }
 0xef6   : > { %v1389_v4 = vpop.f32.mrf.mxu1 }
 0xef8   : > { %v1017_v5 = vpop.f32.mrf.mxu1 }
 0xef9   : > { %1027 = vrot.lane.b32.xlu0 %v1017_v5, %s1488_s12  ;;  %1024 = vrot.lane.b32.xlu1 %v1017_v5, %s1489_s13 }
 0xefa   : > { %v1400_v6 = vpop.f32.mrf.mxu1 }
 0xefc   : > { %v1020_v7 = vpop.f32.mrf.mxu1 }
 0xefe   : > { %v1401_v9 = vpop.f32.mrf.mxu1 }
 0xf6b   : > { %v1028_v10 = vpop.permute.xlu0 %1027  ;;  %v1025_v12 = vpop.permute.xlu1 %1024 }
 0xf6c   : > { %v1030_v13 = vsel %vm436_vm3, %v1025_v12, %v1028_v10 }
 0xf6d   : > { %1035 = vrot.lane.b32.xlu0 %v1030_v13, %s1490_s14  ;;  %1032 = vrot.lane.b32.xlu1 %v1030_v13, %s1491_s15  ;;  %s1508_s14 = smov 24  }
 0xfdf   : > { %v1036_v14 = vpop.permute.xlu0 %1035  ;;  %v1033_v15 = vpop.permute.xlu1 %1032 }
 0xfe0   : > { %v1038_v17 = vsel %vm445_vm4, %v1033_v15, %v1036_v14 }
 0xfe1   : > { %v1039_v18 = vsel %vm1606_vm5, %v1038_v17, %v1030_v13 }
 0xfe2   : > { %1044 = vrot.lane.b32.xlu0 %v1039_v18, %s1492_s16  ;;  %1041 = vrot.lane.b32.xlu1 %v1039_v18, %s1493_s17 }
0x1054   : > { %v1045_v19 = vpop.permute.xlu0 %1044  ;;  %v1042_v20 = vpop.permute.xlu1 %1041 }
0x1055   : > { %v1047_v21 = vsel %vm455_vm6, %v1042_v20, %v1045_v19 }
0x1056   : > { %v1048_v22 = vsel %vm1615_vm7, %v1047_v21, %v1039_v18 }
0x1057   : > { %1053 = vrot.lane.b32.xlu0 %v1048_v22, %s1494_s18  ;;  %1050 = vrot.lane.b32.xlu1 %v1048_v22, %s1495_s19  ;;  %s246_s19 = scalar_lea.vmem %s1789_s6, %s1269_s29 }
0x10c9   : > { %v1054_v24 = vpop.permute.xlu0 %1053  ;;  %v1051_v25 = vpop.permute.xlu1 %1050 }
0x10ca   : > { %v1056_v26 = vsel %vm465_vm8, %v1051_v25, %v1054_v24 }
0x10cb   : > { %v1057_v27 = vsel %vm1624_vm9, %v1056_v26, %v1048_v22 }
0x10cc   : > { %v1058_v28 = vadd.f32 %v1289_v30, %v1057_v27 }
0x10ce   : > { %v1059_v29 = vsel %vm469_vm10, %v1058_v28, -inf }
0x10cf   : > { %1060 = vmax.xlane.f32.xlu1 %v1059_v29 }
0x10e0   : > { %1077 = vrot.lane.b32.xlu1 %v1588_v11, %s1505_s7 }
0x10e4   : > { %1130 = vrot.lane.b32.xlu1 %v924_v0, %s1506_s8 }
0x1158   : > { %v1061_v36 = vpop.xlane.xlu1 %1060 }
0x1159   : > { %v1062_v31 = vsub.f32 %v1058_v28, %v1061_v36 }
0x115b   : > { %v1063_v32 = vmul.f32 1.442695, %v1062_v31 }
0x115c   : > { %v1078_v33 = vpop.permute.xlu1 %1077 }
0x115d   : > { %1471 = vpow2.f32 %v1063_v32  ;;  %v1083_v34 = vand.u32 %v1078_v33, %v1634_v55 }
0x115f   : > { %1403 = vmatpush3.bf16.msra.mxu0 %v1083_v34 }
0x1160   : > { %v1131_v51 = vpop.permute.xlu1 %1130 }
0x116a   : > { %v1472_v35 = vpop.eup %1471 }
0x116b   : > { %v1065_v43 = vsel %vm469_vm10, %v1472_v35, 0.0 }
0x116c   : > { %1066 = vadd.xlane.f32.xlu0 %v1065_v43 }
0x11f5   : > { %v1067_v37 = vpop.xlane.xlu0 %1066 }
0x11f6   : > { %1473 = vrcp.f32 %v1067_v37 }
0x1203   : > { %v1474_v38 = vpop.eup %1473 }
0x1204   : > { %v1069_v39 = vmul.f32 %v1474_v38, %v1472_v35 }
0x1206   : > { %v1070_v11 = vsel %vm469_vm10, %v1069_v39, 0.0 }
0x1207   : > { %1071 = vadd.xlane.f32.xlu0 %v1070_v11 }
0x121d   : > { %1126 = vrot.lane.b32.xlu0 %v1696_v8, %s1507_s9 }
0x1290   : > { %v1072_v40 = vpop.xlane.xlu0 %1071 }
0x1291   : > { %v1073_v41 = vadd.f32 1e-08, %v1072_v40 }
0x1293   : > { %1475 = vrcp.f32 %v1073_v41 }
0x1294   : > { %v1127_v50 = vpop.permute.xlu0 %1126 }
0x1295   : > { %v1137_v52 = vsel %vm331_vm1, %v1655_v16, %v1127_v50 }
0x1296   : > { %v1139_v53 = vsel %vm1138_vm13, %v1137_v52, %v1131_v51 }
0x12a0   : > { %v1476_v42 = vpop.eup %1475 }
0x12a1   : > { %v1075_v55 = vmul.f32 %v1476_v42, %v1069_v39 }
0x12a3   : > { %v1076_v44 = vpack.c.bf16 %v1075_v55, %v1075_v55 }
0x12a5   : > { %1405 = vmatmul.mubr.msk.bf16.vlgmr.msra.gmra.mxu0 %vm436_vm3, %v1076_v44 }
0x1365   : > { %v1119_v8 = vpop.f32.mrf.mxu0 }
0x1366   : > { %1134 = vrot.lane.b32.xlu1 %v1119_v8, %s1508_s14 }
0x1367   : > { %v1406_v47 = vpop.f32.mrf.mxu0 }
0x1369   : > { %v1122_v48 = vpop.f32.mrf.mxu0 }
0x136b   : > { %v1407_v49 = vpop.f32.mrf.mxu0 }
0x13d8   : > { %v1135_v54 = vpop.permute.xlu1 %1134 }
0x13d9   : > { %v1141_v56 = vsel %vm1140_vm14, %v1139_v53, %v1135_v54 }
0x13da   : > { %v1142_v57 = vpack.c.bf16 %v1141_v56, %v1141_v56 }
0x13dc   : > { %1413 = vmatmul.mubr.msk.bf16.vlgmr.msra.gmra.mxu1 %vm273_vm2, %v1142_v57 }
0x149c   : > { %v1203_v58 = vpop.f32.mrf.mxu1 }
0x149d   : > { %v1204_v16 = vadd.f32 %v1292_v1, %v1203_v58 }
0x149e   : > { %v1414_v59 = vpop.f32.mrf.mxu1 }
0x149f   : > { %1210 = vst.msk [vmem:[%s246_s19] sm:$0x1f] %vm1209_vm15, %v1204_v16 }
0x14a0   : > { %v1206_v60 = vpop.f32.mrf.mxu1 }
0x14a2   : > { %v1415_v61 = vpop.f32.mrf.mxu1 }
0x14a3 PF: > { %s16_s21 = sadd.s32 1, %s1483_s21  }
0x14a4   : > { %p13_p4 = scmp.ge.s32.totalorder %s16_s21, 4  }
0x14a6   :  { %15 = sbr.rel (!%p13_p4) target bundleno = 1 (0x1), region = 74 }

</bundles_post_ra>
